<compile_context>
chip_gen: v7x
topology: tpu7x:2x2x1
jax: 0.10.0
libtpu: 0.0.40
codegen_flags: <defaults>
</compile_context>

<pallas_src>
from functools import partial
import math

import jax
import jax.numpy as jnp
from jax.experimental import pallas as pl
from jax.experimental.pallas import tpu as pltpu

# ----------------------------------------------------------------------------
# Configuration (small synthetic sizes consistent with the module's __init__).
# ----------------------------------------------------------------------------
BATCH = 8
EMB_FEATURES = 64
LATENT_SIZE = 16
CAT_TRANS_TYPES_CNT = 8
CAT_TRANS_OPS_CNT = 8
CAT_TRANS_DESCS_CNT = 16
CAT_BANK_CODE_DEBTOR_CNT = 16
# module-level globals referenced by decode_parts in the original code:
CRED_EMBED_DIM = 8
DEBT_EMBED_DIM = 4

REMAIN_FEATURES = EMB_FEATURES - (
    2
    + CAT_TRANS_TYPES_CNT
    + CAT_TRANS_OPS_CNT
    + CAT_TRANS_DESCS_CNT
    + CAT_BANK_CODE_DEBTOR_CNT
)
assert REMAIN_FEATURES > 0
assert CRED_EMBED_DIM <= REMAIN_FEATURES and DEBT_EMBED_DIM <= REMAIN_FEATURES

HEAD_PAD = 16            # final head layer padded to a uniform 16 output lanes
PACKED_WIDTH = 128       # single lane-dense output slab (one f32 vreg at B=8)
FAN_WIDTH = 6 * 64 + 32  # 6 head first layers (64 each) + decoder first layer (32)

# column layout of the packed output slab
_COL_REMAIN = 0
_COL_LOGBAL = _COL_REMAIN + REMAIN_FEATURES            # 14
_COL_PERC = _COL_LOGBAL + 1                            # 15
_COL_TYPES = _COL_PERC + 1                             # 16
_COL_OPS = _COL_TYPES + CAT_TRANS_TYPES_CNT            # 24
_COL_DESCS = _COL_OPS + CAT_TRANS_OPS_CNT              # 32
_COL_DEBTOR = _COL_DESCS + CAT_TRANS_DESCS_CNT         # 48
_COL_MEAN = _COL_DEBTOR + CAT_BANK_CODE_DEBTOR_CNT     # 64
_COL_LOGVAR = _COL_MEAN + LATENT_SIZE                  # 80
_COL_Z = _COL_LOGVAR + LATENT_SIZE                     # 96
_COL_END = _COL_Z + LATENT_SIZE                        # 112
assert _COL_END <= PACKED_WIDTH

# head ordering (g index inside the kernel)
_HEAD_KEYS = (
    "decoder_log_balance",
    "decoder_perc_withdrawed",
    "decoder_trans_types",
    "decoder_trans_ops",
    "decoder_trans_descs",
    "decoder_bank_code_debtor",
)

# ---- bias slab row layout (static offsets) ----------------------------------
# wide slab: (6, 1024) f32
_BW_EB1 = 0        # encoder layer-1 bias, mean(512) || logvar(512)
_BW_EB2 = 1        # + g  (g=0 mean, g=1 logvar), width 256
_BW_BLAT = 3       # latent fan-out bias: 6 head L1 biases (6*64) || decoder L1 (32)
_BW_DB3 = 4        # decoder layer-3 bias (256)
_BW_DB4 = 5        # decoder layer-4 bias (256)
_BW_ROWS = 6
_BW_WIDTH = 1024

# narrow slab: (26, 128) f32
_BN_EB3 = 0        # + g, width 128
_BN_EB4 = 2        # + g, width 64
_BN_B16 = 4        # 8 rows of 16: [mean L5, logvar L5, head0..head5 final (padded)]
_BN_HB2 = 12       # + g, head layer-2 bias (64)
_BN_HB3 = 18       # + g, head layer-3 bias (64)
_BN_DB2 = 24       # decoder layer-2 bias (128)
_BN_DB5 = 25       # decoder layer-5 bias (14)
_BN_ROWS = 26
_BN_WIDTH = 128


# ----------------------------------------------------------------------------
# Fused Pallas kernel: the whole VAE forward in one launch, all in VMEM.
# ----------------------------------------------------------------------------
def _vae_fused_kernel(
    x_ref, eps_ref,
    ew1, ew2, ew3, ew4,     # encoder weights (L1 merged along N, L2-L4 stacked g=2)
    w16,                     # (8,64,16): [mean L5, logvar L5, head0..head5 final (padded)]
    wlat,                    # (16,416): [6 head L1 (6*64) | decoder L1 (32)]
    hw23,                    # (12,64,64): head L2 (rows 0..5), head L3 (rows 6..11)
    dw2, dw3, dw4, dw5,      # remain-decoder layers 2..5
    bw, bn,                  # bias slabs: (6,1024) f32, (26,128) f32
    out_ref,
):
    f32, bf16 = jnp.float32, jnp.bfloat16
    B = out_ref.shape[0]

    def dot(h, w):
        # bf16 MXU matmul with f32 accumulation
        return jnp.dot(h, w, preferred_element_type=f32)

    def sigmoid(h):
        return 1.0 / (1.0 + jnp.exp(-h))

    def softmax(h):
        m = jnp.max(h, axis=-1, keepdims=True)
        e = jnp.exp(h - m)
        return e / jnp.sum(e, axis=-1, keepdims=True)

    x = x_ref[...].astype(bf16)       # (B, EMB_FEATURES)
    eps = eps_ref[...]                # (B, LATENT_SIZE) f32

    # ---- encoders: layer 1 merged (mean || logvar), layers 2-5 stacked g=2 --
    h1 = jnp.tanh(dot(x, ew1[...]) + bw[_BW_EB1:_BW_EB1 + 1, :]).astype(bf16)  # (B,1024)
    enc = []
    for g in range(2):   # g=0 mean, g=1 logvar
        h = h1[:, 512 * g:512 * (g + 1)]
        h = jnp.tanh(dot(h, ew2[g]) + bw[_BW_EB2 + g:_BW_EB2 + g + 1, :256]).astype(bf16)
        h = jnp.tanh(dot(h, ew3[g]) + bn[_BN_EB3 + g:_BN_EB3 + g + 1, :128]).astype(bf16)
        h = jnp.tanh(dot(h, ew4[g]) + bn[_BN_EB4 + g:_BN_EB4 + g + 1, :64]).astype(bf16)
        enc.append(dot(h, w16[g]) + bn[_BN_B16 + g:_BN_B16 + g + 1, :LATENT_SIZE])
    lat_mean, lat_logvar = enc                         # (B, LATENT_SIZE) f32 each

    # ---- reparameterization (sample_norm), fused in-kernel ------------------
    lat_vec = lat_mean + jnp.exp(0.5 * lat_logvar) * eps
    z = lat_vec.astype(bf16)

    # ---- shared latent fan-out: 6 head first layers + decoder first layer ---
    fan = jnp.tanh(dot(z, wlat[...])
                   + bw[_BW_BLAT:_BW_BLAT + 1, :FAN_WIDTH]).astype(bf16)       # (B,416)

    # ---- 6 latent heads, layers 2..4 (stacked weights) ----------------------
    head_out = []
    for g in range(6):
        h = fan[:, 64 * g:64 * (g + 1)]
        h = jnp.tanh(dot(h, hw23[g]) + bn[_BN_HB2 + g:_BN_HB2 + g + 1, :64]).astype(bf16)
        h = jnp.tanh(dot(h, hw23[6 + g]) + bn[_BN_HB3 + g:_BN_HB3 + g + 1, :64]).astype(bf16)
        head_out.append(dot(h, w16[2 + g]) + bn[_BN_B16 + 2 + g:_BN_B16 + 3 + g, :HEAD_PAD])

    # ---- "remain features" decoder, layers 2..5 ------------------------------
    h = fan[:, 6 * 64:6 * 64 + 32]
    h = jnp.tanh(dot(h, dw2[...]) + bn[_BN_DB2:_BN_DB2 + 1, :128]).astype(bf16)
    h = jnp.tanh(dot(h, dw3[...]) + bw[_BW_DB3:_BW_DB3 + 1, :256]).astype(bf16)
    h = jnp.tanh(dot(h, dw4[...]) + bw[_BW_DB4:_BW_DB4 + 1, :256]).astype(bf16)
    remain = sigmoid(dot(h, dw5[...]) + bn[_BN_DB5:_BN_DB5 + 1, :REMAIN_FEATURES])

    # ---- pack everything into one lane-dense (B,128) slab: single store -----
    packed = jnp.concatenate(
        [
            remain,                                                  # 14
            head_out[0][:, 0:1],                                     # log_balance 1
            sigmoid(head_out[1][:, 0:1]),                            # perc 1
            softmax(head_out[2][:, :CAT_TRANS_TYPES_CNT]),           # 8
            softmax(head_out[3][:, :CAT_TRANS_OPS_CNT]),             # 8
            softmax(head_out[4][:, :CAT_TRANS_DESCS_CNT]),           # 16
            softmax(head_out[5][:, :CAT_BANK_CODE_DEBTOR_CNT]),      # 16
            lat_mean,                                                # 16
            lat_logvar,                                              # 16
            lat_vec,                                                 # 16
            jnp.zeros((B, PACKED_WIDTH - _COL_END), f32),            # pad 16
        ],
        axis=-1,
    )
    out_ref[...] = packed


# ----------------------------------------------------------------------------
# Parameter packing: 11 bf16 weight blobs + 2 f32 bias slabs (13 operands).
# ----------------------------------------------------------------------------
def pack_params(params):
    bf16, f32 = jnp.bfloat16, jnp.float32

    mean = params["mean"]                         # [(64,512),(512,256),(256,128),(128,64),(64,16)]
    logv = params["logvar"]
    heads = [params[k] for k in _HEAD_KEYS]       # each: [(16,64),(64,64),(64,64),(64,out)]
    dec = params["decoder"]                       # [(16,32),(32,128),(128,256),(256,256),(256,14)]

    def pad16_w(w):   # (64, out) -> (64, 16)
        return jnp.pad(w, ((0, 0), (0, HEAD_PAD - w.shape[1])))

    def pad16_b(b):
        return jnp.pad(b, (0, HEAD_PAD - b.shape[0]))

    # ---- weights -------------------------------------------------------------
    ew1 = jnp.concatenate([mean[0][0], logv[0][0]], axis=1).astype(bf16)    # (64,1024)
    ew2 = jnp.stack([mean[1][0], logv[1][0]]).astype(bf16)                  # (2,512,256)
    ew3 = jnp.stack([mean[2][0], logv[2][0]]).astype(bf16)                  # (2,256,128)
    ew4 = jnp.stack([mean[3][0], logv[3][0]]).astype(bf16)                  # (2,128,64)
    w16 = jnp.stack([mean[4][0], logv[4][0]]
                    + [pad16_w(h[3][0]) for h in heads]).astype(bf16)       # (8,64,16)
    wlat = jnp.concatenate([h[0][0] for h in heads] + [dec[0][0]],
                           axis=1).astype(bf16)                             # (16,416)
    hw23 = jnp.stack([h[1][0] for h in heads]
                     + [h[2][0] for h in heads]).astype(bf16)               # (12,64,64)
    dw2 = dec[1][0].astype(bf16)                                            # (32,128)
    dw3 = dec[2][0].astype(bf16)                                            # (128,256)
    dw4 = dec[3][0].astype(bf16)                                            # (256,256)
    dw5 = dec[4][0].astype(bf16)                                            # (256,14)

    # ---- bias slabs ------------------------------------------------------------
    def row(vec, width):
        vec = jnp.asarray(vec, f32)
        return jnp.pad(vec, (0, width - vec.shape[0]))[None, :]

    bias_wide = jnp.concatenate(
        [
            row(jnp.concatenate([mean[0][1], logv[0][1]]), _BW_WIDTH),                 # _BW_EB1
            row(mean[1][1], _BW_WIDTH),                                                # _BW_EB2+0
            row(logv[1][1], _BW_WIDTH),                                                # _BW_EB2+1
            row(jnp.concatenate([h[0][1] for h in heads] + [dec[0][1]]), _BW_WIDTH),   # _BW_BLAT
            row(dec[2][1], _BW_WIDTH),                                                 # _BW_DB3
            row(dec[3][1], _BW_WIDTH),                                                 # _BW_DB4
        ],
        axis=0,
    )
    assert bias_wide.shape == (_BW_ROWS, _BW_WIDTH)

    narrow_rows = []
    narrow_rows += [row(mean[2][1], _BN_WIDTH), row(logv[2][1], _BN_WIDTH)]            # _BN_EB3+g
    narrow_rows += [row(mean[3][1], _BN_WIDTH), row(logv[3][1], _BN_WIDTH)]            # _BN_EB4+g
    narrow_rows += [row(mean[4][1], _BN_WIDTH), row(logv[4][1], _BN_WIDTH)]            # _BN_B16+0,1
    narrow_rows += [row(pad16_b(h[3][1]), _BN_WIDTH) for h in heads]                   # _BN_B16+2+g
    narrow_rows += [row(h[1][1], _BN_WIDTH) for h in heads]                            # _BN_HB2+g
    narrow_rows += [row(h[2][1], _BN_WIDTH) for h in heads]                            # _BN_HB3+g
    narrow_rows += [row(dec[1][1], _BN_WIDTH)]                                         # _BN_DB2
    narrow_rows += [row(dec[4][1], _BN_WIDTH)]                                         # _BN_DB5
    bias_narrow = jnp.concatenate(narrow_rows, axis=0)
    assert bias_narrow.shape == (_BN_ROWS, _BN_WIDTH)

    return (ew1, ew2, ew3, ew4, w16, wlat, hw23, dw2, dw3, dw4, dw5,
            bias_wide, bias_narrow)


# ----------------------------------------------------------------------------
# Cost estimate (advisory hint for XLA scheduling of this tiny custom call).
# ----------------------------------------------------------------------------
def _cost_estimate(batch, packed_params):
    layer_kn = (
        [(EMB_FEATURES, 512), (512, 256), (256, 128), (128, 64), (64, LATENT_SIZE)] * 2
        + [(LATENT_SIZE, 64), (64, 64), (64, 64), (64, HEAD_PAD)] * 6
        + [(LATENT_SIZE, 32), (32, 128), (128, 256), (256, 256), (256, REMAIN_FEATURES)]
    )
    flops = 2 * batch * sum(k * n for k, n in layer_kn)
    # tanh / exp counts (rough)
    transcendentals = batch * (
        2 * (512 + 256 + 128 + 64)          # encoder tanhs
        + FAN_WIDTH + 6 * (64 + 64)         # head/decoder tanhs
        + 128 + 256 + 256                   # decoder tanhs
        + LATENT_SIZE                       # exp(0.5*logvar)
        + 2 * HEAD_PAD + 2 * CAT_TRANS_TYPES_CNT + 2 * CAT_TRANS_DESCS_CNT
        + REMAIN_FEATURES + 2               # softmax / sigmoid exps
    )
    bytes_accessed = sum(int(p.size) * p.dtype.itemsize for p in packed_params)
    bytes_accessed += batch * (EMB_FEATURES + LATENT_SIZE + PACKED_WIDTH) * 4
    return pl.CostEstimate(flops=int(flops),
                           transcendentals=int(transcendentals),
                           bytes_accessed=int(bytes_accessed))


# ----------------------------------------------------------------------------
# Forward pass (mirrors VAE.forward): one pallas_call, slicing in the wrapper.
# ----------------------------------------------------------------------------
def vae_forward(packed_params, x, eps):
    batch = x.shape[0]
    operands = (x, eps) + tuple(packed_params)
    vmem_spec = pl.BlockSpec(memory_space=pltpu.MemorySpace.VMEM)
    packed = pl.pallas_call(
        _vae_fused_kernel,
        out_shape=jax.ShapeDtypeStruct((batch, PACKED_WIDTH), jnp.float32),
        in_specs=[vmem_spec] * len(operands),
        out_specs=vmem_spec,
        cost_estimate=_cost_estimate(batch, packed_params),
    )(*operands)

    remain = packed[:, _COL_REMAIN:_COL_LOGBAL]
    cred_emb_id = remain[:, :CRED_EMBED_DIM]
    # NOTE: faithful to the original module, which also slices from column 0
    # (likely a bug upstream; kept for semantic parity).
    debt_emb_id = remain[:, :DEBT_EMBED_DIM]
    out_emb = (
        cred_emb_id,
        debt_emb_id,
        packed[:, _COL_LOGBAL:_COL_PERC],      # log_balance
        packed[:, _COL_PERC:_COL_TYPES],       # perc_withdrawed
        packed[:, _COL_TYPES:_COL_OPS],        # trans_types
        packed[:, _COL_OPS:_COL_DESCS],        # trans_ops
        packed[:, _COL_DESCS:_COL_DEBTOR],     # trans_descs
        packed[:, _COL_DEBTOR:_COL_MEAN],      # bank_code_debtor
    )
    lat_mean = packed[:, _COL_MEAN:_COL_LOGVAR]
    lat_logvar = packed[:, _COL_LOGVAR:_COL_Z]
    lat_vec = packed[:, _COL_Z:_COL_END]
    return out_emb, lat_mean, lat_logvar, lat_vec


# ----------------------------------------------------------------------------
# Deterministic parameter init (PyTorch nn.Linear-style uniform(-1/sqrt(fan_in)))
# ----------------------------------------------------------------------------
def _init_linear(key, fan_in, fan_out):
    kw, kb = jax.random.split(key)
    bound = 1.0 / math.sqrt(fan_in)
    w = jax.random.uniform(kw, (fan_in, fan_out), jnp.float32, -bound, bound)
    b = jax.random.uniform(kb, (fan_out,), jnp.float32, -bound, bound)
    return (w, b)


def _init_mlp(key, dims):
    keys = jax.random.split(key, len(dims) - 1)
    return [_init_linear(keys[i], dims[i], dims[i + 1]) for i in range(len(dims) - 1)]


def init_vae_params(key):
    ks = jax.random.split(key, 10)
    enc_dims = [EMB_FEATURES, 512, 256, 128, 64, LATENT_SIZE]
    onehot = lambda k, out: _init_mlp(k, [LATENT_SIZE, 64, 64, 64, out])
    return {
        "mean": _init_mlp(ks[0], enc_dims),
        "logvar": _init_mlp(ks[1], enc_dims),
        "decoder_trans_types": onehot(ks[2], CAT_TRANS_TYPES_CNT),
        "decoder_trans_ops": onehot(ks[3], CAT_TRANS_OPS_CNT),
        "decoder_trans_descs": onehot(ks[4], CAT_TRANS_DESCS_CNT),
        "decoder_bank_code_debtor": onehot(ks[5], CAT_BANK_CODE_DEBTOR_CNT),
        "decoder_log_balance": _init_mlp(ks[6], [LATENT_SIZE, 64, 64, 64, 1]),
        "decoder_perc_withdrawed": _init_mlp(ks[7], [LATENT_SIZE, 64, 64, 64, 1]),
        "decoder": _init_mlp(ks[8], [LATENT_SIZE, 32, 128, 256, 256, REMAIN_FEATURES]),
    }


# ----------------------------------------------------------------------------
# Pure-JAX reference (mimics the kernel's bf16 rounding of matmul inputs).
# ----------------------------------------------------------------------------
ENC_ACTS = ("tanh", "tanh", "tanh", "tanh", "none")
ONEHOT_ACTS = ("tanh", "tanh", "tanh", "softmax")
LOGBAL_ACTS = ("tanh", "tanh", "tanh", "none")
PERC_ACTS = ("tanh", "tanh", "tanh", "sigmoid")
DEC_ACTS = ("tanh", "tanh", "tanh", "tanh", "sigmoid")


def _r16(a):
    return a.astype(jnp.bfloat16).astype(jnp.float32)


def vae_forward_ref(params, x, eps):
    def mlp(h, layers, acts):
        for (w, b), act in zip(layers, acts):
            h = jnp.dot(_r16(h), _r16(w), preferred_element_type=jnp.float32) + b
            if act == "tanh":
                h = jnp.tanh(h)
            elif act == "sigmoid":
                h = jax.nn.sigmoid(h)
            elif act == "softmax":
                h = jax.nn.softmax(h, axis=-1)
        return h

    lat_mean = mlp(x, params["mean"], ENC_ACTS)
    lat_logvar = mlp(x, params["logvar"], ENC_ACTS)
    lat_vec = lat_mean + jnp.exp(0.5 * lat_logvar) * eps
    emb_ids = mlp(lat_vec, params["decoder"], DEC_ACTS)
    out_emb = (
        emb_ids[:, :CRED_EMBED_DIM],
        emb_ids[:, :DEBT_EMBED_DIM],
        mlp(lat_vec, params["decoder_log_balance"], LOGBAL_ACTS),
        mlp(lat_vec, params["decoder_perc_withdrawed"], PERC_ACTS),
        mlp(lat_vec, params["decoder_trans_types"], ONEHOT_ACTS),
        mlp(lat_vec, params["decoder_trans_ops"], ONEHOT_ACTS),
        mlp(lat_vec, params["decoder_trans_descs"], ONEHOT_ACTS),
        mlp(lat_vec, params["decoder_bank_code_debtor"], ONEHOT_ACTS),
    )
    return out_emb, lat_mean, lat_logvar, lat_vec


# ----------------------------------------------------------------------------
# Main
# ----------------------------------------------------------------------------
if __name__ == "__main__":
    key = jax.random.PRNGKey(0)
    k_params, k_x, k_eps = jax.random.split(key, 3)

    params = init_vae_params(k_params)
    packed_params = pack_params(params)
    x = jax.random.normal(k_x, (BATCH, EMB_FEATURES), jnp.float32)
    eps = jax.random.normal(k_eps, (BATCH, LATENT_SIZE), jnp.float32)

    fwd = jax.jit(partial(vae_forward, packed_params))
    out_emb, lat_mean, lat_logvar, lat_vec = fwd(x, eps)
    jax.block_until_ready((out_emb, lat_mean, lat_logvar, lat_vec))

    # shape sanity checks
    assert lat_mean.shape == (BATCH, LATENT_SIZE)
    assert lat_logvar.shape == (BATCH, LATENT_SIZE)
    assert lat_vec.shape == (BATCH, LATENT_SIZE)
    expected_dims = (
        CRED_EMBED_DIM,
        DEBT_EMBED_DIM,
        1,
        1,
        CAT_TRANS_TYPES_CNT,
        CAT_TRANS_OPS_CNT,
        CAT_TRANS_DESCS_CNT,
        CAT_BANK_CODE_DEBTOR_CNT,
    )
    for o, d in zip(out_emb, expected_dims):
        assert o.shape == (BATCH, d), (o.shape, d)

    # softmax heads sum to ~1 (exact division in-kernel)
    for idx in (4, 5, 6, 7):
        assert bool(jnp.allclose(jnp.sum(out_emb[idx], axis=-1), 1.0, atol=1e-2))

    # numerical check against a pure-JAX reference (loose tol: bf16 matmul inputs)
    ref_out_emb, ref_mean, ref_logvar, ref_z = vae_forward_ref(params, x, eps)

    def _close(a, b):
        return bool(jnp.allclose(a, b, atol=5e-2, rtol=5e-2))

    assert _close(lat_mean, ref_mean)
    assert _close(lat_logvar, ref_logvar)
    assert _close(lat_vec, ref_z)
    for o, r in zip(out_emb, ref_out_emb):
        assert _close(o, r), (o.shape, float(jnp.max(jnp.abs(o - r))))

    print("KERNEL_OK")
</pallas_src>

<mosaic_0001>
module attributes {stable_mosaic.version = 11 : i64} {
  func.func @_vae_fused_kernel(%arg0: memref<8x64xf32, #tpu.memory_space<vmem>>, %arg1: memref<8x16xf32, #tpu.memory_space<vmem>>, %arg2: memref<64x1024xbf16, #tpu.memory_space<vmem>>, %arg3: memref<2x512x256xbf16, #tpu.memory_space<vmem>>, %arg4: memref<2x256x128xbf16, #tpu.memory_space<vmem>>, %arg5: memref<2x128x64xbf16, #tpu.memory_space<vmem>>, %arg6: memref<8x64x16xbf16, #tpu.memory_space<vmem>>, %arg7: memref<16x416xbf16, #tpu.memory_space<vmem>>, %arg8: memref<12x64x64xbf16, #tpu.memory_space<vmem>>, %arg9: memref<32x128xbf16, #tpu.memory_space<vmem>>, %arg10: memref<128x256xbf16, #tpu.memory_space<vmem>>, %arg11: memref<256x256xbf16, #tpu.memory_space<vmem>>, %arg12: memref<256x14xbf16, #tpu.memory_space<vmem>>, %arg13: memref<6x1024xf32, #tpu.memory_space<vmem>>, %arg14: memref<26x128xf32, #tpu.memory_space<vmem>>, %arg15: memref<8x128xf32, #tpu.memory_space<vmem>>) attributes {dimension_semantics = [], scalar_prefetch = 0 : i64, scratch_operands = 0 : i64, tpu.core_type = #tpu.core_type<tc>} {
    %c0 = arith.constant 0 : index
    %c0_0 = arith.constant 0 : index
    %0 = vector.load %arg0[%c0, %c0_0] : memref<8x64xf32, #tpu.memory_space<vmem>>, vector<8x64xf32>
    %1 = arith.truncf %0 : vector<8x64xf32> to vector<8x64xbf16>
    %c0_1 = arith.constant 0 : index
    %c0_2 = arith.constant 0 : index
    %2 = vector.load %arg1[%c0_1, %c0_2] : memref<8x16xf32, #tpu.memory_space<vmem>>, vector<8x16xf32>
    %c0_3 = arith.constant 0 : index
    %c0_4 = arith.constant 0 : index
    %3 = vector.load %arg2[%c0_3, %c0_4] : memref<64x1024xbf16, #tpu.memory_space<vmem>>, vector<64x1024xbf16>
    %cst = arith.constant dense<0.000000e+00> : vector<8x1024xf32>
    %4 = tpu.matmul %1, %3, %cst {dimension_numbers = #tpu.dot_dimension_numbers<[1], [0], [0], [1], [0, 0, 1, 1], [], []>} : vector<8x64xbf16>, vector<64x1024xbf16>, vector<8x1024xf32> -> vector<8x1024xf32>
    %c0_5 = arith.constant 0 : index
    %c0_6 = arith.constant 0 : index
    %5 = vector.load %arg13[%c0_5, %c0_6] : memref<6x1024xf32, #tpu.memory_space<vmem>>, vector<1x1024xf32>
    %6 = vector.broadcast %5 : vector<1x1024xf32> to vector<8x1024xf32>
    %7 = arith.addf %4, %6 : vector<8x1024xf32>
    %8 = math.tanh %7 : vector<8x1024xf32>
    %9 = arith.truncf %8 : vector<8x1024xf32> to vector<8x1024xbf16>
    %10 = vector.extract_strided_slice %9 {offsets = [0, 0], sizes = [8, 512], strides = [1, 1]} : vector<8x1024xbf16> to vector<8x512xbf16>
    %c0_7 = arith.constant 0 : index
    %c0_8 = arith.constant 0 : index
    %c0_9 = arith.constant 0 : index
    %11 = vector.load %arg3[%c0_7, %c0_8, %c0_9] : memref<2x512x256xbf16, #tpu.memory_space<vmem>>, vector<1x512x256xbf16>
    %12 = vector.shape_cast %11 : vector<1x512x256xbf16> to vector<512x256xbf16>
    %cst_10 = arith.constant dense<0.000000e+00> : vector<8x256xf32>
    %13 = tpu.matmul %10, %12, %cst_10 {dimension_numbers = #tpu.dot_dimension_numbers<[1], [0], [0], [1], [0, 0, 1, 1], [], []>} : vector<8x512xbf16>, vector<512x256xbf16>, vector<8x256xf32> -> vector<8x256xf32>
    %c1 = arith.constant 1 : index
    %c0_11 = arith.constant 0 : index
    %14 = vector.load %arg13[%c1, %c0_11] : memref<6x1024xf32, #tpu.memory_space<vmem>>, vector<1x256xf32>
    %15 = vector.broadcast %14 : vector<1x256xf32> to vector<8x256xf32>
    %16 = arith.addf %13, %15 : vector<8x256xf32>
    %17 = math.tanh %16 : vector<8x256xf32>
    %18 = arith.truncf %17 : vector<8x256xf32> to vector<8x256xbf16>
    %c0_12 = arith.constant 0 : index
    %c0_13 = arith.constant 0 : index
    %c0_14 = arith.constant 0 : index
    %19 = vector.load %arg4[%c0_12, %c0_13, %c0_14] : memref<2x256x128xbf16, #tpu.memory_space<vmem>>, vector<1x256x128xbf16>
    %20 = vector.shape_cast %19 : vector<1x256x128xbf16> to vector<256x128xbf16>
    %cst_15 = arith.constant dense<0.000000e+00> : vector<8x128xf32>
    %21 = tpu.matmul %18, %20, %cst_15 {dimension_numbers = #tpu.dot_dimension_numbers<[1], [0], [0], [1], [0, 0, 1, 1], [], []>} : vector<8x256xbf16>, vector<256x128xbf16>, vector<8x128xf32> -> vector<8x128xf32>
    %c0_16 = arith.constant 0 : index
    %c0_17 = arith.constant 0 : index
    %22 = vector.load %arg14[%c0_16, %c0_17] : memref<26x128xf32, #tpu.memory_space<vmem>>, vector<1x128xf32>
    %23 = vector.broadcast %22 : vector<1x128xf32> to vector<8x128xf32>
    %24 = arith.addf %21, %23 : vector<8x128xf32>
    %25 = math.tanh %24 : vector<8x128xf32>
    %26 = arith.truncf %25 : vector<8x128xf32> to vector<8x128xbf16>
    %c0_18 = arith.constant 0 : index
    %c0_19 = arith.constant 0 : index
    %c0_20 = arith.constant 0 : index
    %27 = vector.load %arg5[%c0_18, %c0_19, %c0_20] : memref<2x128x64xbf16, #tpu.memory_space<vmem>>, vector<1x128x64xbf16>
    %28 = vector.shape_cast %27 : vector<1x128x64xbf16> to vector<128x64xbf16>
    %cst_21 = arith.constant dense<0.000000e+00> : vector<8x64xf32>
    %29 = tpu.matmul %26, %28, %cst_21 {dimension_numbers = #tpu.dot_dimension_numbers<[1], [0], [0], [1], [0, 0, 1, 1], [], []>} : vector<8x128xbf16>, vector<128x64xbf16>, vector<8x64xf32> -> vector<8x64xf32>
    %c2 = arith.constant 2 : index
    %c0_22 = arith.constant 0 : index
    %30 = vector.load %arg14[%c2, %c0_22] : memref<26x128xf32, #tpu.memory_space<vmem>>, vector<1x64xf32>
    %31 = vector.broadcast %30 : vector<1x64xf32> to vector<8x64xf32>
    %32 = arith.addf %29, %31 : vector<8x64xf32>
    %33 = math.tanh %32 : vector<8x64xf32>
    %34 = arith.truncf %33 : vector<8x64xf32> to vector<8x64xbf16>
    %c0_23 = arith.constant 0 : index
    %c0_24 = arith.constant 0 : index
    %c0_25 = arith.constant 0 : index
    %35 = vector.load %arg6[%c0_23, %c0_24, %c0_25] : memref<8x64x16xbf16, #tpu.memory_space<vmem>>, vector<1x64x16xbf16>
    %36 = vector.shape_cast %35 : vector<1x64x16xbf16> to vector<64x16xbf16>
    %cst_26 = arith.constant dense<0.000000e+00> : vector<8x16xf32>
    %37 = tpu.matmul %34, %36, %cst_26 {dimension_numbers = #tpu.dot_dimension_numbers<[1], [0], [0], [1], [0, 0, 1, 1], [], []>} : vector<8x64xbf16>, vector<64x16xbf16>, vector<8x16xf32> -> vector<8x16xf32>
    %c4 = arith.constant 4 : index
    %c0_27 = arith.constant 0 : index
    %38 = vector.load %arg14[%c4, %c0_27] : memref<26x128xf32, #tpu.memory_space<vmem>>, vector<1x16xf32>
    %39 = vector.broadcast %38 : vector<1x16xf32> to vector<8x16xf32>
    %40 = arith.addf %37, %39 : vector<8x16xf32>
    %41 = vector.extract_strided_slice %9 {offsets = [0, 512], sizes = [8, 512], strides = [1, 1]} : vector<8x1024xbf16> to vector<8x512xbf16>
    %c1_28 = arith.constant 1 : index
    %c0_29 = arith.constant 0 : index
    %c0_30 = arith.constant 0 : index
    %42 = vector.load %arg3[%c1_28, %c0_29, %c0_30] : memref<2x512x256xbf16, #tpu.memory_space<vmem>>, vector<1x512x256xbf16>
    %43 = vector.shape_cast %42 : vector<1x512x256xbf16> to vector<512x256xbf16>
    %cst_31 = arith.constant dense<0.000000e+00> : vector<8x256xf32>
    %44 = tpu.matmul %41, %43, %cst_31 {dimension_numbers = #tpu.dot_dimension_numbers<[1], [0], [0], [1], [0, 0, 1, 1], [], []>} : vector<8x512xbf16>, vector<512x256xbf16>, vector<8x256xf32> -> vector<8x256xf32>
    %c2_32 = arith.constant 2 : index
    %c0_33 = arith.constant 0 : index
    %45 = vector.load %arg13[%c2_32, %c0_33] : memref<6x1024xf32, #tpu.memory_space<vmem>>, vector<1x256xf32>
    %46 = vector.broadcast %45 : vector<1x256xf32> to vector<8x256xf32>
    %47 = arith.addf %44, %46 : vector<8x256xf32>
    %48 = math.tanh %47 : vector<8x256xf32>
    %49 = arith.truncf %48 : vector<8x256xf32> to vector<8x256xbf16>
    %c1_34 = arith.constant 1 : index
    %c0_35 = arith.constant 0 : index
    %c0_36 = arith.constant 0 : index
    %50 = vector.load %arg4[%c1_34, %c0_35, %c0_36] : memref<2x256x128xbf16, #tpu.memory_space<vmem>>, vector<1x256x128xbf16>
    %51 = vector.shape_cast %50 : vector<1x256x128xbf16> to vector<256x128xbf16>
    %cst_37 = arith.constant dense<0.000000e+00> : vector<8x128xf32>
    %52 = tpu.matmul %49, %51, %cst_37 {dimension_numbers = #tpu.dot_dimension_numbers<[1], [0], [0], [1], [0, 0, 1, 1], [], []>} : vector<8x256xbf16>, vector<256x128xbf16>, vector<8x128xf32> -> vector<8x128xf32>
    %c1_38 = arith.constant 1 : index
    %c0_39 = arith.constant 0 : index
    %53 = vector.load %arg14[%c1_38, %c0_39] : memref<26x128xf32, #tpu.memory_space<vmem>>, vector<1x128xf32>
    %54 = vector.broadcast %53 : vector<1x128xf32> to vector<8x128xf32>
    %55 = arith.addf %52, %54 : vector<8x128xf32>
    %56 = math.tanh %55 : vector<8x128xf32>
    %57 = arith.truncf %56 : vector<8x128xf32> to vector<8x128xbf16>
    %c1_40 = arith.constant 1 : index
    %c0_41 = arith.constant 0 : index
    %c0_42 = arith.constant 0 : index
    %58 = vector.load %arg5[%c1_40, %c0_41, %c0_42] : memref<2x128x64xbf16, #tpu.memory_space<vmem>>, vector<1x128x64xbf16>
    %59 = vector.shape_cast %58 : vector<1x128x64xbf16> to vector<128x64xbf16>
    %cst_43 = arith.constant dense<0.000000e+00> : vector<8x64xf32>
    %60 = tpu.matmul %57, %59, %cst_43 {dimension_numbers = #tpu.dot_dimension_numbers<[1], [0], [0], [1], [0, 0, 1, 1], [], []>} : vector<8x128xbf16>, vector<128x64xbf16>, vector<8x64xf32> -> vector<8x64xf32>
    %c3 = arith.constant 3 : index
    %c0_44 = arith.constant 0 : index
    %61 = vector.load %arg14[%c3, %c0_44] : memref<26x128xf32, #tpu.memory_space<vmem>>, vector<1x64xf32>
    %62 = vector.broadcast %61 : vector<1x64xf32> to vector<8x64xf32>
    %63 = arith.addf %60, %62 : vector<8x64xf32>
    %64 = math.tanh %63 : vector<8x64xf32>
    %65 = arith.truncf %64 : vector<8x64xf32> to vector<8x64xbf16>
    %c1_45 = arith.constant 1 : index
    %c0_46 = arith.constant 0 : index
    %c0_47 = arith.constant 0 : index
    %66 = vector.load %arg6[%c1_45, %c0_46, %c0_47] : memref<8x64x16xbf16, #tpu.memory_space<vmem>>, vector<1x64x16xbf16>
    %67 = vector.shape_cast %66 : vector<1x64x16xbf16> to vector<64x16xbf16>
    %cst_48 = arith.constant dense<0.000000e+00> : vector<8x16xf32>
    %68 = tpu.matmul %65, %67, %cst_48 {dimension_numbers = #tpu.dot_dimension_numbers<[1], [0], [0], [1], [0, 0, 1, 1], [], []>} : vector<8x64xbf16>, vector<64x16xbf16>, vector<8x16xf32> -> vector<8x16xf32>
    %c5 = arith.constant 5 : index
    %c0_49 = arith.constant 0 : index
    %69 = vector.load %arg14[%c5, %c0_49] : memref<26x128xf32, #tpu.memory_space<vmem>>, vector<1x16xf32>
    %70 = vector.broadcast %69 : vector<1x16xf32> to vector<8x16xf32>
    %71 = arith.addf %68, %70 : vector<8x16xf32>
    %cst_50 = arith.constant 5.000000e-01 : f32
    %72 = vector.broadcast %cst_50 : f32 to vector<8x16xf32>
    %73 = arith.mulf %72, %71 : vector<8x16xf32>
    %74 = math.exp %73 : vector<8x16xf32>
    %75 = arith.mulf %74, %2 : vector<8x16xf32>
    %76 = arith.addf %40, %75 : vector<8x16xf32>
    %77 = arith.truncf %76 : vector<8x16xf32> to vector<8x16xbf16>
    %c0_51 = arith.constant 0 : index
    %c0_52 = arith.constant 0 : index
    %78 = vector.load %arg7[%c0_51, %c0_52] : memref<16x416xbf16, #tpu.memory_space<vmem>>, vector<16x416xbf16>
    %cst_53 = arith.constant dense<0.000000e+00> : vector<8x416xf32>
    %79 = tpu.matmul %77, %78, %cst_53 {dimension_numbers = #tpu.dot_dimension_numbers<[1], [0], [0], [1], [0, 0, 1, 1], [], []>} : vector<8x16xbf16>, vector<16x416xbf16>, vector<8x416xf32> -> vector<8x416xf32>
    %c3_54 = arith.constant 3 : index
    %c0_55 = arith.constant 0 : index
    %80 = vector.load %arg13[%c3_54, %c0_55] : memref<6x1024xf32, #tpu.memory_space<vmem>>, vector<1x416xf32>
    %81 = vector.broadcast %80 : vector<1x416xf32> to vector<8x416xf32>
    %82 = arith.addf %79, %81 : vector<8x416xf32>
    %83 = math.tanh %82 : vector<8x416xf32>
    %84 = arith.truncf %83 : vector<8x416xf32> to vector<8x416xbf16>
    %85 = vector.extract_strided_slice %84 {offsets = [0, 0], sizes = [8, 64], strides = [1, 1]} : vector<8x416xbf16> to vector<8x64xbf16>
    %c0_56 = arith.constant 0 : index
    %c0_57 = arith.constant 0 : index
    %c0_58 = arith.constant 0 : index
    %86 = vector.load %arg8[%c0_56, %c0_57, %c0_58] : memref<12x64x64xbf16, #tpu.memory_space<vmem>>, vector<1x64x64xbf16>
    %87 = vector.shape_cast %86 : vector<1x64x64xbf16> to vector<64x64xbf16>
    %cst_59 = arith.constant dense<0.000000e+00> : vector<8x64xf32>
    %88 = tpu.matmul %85, %87, %cst_59 {dimension_numbers = #tpu.dot_dimension_numbers<[1], [0], [0], [1], [0, 0, 1, 1], [], []>} : vector<8x64xbf16>, vector<64x64xbf16>, vector<8x64xf32> -> vector<8x64xf32>
    %c12 = arith.constant 12 : index
    %c0_60 = arith.constant 0 : index
    %89 = vector.load %arg14[%c12, %c0_60] : memref<26x128xf32, #tpu.memory_space<vmem>>, vector<1x64xf32>
    %90 = vector.broadcast %89 : vector<1x64xf32> to vector<8x64xf32>
    %91 = arith.addf %88, %90 : vector<8x64xf32>
    %92 = math.tanh %91 : vector<8x64xf32>
    %93 = arith.truncf %92 : vector<8x64xf32> to vector<8x64xbf16>
    %c6 = arith.constant 6 : index
    %c0_61 = arith.constant 0 : index
    %c0_62 = arith.constant 0 : index
    %94 = vector.load %arg8[%c6, %c0_61, %c0_62] : memref<12x64x64xbf16, #tpu.memory_space<vmem>>, vector<1x64x64xbf16>
    %95 = vector.shape_cast %94 : vector<1x64x64xbf16> to vector<64x64xbf16>
    %cst_63 = arith.constant dense<0.000000e+00> : vector<8x64xf32>
    %96 = tpu.matmul %93, %95, %cst_63 {dimension_numbers = #tpu.dot_dimension_numbers<[1], [0], [0], [1], [0, 0, 1, 1], [], []>} : vector<8x64xbf16>, vector<64x64xbf16>, vector<8x64xf32> -> vector<8x64xf32>
    %c18 = arith.constant 18 : index
    %c0_64 = arith.constant 0 : index
    %97 = vector.load %arg14[%c18, %c0_64] : memref<26x128xf32, #tpu.memory_space<vmem>>, vector<1x64xf32>
    %98 = vector.broadcast %97 : vector<1x64xf32> to vector<8x64xf32>
    %99 = arith.addf %96, %98 : vector<8x64xf32>
    %100 = math.tanh %99 : vector<8x64xf32>
    %101 = arith.truncf %100 : vector<8x64xf32> to vector<8x64xbf16>
    %c2_65 = arith.constant 2 : index
    %c0_66 = arith.constant 0 : index
    %c0_67 = arith.constant 0 : index
    %102 = vector.load %arg6[%c2_65, %c0_66, %c0_67] : memref<8x64x16xbf16, #tpu.memory_space<vmem>>, vector<1x64x16xbf16>
    %103 = vector.shape_cast %102 : vector<1x64x16xbf16> to vector<64x16xbf16>
    %cst_68 = arith.constant dense<0.000000e+00> : vector<8x16xf32>
    %104 = tpu.matmul %101, %103, %cst_68 {dimension_numbers = #tpu.dot_dimension_numbers<[1], [0], [0], [1], [0, 0, 1, 1], [], []>} : vector<8x64xbf16>, vector<64x16xbf16>, vector<8x16xf32> -> vector<8x16xf32>
    %c6_69 = arith.constant 6 : index
    %c0_70 = arith.constant 0 : index
    %105 = vector.load %arg14[%c6_69, %c0_70] : memref<26x128xf32, #tpu.memory_space<vmem>>, vector<1x16xf32>
    %106 = vector.broadcast %105 : vector<1x16xf32> to vector<8x16xf32>
    %107 = arith.addf %104, %106 : vector<8x16xf32>
    %108 = vector.extract_strided_slice %84 {offsets = [0, 64], sizes = [8, 64], strides = [1, 1]} : vector<8x416xbf16> to vector<8x64xbf16>
    %c1_71 = arith.constant 1 : index
    %c0_72 = arith.constant 0 : index
    %c0_73 = arith.constant 0 : index
    %109 = vector.load %arg8[%c1_71, %c0_72, %c0_73] : memref<12x64x64xbf16, #tpu.memory_space<vmem>>, vector<1x64x64xbf16>
    %110 = vector.shape_cast %109 : vector<1x64x64xbf16> to vector<64x64xbf16>
    %cst_74 = arith.constant dense<0.000000e+00> : vector<8x64xf32>
    %111 = tpu.matmul %108, %110, %cst_74 {dimension_numbers = #tpu.dot_dimension_numbers<[1], [0], [0], [1], [0, 0, 1, 1], [], []>} : vector<8x64xbf16>, vector<64x64xbf16>, vector<8x64xf32> -> vector<8x64xf32>
    %c13 = arith.constant 13 : index
    %c0_75 = arith.constant 0 : index
    %112 = vector.load %arg14[%c13, %c0_75] : memref<26x128xf32, #tpu.memory_space<vmem>>, vector<1x64xf32>
    %113 = vector.broadcast %112 : vector<1x64xf32> to vector<8x64xf32>
    %114 = arith.addf %111, %113 : vector<8x64xf32>
    %115 = math.tanh %114 : vector<8x64xf32>
    %116 = arith.truncf %115 : vector<8x64xf32> to vector<8x64xbf16>
    %c7 = arith.constant 7 : index
    %c0_76 = arith.constant 0 : index
    %c0_77 = arith.constant 0 : index
    %117 = vector.load %arg8[%c7, %c0_76, %c0_77] : memref<12x64x64xbf16, #tpu.memory_space<vmem>>, vector<1x64x64xbf16>
    %118 = vector.shape_cast %117 : vector<1x64x64xbf16> to vector<64x64xbf16>
    %cst_78 = arith.constant dense<0.000000e+00> : vector<8x64xf32>
    %119 = tpu.matmul %116, %118, %cst_78 {dimension_numbers = #tpu.dot_dimension_numbers<[1], [0], [0], [1], [0, 0, 1, 1], [], []>} : vector<8x64xbf16>, vector<64x64xbf16>, vector<8x64xf32> -> vector<8x64xf32>
    %c19 = arith.constant 19 : index
    %c0_79 = arith.constant 0 : index
    %120 = vector.load %arg14[%c19, %c0_79] : memref<26x128xf32, #tpu.memory_space<vmem>>, vector<1x64xf32>
    %121 = vector.broadcast %120 : vector<1x64xf32> to vector<8x64xf32>
    %122 = arith.addf %119, %121 : vector<8x64xf32>
    %123 = math.tanh %122 : vector<8x64xf32>
    %124 = arith.truncf %123 : vector<8x64xf32> to vector<8x64xbf16>
    %c3_80 = arith.constant 3 : index
    %c0_81 = arith.constant 0 : index
    %c0_82 = arith.constant 0 : index
    %125 = vector.load %arg6[%c3_80, %c0_81, %c0_82] : memref<8x64x16xbf16, #tpu.memory_space<vmem>>, vector<1x64x16xbf16>
    %126 = vector.shape_cast %125 : vector<1x64x16xbf16> to vector<64x16xbf16>
    %cst_83 = arith.constant dense<0.000000e+00> : vector<8x16xf32>
    %127 = tpu.matmul %124, %126, %cst_83 {dimension_numbers = #tpu.dot_dimension_numbers<[1], [0], [0], [1], [0, 0, 1, 1], [], []>} : vector<8x64xbf16>, vector<64x16xbf16>, vector<8x16xf32> -> vector<8x16xf32>
    %c7_84 = arith.constant 7 : index
    %c0_85 = arith.constant 0 : index
    %128 = vector.load %arg14[%c7_84, %c0_85] : memref<26x128xf32, #tpu.memory_space<vmem>>, vector<1x16xf32>
    %129 = vector.broadcast %128 : vector<1x16xf32> to vector<8x16xf32>
    %130 = arith.addf %127, %129 : vector<8x16xf32>
    %131 = vector.extract_strided_slice %84 {offsets = [0, 128], sizes = [8, 64], strides = [1, 1]} : vector<8x416xbf16> to vector<8x64xbf16>
    %c2_86 = arith.constant 2 : index
    %c0_87 = arith.constant 0 : index
    %c0_88 = arith.constant 0 : index
    %132 = vector.load %arg8[%c2_86, %c0_87, %c0_88] : memref<12x64x64xbf16, #tpu.memory_space<vmem>>, vector<1x64x64xbf16>
    %133 = vector.shape_cast %132 : vector<1x64x64xbf16> to vector<64x64xbf16>
    %cst_89 = arith.constant dense<0.000000e+00> : vector<8x64xf32>
    %134 = tpu.matmul %131, %133, %cst_89 {dimension_numbers = #tpu.dot_dimension_numbers<[1], [0], [0], [1], [0, 0, 1, 1], [], []>} : vector<8x64xbf16>, vector<64x64xbf16>, vector<8x64xf32> -> vector<8x64xf32>
    %c14 = arith.constant 14 : index
    %c0_90 = arith.constant 0 : index
    %135 = vector.load %arg14[%c14, %c0_90] : memref<26x128xf32, #tpu.memory_space<vmem>>, vector<1x64xf32>
    %136 = vector.broadcast %135 : vector<1x64xf32> to vector<8x64xf32>
    %137 = arith.addf %134, %136 : vector<8x64xf32>
    %138 = math.tanh %137 : vector<8x64xf32>
    %139 = arith.truncf %138 : vector<8x64xf32> to vector<8x64xbf16>
    %c8 = arith.constant 8 : index
    %c0_91 = arith.constant 0 : index
    %c0_92 = arith.constant 0 : index
    %140 = vector.load %arg8[%c8, %c0_91, %c0_92] : memref<12x64x64xbf16, #tpu.memory_space<vmem>>, vector<1x64x64xbf16>
    %141 = vector.shape_cast %140 : vector<1x64x64xbf16> to vector<64x64xbf16>
    %cst_93 = arith.constant dense<0.000000e+00> : vector<8x64xf32>
    %142 = tpu.matmul %139, %141, %cst_93 {dimension_numbers = #tpu.dot_dimension_numbers<[1], [0], [0], [1], [0, 0, 1, 1], [], []>} : vector<8x64xbf16>, vector<64x64xbf16>, vector<8x64xf32> -> vector<8x64xf32>
    %c20 = arith.constant 20 : index
    %c0_94 = arith.constant 0 : index
    %143 = vector.load %arg14[%c20, %c0_94] : memref<26x128xf32, #tpu.memory_space<vmem>>, vector<1x64xf32>
    %144 = vector.broadcast %143 : vector<1x64xf32> to vector<8x64xf32>
    %145 = arith.addf %142, %144 : vector<8x64xf32>
    %146 = math.tanh %145 : vector<8x64xf32>
    %147 = arith.truncf %146 : vector<8x64xf32> to vector<8x64xbf16>
    %c4_95 = arith.constant 4 : index
    %c0_96 = arith.constant 0 : index
    %c0_97 = arith.constant 0 : index
    %148 = vector.load %arg6[%c4_95, %c0_96, %c0_97] : memref<8x64x16xbf16, #tpu.memory_space<vmem>>, vector<1x64x16xbf16>
    %149 = vector.shape_cast %148 : vector<1x64x16xbf16> to vector<64x16xbf16>
    %cst_98 = arith.constant dense<0.000000e+00> : vector<8x16xf32>
    %150 = tpu.matmul %147, %149, %cst_98 {dimension_numbers = #tpu.dot_dimension_numbers<[1], [0], [0], [1], [0, 0, 1, 1], [], []>} : vector<8x64xbf16>, vector<64x16xbf16>, vector<8x16xf32> -> vector<8x16xf32>
    %c8_99 = arith.constant 8 : index
    %c0_100 = arith.constant 0 : index
    %151 = vector.load %arg14[%c8_99, %c0_100] : memref<26x128xf32, #tpu.memory_space<vmem>>, vector<1x16xf32>
    %152 = vector.broadcast %151 : vector<1x16xf32> to vector<8x16xf32>
    %153 = arith.addf %150, %152 : vector<8x16xf32>
    %154 = vector.extract_strided_slice %84 {offsets = [0, 192], sizes = [8, 64], strides = [1, 1]} : vector<8x416xbf16> to vector<8x64xbf16>
    %c3_101 = arith.constant 3 : index
    %c0_102 = arith.constant 0 : index
    %c0_103 = arith.constant 0 : index
    %155 = vector.load %arg8[%c3_101, %c0_102, %c0_103] : memref<12x64x64xbf16, #tpu.memory_space<vmem>>, vector<1x64x64xbf16>
    %156 = vector.shape_cast %155 : vector<1x64x64xbf16> to vector<64x64xbf16>
    %cst_104 = arith.constant dense<0.000000e+00> : vector<8x64xf32>
    %157 = tpu.matmul %154, %156, %cst_104 {dimension_numbers = #tpu.dot_dimension_numbers<[1], [0], [0], [1], [0, 0, 1, 1], [], []>} : vector<8x64xbf16>, vector<64x64xbf16>, vector<8x64xf32> -> vector<8x64xf32>
    %c15 = arith.constant 15 : index
    %c0_105 = arith.constant 0 : index
    %158 = vector.load %arg14[%c15, %c0_105] : memref<26x128xf32, #tpu.memory_space<vmem>>, vector<1x64xf32>
    %159 = vector.broadcast %158 : vector<1x64xf32> to vector<8x64xf32>
    %160 = arith.addf %157, %159 : vector<8x64xf32>
    %161 = math.tanh %160 : vector<8x64xf32>
    %162 = arith.truncf %161 : vector<8x64xf32> to vector<8x64xbf16>
    %c9 = arith.constant 9 : index
    %c0_106 = arith.constant 0 : index
    %c0_107 = arith.constant 0 : index
    %163 = vector.load %arg8[%c9, %c0_106, %c0_107] : memref<12x64x64xbf16, #tpu.memory_space<vmem>>, vector<1x64x64xbf16>
    %164 = vector.shape_cast %163 : vector<1x64x64xbf16> to vector<64x64xbf16>
    %cst_108 = arith.constant dense<0.000000e+00> : vector<8x64xf32>
    %165 = tpu.matmul %162, %164, %cst_108 {dimension_numbers = #tpu.dot_dimension_numbers<[1], [0], [0], [1], [0, 0, 1, 1], [], []>} : vector<8x64xbf16>, vector<64x64xbf16>, vector<8x64xf32> -> vector<8x64xf32>
    %c21 = arith.constant 21 : index
    %c0_109 = arith.constant 0 : index
    %166 = vector.load %arg14[%c21, %c0_109] : memref<26x128xf32, #tpu.memory_space<vmem>>, vector<1x64xf32>
    %167 = vector.broadcast %166 : vector<1x64xf32> to vector<8x64xf32>
    %168 = arith.addf %165, %167 : vector<8x64xf32>
    %169 = math.tanh %168 : vector<8x64xf32>
    %170 = arith.truncf %169 : vector<8x64xf32> to vector<8x64xbf16>
    %c5_110 = arith.constant 5 : index
    %c0_111 = arith.constant 0 : index
    %c0_112 = arith.constant 0 : index
    %171 = vector.load %arg6[%c5_110, %c0_111, %c0_112] : memref<8x64x16xbf16, #tpu.memory_space<vmem>>, vector<1x64x16xbf16>
    %172 = vector.shape_cast %171 : vector<1x64x16xbf16> to vector<64x16xbf16>
    %cst_113 = arith.constant dense<0.000000e+00> : vector<8x16xf32>
    %173 = tpu.matmul %170, %172, %cst_113 {dimension_numbers = #tpu.dot_dimension_numbers<[1], [0], [0], [1], [0, 0, 1, 1], [], []>} : vector<8x64xbf16>, vector<64x16xbf16>, vector<8x16xf32> -> vector<8x16xf32>
    %c9_114 = arith.constant 9 : index
    %c0_115 = arith.constant 0 : index
    %174 = vector.load %arg14[%c9_114, %c0_115] : memref<26x128xf32, #tpu.memory_space<vmem>>, vector<1x16xf32>
    %175 = vector.broadcast %174 : vector<1x16xf32> to vector<8x16xf32>
    %176 = arith.addf %173, %175 : vector<8x16xf32>
    %177 = vector.extract_strided_slice %84 {offsets = [0, 256], sizes = [8, 64], strides = [1, 1]} : vector<8x416xbf16> to vector<8x64xbf16>
    %c4_116 = arith.constant 4 : index
    %c0_117 = arith.constant 0 : index
    %c0_118 = arith.constant 0 : index
    %178 = vector.load %arg8[%c4_116, %c0_117, %c0_118] : memref<12x64x64xbf16, #tpu.memory_space<vmem>>, vector<1x64x64xbf16>
    %179 = vector.shape_cast %178 : vector<1x64x64xbf16> to vector<64x64xbf16>
    %cst_119 = arith.constant dense<0.000000e+00> : vector<8x64xf32>
    %180 = tpu.matmul %177, %179, %cst_119 {dimension_numbers = #tpu.dot_dimension_numbers<[1], [0], [0], [1], [0, 0, 1, 1], [], []>} : vector<8x64xbf16>, vector<64x64xbf16>, vector<8x64xf32> -> vector<8x64xf32>
    %c16 = arith.constant 16 : index
    %c0_120 = arith.constant 0 : index
    %181 = vector.load %arg14[%c16, %c0_120] : memref<26x128xf32, #tpu.memory_space<vmem>>, vector<1x64xf32>
    %182 = vector.broadcast %181 : vector<1x64xf32> to vector<8x64xf32>
    %183 = arith.addf %180, %182 : vector<8x64xf32>
    %184 = math.tanh %183 : vector<8x64xf32>
    %185 = arith.truncf %184 : vector<8x64xf32> to vector<8x64xbf16>
    %c10 = arith.constant 10 : index
    %c0_121 = arith.constant 0 : index
    %c0_122 = arith.constant 0 : index
    %186 = vector.load %arg8[%c10, %c0_121, %c0_122] : memref<12x64x64xbf16, #tpu.memory_space<vmem>>, vector<1x64x64xbf16>
    %187 = vector.shape_cast %186 : vector<1x64x64xbf16> to vector<64x64xbf16>
    %cst_123 = arith.constant dense<0.000000e+00> : vector<8x64xf32>
    %188 = tpu.matmul %185, %187, %cst_123 {dimension_numbers = #tpu.dot_dimension_numbers<[1], [0], [0], [1], [0, 0, 1, 1], [], []>} : vector<8x64xbf16>, vector<64x64xbf16>, vector<8x64xf32> -> vector<8x64xf32>
    %c22 = arith.constant 22 : index
    %c0_124 = arith.constant 0 : index
    %189 = vector.load %arg14[%c22, %c0_124] : memref<26x128xf32, #tpu.memory_space<vmem>>, vector<1x64xf32>
    %190 = vector.broadcast %189 : vector<1x64xf32> to vector<8x64xf32>
    %191 = arith.addf %188, %190 : vector<8x64xf32>
    %192 = math.tanh %191 : vector<8x64xf32>
    %193 = arith.truncf %192 : vector<8x64xf32> to vector<8x64xbf16>
    %c6_125 = arith.constant 6 : index
    %c0_126 = arith.constant 0 : index
    %c0_127 = arith.constant 0 : index
    %194 = vector.load %arg6[%c6_125, %c0_126, %c0_127] : memref<8x64x16xbf16, #tpu.memory_space<vmem>>, vector<1x64x16xbf16>
    %195 = vector.shape_cast %194 : vector<1x64x16xbf16> to vector<64x16xbf16>
    %cst_128 = arith.constant dense<0.000000e+00> : vector<8x16xf32>
    %196 = tpu.matmul %193, %195, %cst_128 {dimension_numbers = #tpu.dot_dimension_numbers<[1], [0], [0], [1], [0, 0, 1, 1], [], []>} : vector<8x64xbf16>, vector<64x16xbf16>, vector<8x16xf32> -> vector<8x16xf32>
    %c10_129 = arith.constant 10 : index
    %c0_130 = arith.constant 0 : index
    %197 = vector.load %arg14[%c10_129, %c0_130] : memref<26x128xf32, #tpu.memory_space<vmem>>, vector<1x16xf32>
    %198 = vector.broadcast %197 : vector<1x16xf32> to vector<8x16xf32>
    %199 = arith.addf %196, %198 : vector<8x16xf32>
    %200 = vector.extract_strided_slice %84 {offsets = [0, 320], sizes = [8, 64], strides = [1, 1]} : vector<8x416xbf16> to vector<8x64xbf16>
    %c5_131 = arith.constant 5 : index
    %c0_132 = arith.constant 0 : index
    %c0_133 = arith.constant 0 : index
    %201 = vector.load %arg8[%c5_131, %c0_132, %c0_133] : memref<12x64x64xbf16, #tpu.memory_space<vmem>>, vector<1x64x64xbf16>
    %202 = vector.shape_cast %201 : vector<1x64x64xbf16> to vector<64x64xbf16>
    %cst_134 = arith.constant dense<0.000000e+00> : vector<8x64xf32>
    %203 = tpu.matmul %200, %202, %cst_134 {dimension_numbers = #tpu.dot_dimension_numbers<[1], [0], [0], [1], [0, 0, 1, 1], [], []>} : vector<8x64xbf16>, vector<64x64xbf16>, vector<8x64xf32> -> vector<8x64xf32>
    %c17 = arith.constant 17 : index
    %c0_135 = arith.constant 0 : index
    %204 = vector.load %arg14[%c17, %c0_135] : memref<26x128xf32, #tpu.memory_space<vmem>>, vector<1x64xf32>
    %205 = vector.broadcast %204 : vector<1x64xf32> to vector<8x64xf32>
    %206 = arith.addf %203, %205 : vector<8x64xf32>
    %207 = math.tanh %206 : vector<8x64xf32>
    %208 = arith.truncf %207 : vector<8x64xf32> to vector<8x64xbf16>
    %c11 = arith.constant 11 : index
    %c0_136 = arith.constant 0 : index
    %c0_137 = arith.constant 0 : index
    %209 = vector.load %arg8[%c11, %c0_136, %c0_137] : memref<12x64x64xbf16, #tpu.memory_space<vmem>>, vector<1x64x64xbf16>
    %210 = vector.shape_cast %209 : vector<1x64x64xbf16> to vector<64x64xbf16>
    %cst_138 = arith.constant dense<0.000000e+00> : vector<8x64xf32>
    %211 = tpu.matmul %208, %210, %cst_138 {dimension_numbers = #tpu.dot_dimension_numbers<[1], [0], [0], [1], [0, 0, 1, 1], [], []>} : vector<8x64xbf16>, vector<64x64xbf16>, vector<8x64xf32> -> vector<8x64xf32>
    %c23 = arith.constant 23 : index
    %c0_139 = arith.constant 0 : index
    %212 = vector.load %arg14[%c23, %c0_139] : memref<26x128xf32, #tpu.memory_space<vmem>>, vector<1x64xf32>
    %213 = vector.broadcast %212 : vector<1x64xf32> to vector<8x64xf32>
    %214 = arith.addf %211, %213 : vector<8x64xf32>
    %215 = math.tanh %214 : vector<8x64xf32>
    %216 = arith.truncf %215 : vector<8x64xf32> to vector<8x64xbf16>
    %c7_140 = arith.constant 7 : index
    %c0_141 = arith.constant 0 : index
    %c0_142 = arith.constant 0 : index
    %217 = vector.load %arg6[%c7_140, %c0_141, %c0_142] : memref<8x64x16xbf16, #tpu.memory_space<vmem>>, vector<1x64x16xbf16>
    %218 = vector.shape_cast %217 : vector<1x64x16xbf16> to vector<64x16xbf16>
    %cst_143 = arith.constant dense<0.000000e+00> : vector<8x16xf32>
    %219 = tpu.matmul %216, %218, %cst_143 {dimension_numbers = #tpu.dot_dimension_numbers<[1], [0], [0], [1], [0, 0, 1, 1], [], []>} : vector<8x64xbf16>, vector<64x16xbf16>, vector<8x16xf32> -> vector<8x16xf32>
    %c11_144 = arith.constant 11 : index
    %c0_145 = arith.constant 0 : index
    %220 = vector.load %arg14[%c11_144, %c0_145] : memref<26x128xf32, #tpu.memory_space<vmem>>, vector<1x16xf32>
    %221 = vector.broadcast %220 : vector<1x16xf32> to vector<8x16xf32>
    %222 = arith.addf %219, %221 : vector<8x16xf32>
    %223 = vector.extract_strided_slice %84 {offsets = [0, 384], sizes = [8, 32], strides = [1, 1]} : vector<8x416xbf16> to vector<8x32xbf16>
    %c0_146 = arith.constant 0 : index
    %c0_147 = arith.constant 0 : index
    %224 = vector.load %arg9[%c0_146, %c0_147] : memref<32x128xbf16, #tpu.memory_space<vmem>>, vector<32x128xbf16>
    %cst_148 = arith.constant dense<0.000000e+00> : vector<8x128xf32>
    %225 = tpu.matmul %223, %224, %cst_148 {dimension_numbers = #tpu.dot_dimension_numbers<[1], [0], [0], [1], [0, 0, 1, 1], [], []>} : vector<8x32xbf16>, vector<32x128xbf16>, vector<8x128xf32> -> vector<8x128xf32>
    %c24 = arith.constant 24 : index
    %c0_149 = arith.constant 0 : index
    %226 = vector.load %arg14[%c24, %c0_149] : memref<26x128xf32, #tpu.memory_space<vmem>>, vector<1x128xf32>
    %227 = vector.broadcast %226 : vector<1x128xf32> to vector<8x128xf32>
    %228 = arith.addf %225, %227 : vector<8x128xf32>
    %229 = math.tanh %228 : vector<8x128xf32>
    %230 = arith.truncf %229 : vector<8x128xf32> to vector<8x128xbf16>
    %c0_150 = arith.constant 0 : index
    %c0_151 = arith.constant 0 : index
    %231 = vector.load %arg10[%c0_150, %c0_151] : memref<128x256xbf16, #tpu.memory_space<vmem>>, vector<128x256xbf16>
    %cst_152 = arith.constant dense<0.000000e+00> : vector<8x256xf32>
    %232 = tpu.matmul %230, %231, %cst_152 {dimension_numbers = #tpu.dot_dimension_numbers<[1], [0], [0], [1], [0, 0, 1, 1], [], []>} : vector<8x128xbf16>, vector<128x256xbf16>, vector<8x256xf32> -> vector<8x256xf32>
    %c4_153 = arith.constant 4 : index
    %c0_154 = arith.constant 0 : index
    %233 = vector.load %arg13[%c4_153, %c0_154] : memref<6x1024xf32, #tpu.memory_space<vmem>>, vector<1x256xf32>
    %234 = vector.broadcast %233 : vector<1x256xf32> to vector<8x256xf32>
    %235 = arith.addf %232, %234 : vector<8x256xf32>
    %236 = math.tanh %235 : vector<8x256xf32>
    %237 = arith.truncf %236 : vector<8x256xf32> to vector<8x256xbf16>
    %c0_155 = arith.constant 0 : index
    %c0_156 = arith.constant 0 : index
    %238 = vector.load %arg11[%c0_155, %c0_156] : memref<256x256xbf16, #tpu.memory_space<vmem>>, vector<256x256xbf16>
    %cst_157 = arith.constant dense<0.000000e+00> : vector<8x256xf32>
    %239 = tpu.matmul %237, %238, %cst_157 {dimension_numbers = #tpu.dot_dimension_numbers<[1], [0], [0], [1], [0, 0, 1, 1], [], []>} : vector<8x256xbf16>, vector<256x256xbf16>, vector<8x256xf32> -> vector<8x256xf32>
    %c5_158 = arith.constant 5 : index
    %c0_159 = arith.constant 0 : index
    %240 = vector.load %arg13[%c5_158, %c0_159] : memref<6x1024xf32, #tpu.memory_space<vmem>>, vector<1x256xf32>
    %241 = vector.broadcast %240 : vector<1x256xf32> to vector<8x256xf32>
    %242 = arith.addf %239, %241 : vector<8x256xf32>
    %243 = math.tanh %242 : vector<8x256xf32>
    %244 = arith.truncf %243 : vector<8x256xf32> to vector<8x256xbf16>
    %c0_160 = arith.constant 0 : index
    %c0_161 = arith.constant 0 : index
    %245 = vector.load %arg12[%c0_160, %c0_161] : memref<256x14xbf16, #tpu.memory_space<vmem>>, vector<256x14xbf16>
    %cst_162 = arith.constant dense<0.000000e+00> : vector<8x14xf32>
    %246 = tpu.matmul %244, %245, %cst_162 {dimension_numbers = #tpu.dot_dimension_numbers<[1], [0], [0], [1], [0, 0, 1, 1], [], []>} : vector<8x256xbf16>, vector<256x14xbf16>, vector<8x14xf32> -> vector<8x14xf32>
    %c25 = arith.constant 25 : index
    %c0_163 = arith.constant 0 : index
    %247 = vector.load %arg14[%c25, %c0_163] : memref<26x128xf32, #tpu.memory_space<vmem>>, vector<1x14xf32>
    %248 = vector.broadcast %247 : vector<1x14xf32> to vector<8x14xf32>
    %249 = arith.addf %246, %248 : vector<8x14xf32>
    %cst_164 = arith.constant 0.000000e+00 : f32
    %250 = vector.broadcast %cst_164 : f32 to vector<8x14xf32>
    %251 = arith.subf %250, %249 : vector<8x14xf32>
    %252 = math.exp %251 : vector<8x14xf32>
    %cst_165 = arith.constant 1.000000e+00 : f32
    %253 = vector.broadcast %cst_165 : f32 to vector<8x14xf32>
    %254 = arith.addf %253, %252 : vector<8x14xf32>
    %cst_166 = arith.constant 1.000000e+00 : f32
    %255 = vector.broadcast %cst_166 : f32 to vector<8x14xf32>
    %256 = arith.divf %255, %254 : vector<8x14xf32>
    %257 = vector.extract_strided_slice %107 {offsets = [0, 0], sizes = [8, 1], strides = [1, 1]} : vector<8x16xf32> to vector<8x1xf32>
    %258 = vector.extract_strided_slice %130 {offsets = [0, 0], sizes = [8, 1], strides = [1, 1]} : vector<8x16xf32> to vector<8x1xf32>
    %cst_167 = arith.constant 0.000000e+00 : f32
    %259 = vector.broadcast %cst_167 : f32 to vector<8x1xf32>
    %260 = arith.subf %259, %258 : vector<8x1xf32>
    %261 = math.exp %260 : vector<8x1xf32>
    %cst_168 = arith.constant 1.000000e+00 : f32
    %262 = vector.broadcast %cst_168 : f32 to vector<8x1xf32>
    %263 = arith.addf %262, %261 : vector<8x1xf32>
    %cst_169 = arith.constant 1.000000e+00 : f32
    %264 = vector.broadcast %cst_169 : f32 to vector<8x1xf32>
    %265 = arith.divf %264, %263 : vector<8x1xf32>
    %266 = vector.extract_strided_slice %153 {offsets = [0, 0], sizes = [8, 8], strides = [1, 1]} : vector<8x16xf32> to vector<8x8xf32>
    %cst_170 = arith.constant dense<0xFF800000> : vector<8xf32>
    %267 = vector.multi_reduction <maximumf>, %266, %cst_170 [1] : vector<8x8xf32> to vector<8xf32>
    %268 = vector.shape_cast %267 : vector<8xf32> to vector<8x1xf32>
    %269 = vector.broadcast %268 : vector<8x1xf32> to vector<8x8xf32>
    %270 = arith.subf %266, %269 : vector<8x8xf32>
    %271 = math.exp %270 : vector<8x8xf32>
    %cst_171 = arith.constant dense<0.000000e+00> : vector<8xf32>
    %272 = vector.multi_reduction <add>, %271, %cst_171 [1] : vector<8x8xf32> to vector<8xf32>
    %273 = vector.shape_cast %272 : vector<8xf32> to vector<8x1xf32>
    %274 = vector.broadcast %273 : vector<8x1xf32> to vector<8x8xf32>
    %275 = arith.divf %271, %274 : vector<8x8xf32>
    %276 = vector.extract_strided_slice %176 {offsets = [0, 0], sizes = [8, 8], strides = [1, 1]} : vector<8x16xf32> to vector<8x8xf32>
    %cst_172 = arith.constant dense<0xFF800000> : vector<8xf32>
    %277 = vector.multi_reduction <maximumf>, %276, %cst_172 [1] : vector<8x8xf32> to vector<8xf32>
    %278 = vector.shape_cast %277 : vector<8xf32> to vector<8x1xf32>
    %279 = vector.broadcast %278 : vector<8x1xf32> to vector<8x8xf32>
    %280 = arith.subf %276, %279 : vector<8x8xf32>
    %281 = math.exp %280 : vector<8x8xf32>
    %cst_173 = arith.constant dense<0.000000e+00> : vector<8xf32>
    %282 = vector.multi_reduction <add>, %281, %cst_173 [1] : vector<8x8xf32> to vector<8xf32>
    %283 = vector.shape_cast %282 : vector<8xf32> to vector<8x1xf32>
    %284 = vector.broadcast %283 : vector<8x1xf32> to vector<8x8xf32>
    %285 = arith.divf %281, %284 : vector<8x8xf32>
    %cst_174 = arith.constant dense<0xFF800000> : vector<8xf32>
    %286 = vector.multi_reduction <maximumf>, %199, %cst_174 [1] : vector<8x16xf32> to vector<8xf32>
    %287 = vector.shape_cast %286 : vector<8xf32> to vector<8x1xf32>
    %288 = vector.broadcast %287 : vector<8x1xf32> to vector<8x16xf32>
    %289 = arith.subf %199, %288 : vector<8x16xf32>
    %290 = math.exp %289 : vector<8x16xf32>
    %cst_175 = arith.constant dense<0.000000e+00> : vector<8xf32>
    %291 = vector.multi_reduction <add>, %290, %cst_175 [1] : vector<8x16xf32> to vector<8xf32>
    %292 = vector.shape_cast %291 : vector<8xf32> to vector<8x1xf32>
    %293 = vector.broadcast %292 : vector<8x1xf32> to vector<8x16xf32>
    %294 = arith.divf %290, %293 : vector<8x16xf32>
    %cst_176 = arith.constant dense<0xFF800000> : vector<8xf32>
    %295 = vector.multi_reduction <maximumf>, %222, %cst_176 [1] : vector<8x16xf32> to vector<8xf32>
    %296 = vector.shape_cast %295 : vector<8xf32> to vector<8x1xf32>
    %297 = vector.broadcast %296 : vector<8x1xf32> to vector<8x16xf32>
    %298 = arith.subf %222, %297 : vector<8x16xf32>
    %299 = math.exp %298 : vector<8x16xf32>
    %cst_177 = arith.constant dense<0.000000e+00> : vector<8xf32>
    %300 = vector.multi_reduction <add>, %299, %cst_177 [1] : vector<8x16xf32> to vector<8xf32>
    %301 = vector.shape_cast %300 : vector<8xf32> to vector<8x1xf32>
    %302 = vector.broadcast %301 : vector<8x1xf32> to vector<8x16xf32>
    %303 = arith.divf %299, %302 : vector<8x16xf32>
    %cst_178 = arith.constant 0.000000e+00 : f32
    %304 = vector.broadcast %cst_178 : f32 to vector<8x16xf32>
    %305 = tpu.concatenate %256, %257, %265, %275, %285, %294, %303, %40, %71, %76, %304 in 1 : vector<8x14xf32>, vector<8x1xf32>, vector<8x1xf32>, vector<8x8xf32>, vector<8x8xf32>, vector<8x16xf32>, vector<8x16xf32>, vector<8x16xf32>, vector<8x16xf32>, vector<8x16xf32>, vector<8x16xf32> -> vector<8x128xf32>
    %c0_179 = arith.constant 0 : index
    %c0_180 = arith.constant 0 : index
    %306 = vector.load %arg15[%c0_179, %c0_180] : memref<8x128xf32, #tpu.memory_space<vmem>>, vector<8x128xf32>
    tpu.vector_store %arg15[%c0_179, %c0_180], %305 {strides = array<i32>} : memref<8x128xf32, #tpu.memory_space<vmem>>, vector<8x128xf32>,
    return
  }
}

</mosaic_0001>

<bundles_post_ra>
// kernel: vae_forward.1
= control target key start
LH: loop header
LB: loop body
LE: loop exit
PB: predicated region body
PF: predicated region fallthrough
CT: control target
= control target key end

     0   :  { %v6259_v3 = vmov 0   ;;  %vm290_vm0 = vcmask 523264   ;;  %vm6261_vm1 = vmmov 0   ;;  %vm2229_vm2 = vcmask 130048   ;;  %s6262_s30 = smov 64   ;;  %s6263_s16 = smov 14   ;;  %s7858_s2 = inlined_call_operand.vmem [shape: bf16[64,1024], index: 2, kind: input, shape index: {}]   ;;  %s7859_s3 = inlined_call_operand.vmem [shape: bf16[2,512,256], index: 3, kind: input, shape index: {}]   ;;  %s7860_s0 = inlined_call_operand.vmem [shape: f32[8,64], index: 0, kind: input, shape index: {}]   ;;  %s7861_s4 = inlined_call_operand.vmem [shape: bf16[2,256,128], index: 4, kind: input, shape index: {}]   ;;  %s7862_s13 = inlined_call_operand.vmem [shape: f32[6,1024], index: 13, kind: input, shape index: {}]   ;;  %s7863_s5 = inlined_call_operand.vmem [shape: bf16[2,128,64], index: 5, kind: input, shape index: {}]   ;;  %s7864_s14 = inlined_call_operand.vmem [shape: f32[26,128], index: 14, kind: input, shape index: {}]   ;;  %s7865_s6 = inlined_call_operand.vmem [shape: bf16[8,64,16], index: 6, kind: input, shape index: {}]   ;;  %s7866_s7 = inlined_call_operand.vmem [shape: bf16[16,416], index: 7, kind: input, shape index: {}]   ;;  %s7867_s1 = inlined_call_operand.vmem [shape: f32[8,16], index: 1, kind: input, shape index: {}]   ;;  %s7868_s8 = inlined_call_operand.vmem [shape: bf16[12,64,64], index: 8, kind: input, shape index: {}]   ;;  %s7869_s9 = inlined_call_operand.vmem [shape: bf16[32,128], index: 9, kind: input, shape index: {}]   ;;  %s7870_s10 = inlined_call_operand.vmem [shape: bf16[128,256], index: 10, kind: input, shape index: {}]   ;;  %s7871_s11 = inlined_call_operand.vmem [shape: bf16[256,256], index: 11, kind: input, shape index: {}]   ;;  %s7872_s12 = inlined_call_operand.vmem [shape: bf16[256,14], index: 12, kind: input, shape index: {}]   ;;  %s7873_s15 = inlined_call_operand.vmem [shape: f32[8,128], index: 15, kind: output, shape index: {}]  }
   0x1   :  { %v54_v0 = vld [vmem:[%s7858_s2] sm:$0xff]  ;;  %326 = vmatprep.mubr.bf16.mxu0 %v6259_v3  ;;  %367 = vmatprep.mubr.bf16.mxu1 %v6259_v3  ;;  %v55_v10 = vld [vmem:[%s7858_s2 + $0x8] sm:$0xff]  ;;  %v56_v29 = vld [vmem:[%s7858_s2 + $0x10] sm:$0xff]  ;;  %vm4469_vm3 = vcmask 64512   ;;  %vm3834_vm4 = vcmask 261120   ;;  %s6266_s24 = smov 16  }
   0x2   :  { %v58_v1 = vld [vmem:[%s7858_s2 + $0x20] sm:$0xff]  ;;  %v59_v11 = vld [vmem:[%s7858_s2 + $0x28] sm:$0xff]  ;;  %v60_v30 = vld [vmem:[%s7858_s2 + $0x30] sm:$0xff]  ;;  %s6268_s25 = smov 96   ;;  %vm4550_vm5 = vcmask 113664   ;;  %vm4552_vm6 = vcmask 121856  }
   0x3   :  { %v62_v2 = vld [vmem:[%s7858_s2 + $0x40] sm:$0xff]  ;;  %v4573_v4 = vcombine.high %v54_v0, %v58_v1  ;;  %v4572_v5 = vcombine.low %v54_v0, %v58_v1  ;;  %v63_v12 = vld [vmem:[%s7858_s2 + $0x48] sm:$0xff]  ;;  %v4575_v14 = vcombine.high %v55_v10, %v59_v11  ;;  %v4574_v15 = vcombine.low %v55_v10, %v59_v11  ;;  %v64_v36 = vld [vmem:[%s7858_s2 + $0x50] sm:$0xff] }
   0x4   :  { %v66_v6 = vld [vmem:[%s7858_s2 + $0x60] sm:$0xff]  ;;  %v67_v16 = vld [vmem:[%s7858_s2 + $0x68] sm:$0xff]  ;;  %v4577_v35 = vcombine.high %v56_v29, %v60_v30  ;;  %v68_v37 = vld [vmem:[%s7858_s2 + $0x70] sm:$0xff]  ;;  %v4576_v40 = vcombine.low %v56_v29, %v60_v30  ;;  %vm4555_vm7 = vcmask 195584   ;;  %vm4558_vm8 = vcmask 392192  }
   0x5   :  { %v4581_v7 = vcombine.high %v62_v2, %v66_v6  ;;  %v70_v8 = vld [vmem:[%s7858_s2 + $0x80] sm:$0xff]  ;;  %294 = vmatprep.subr.bf16.mxu0 %v4573_v4  ;;  %v4580_v13 = vcombine.low %v62_v2, %v66_v6  ;;  %v4583_v18 = vcombine.high %v63_v12, %v67_v16  ;;  %v71_v19 = vld [vmem:[%s7858_s2 + $0x88] sm:$0xff]  ;;  %335 = vmatprep.subr.bf16.mxu1 %v4575_v14  ;;  %v72_v42 = vld [vmem:[%s7858_s2 + $0x90] sm:$0xff]  ;;  %vm4561_vm9 = vcmask 654336  }
   0x6   :  { %v74_v9 = vld [vmem:[%s7858_s2 + $0xa0] sm:$0xff]  ;;  %295 = vmatpush1.bf16.msra.mxu0 %v4572_v5  ;;  %v75_v20 = vld [vmem:[%s7858_s2 + $0xa8] sm:$0xff]  ;;  %336 = vmatpush1.bf16.msra.mxu1 %v4574_v15  ;;  %v4582_v23 = vcombine.low %v63_v12, %v67_v16  ;;  %v4585_v41 = vcombine.high %v64_v36, %v68_v37  ;;  %v76_v43 = vld [vmem:[%s7858_s2 + $0xb0] sm:$0xff]  ;;  %v4584_v44 = vcombine.low %v64_v36, %v68_v37  ;;  %vm4563_vm10 = vcmask 785408  }
   0x7   :  { %296 = vmatprep.subr.bf16.mxu0 %v4581_v7  ;;  %v4589_v17 = vcombine.high %v70_v8, %v74_v9  ;;  %v78_v21 = vld [vmem:[%s7858_s2 + $0xc0] sm:$0xff]  ;;  %v4588_v24 = vcombine.low %v70_v8, %v74_v9  ;;  %337 = vmatprep.subr.bf16.mxu1 %v4583_v18  ;;  %v4591_v25 = vcombine.high %v71_v19, %v75_v20  ;;  %v79_v27 = vld [vmem:[%s7858_s2 + $0xc8] sm:$0xff]  ;;  %v80_v46 = vld [vmem:[%s7858_s2 + $0xd0] sm:$0xff]  ;;  %vm4565_vm11 = vcmask 916480  }
   0x8   :  { %v82_v22 = vld [vmem:[%s7858_s2 + $0xe0] sm:$0xff]  ;;  %v83_v28 = vld [vmem:[%s7858_s2 + $0xe8] sm:$0xff]  ;;  %v4590_v31 = vcombine.low %v71_v19, %v75_v20  ;;  %v4593_v45 = vcombine.high %v72_v42, %v76_v43  ;;  %v84_v47 = vld [vmem:[%s7858_s2 + $0xf0] sm:$0xff]  ;;  %v4592_v48 = vcombine.low %v72_v42, %v76_v43 }
   0x9   :  { %v4597_v26 = vcombine.high %v78_v21, %v82_v22  ;;  %v4596_v32 = vcombine.low %v78_v21, %v82_v22  ;;  %v51_v33 = vld [vmem:[%s7860_s0] sm:$0xff]  ;;  %v4599_v34 = vcombine.high %v79_v27, %v83_v28  ;;  %v4598_v39 = vcombine.low %v79_v27, %v83_v28  ;;  %v5748_v53 = vld [vmem:[%s7859_s3 + $0x14] ss:$8 sps:$4 sm:$0xff]   ;;  %v5746_v54 = vld [vmem:[%s7859_s3 + $0x10] ss:$8 sps:$4 sm:$0xff]  }
   0xa   :  { %297 = vmatpush1.bf16.msra.mxu0 %v4580_v13  ;;  %338 = vmatpush1.bf16.msra.mxu1 %v4582_v23  ;;  %v6416_v38 = vpack.c.bf16 %v51_v33, %v51_v33  ;;  %v4601_v49 = vcombine.high %v80_v46, %v84_v47  ;;  %v5745_v50 = vld [vmem:[%s7859_s3 + $0x4] ss:$8 sps:$4 sm:$0xff]   ;;  %v4600_v51 = vcombine.low %v80_v46, %v84_v47  ;;  %v5743_v52 = vld [vmem:[%s7859_s3] ss:$8 sps:$4 sm:$0xff]   ;;  %v5754_v57 = vld [vmem:[%s7859_s3 + $0x34] ss:$8 sps:$4 sm:$0xff]  }
   0xb   :  { %298 = vmatprep.subr.bf16.mxu0 %v4589_v17  ;;  %339 = vmatprep.subr.bf16.mxu1 %v4591_v25  ;;  %v5751_v55 = vld [vmem:[%s7859_s3 + $0x24] ss:$8 sps:$4 sm:$0xff]   ;;  %v5749_v56 = vld [vmem:[%s7859_s3 + $0x20] ss:$8 sps:$4 sm:$0xff]   ;;  %v5752_v58 = vld [vmem:[%s7859_s3 + $0x30] ss:$8 sps:$4 sm:$0xff]  }
   0xc   :  { %v5757_v59 = vld [vmem:[%s7859_s3 + $0x44] ss:$8 sps:$4 sm:$0xff]   ;;  %v5755_v60 = vld [vmem:[%s7859_s3 + $0x40] ss:$8 sps:$4 sm:$0xff]   ;;  %v5760_v61 = vld [vmem:[%s7859_s3 + $0x54] ss:$8 sps:$4 sm:$0xff]  }
   0xd   :  { %v5758_v62 = vld [vmem:[%s7859_s3 + $0x50] ss:$8 sps:$4 sm:$0xff]   ;;  %v5763_v63 = vld [vmem:[%s7859_s3 + $0x64] ss:$8 sps:$4 sm:$0xff]   ;;  %v5761_v0 = vld [vmem:[%s7859_s3 + $0x60] ss:$8 sps:$4 sm:$0xff]  }
   0xe   :  { %299 = vmatpush1.bf16.msra.mxu0 %v4588_v24  ;;  %340 = vmatpush1.bf16.msra.mxu1 %v4590_v31  ;;  %v5766_v1 = vld [vmem:[%s7859_s3 + $0x74] ss:$8 sps:$4 sm:$0xff]   ;;  %v5764_v2 = vld [vmem:[%s7859_s3 + $0x70] ss:$8 sps:$4 sm:$0xff]   ;;  %v5769_v4 = vld [vmem:[%s7859_s3 + $0x84] ss:$8 sps:$4 sm:$0xff]  }
   0xf   :  { %300 = vmatprep.subr.bf16.mxu0 %v4597_v26  ;;  %341 = vmatprep.subr.bf16.mxu1 %v4599_v34  ;;  %v5767_v5 = vld [vmem:[%s7859_s3 + $0x80] ss:$8 sps:$4 sm:$0xff]   ;;  %v5772_v6 = vld [vmem:[%s7859_s3 + $0x94] ss:$8 sps:$4 sm:$0xff]   ;;  %v5770_v7 = vld [vmem:[%s7859_s3 + $0x90] ss:$8 sps:$4 sm:$0xff]  }
  0x10   :  { %v5775_v8 = vld [vmem:[%s7859_s3 + $0xa4] ss:$8 sps:$4 sm:$0xff]   ;;  %v5773_v9 = vld [vmem:[%s7859_s3 + $0xa0] ss:$8 sps:$4 sm:$0xff]   ;;  %v5778_v10 = vld [vmem:[%s7859_s3 + $0xb4] ss:$8 sps:$4 sm:$0xff]  }
  0x11   :  { %v5776_v11 = vld [vmem:[%s7859_s3 + $0xb0] ss:$8 sps:$4 sm:$0xff]   ;;  %v5781_v12 = vld [vmem:[%s7859_s3 + $0xc4] ss:$8 sps:$4 sm:$0xff]   ;;  %v5779_v13 = vld [vmem:[%s7859_s3 + $0xc0] ss:$8 sps:$4 sm:$0xff]  }
  0x12   :  { %301 = vmatpush1.bf16.msra.mxu0 %v4596_v32  ;;  %342 = vmatpush1.bf16.msra.mxu1 %v4598_v39  ;;  %v5784_v14 = vld [vmem:[%s7859_s3 + $0xd4] ss:$8 sps:$4 sm:$0xff]   ;;  %v5782_v15 = vld [vmem:[%s7859_s3 + $0xd0] ss:$8 sps:$4 sm:$0xff]   ;;  %v5787_v16 = vld [vmem:[%s7859_s3 + $0xe4] ss:$8 sps:$4 sm:$0xff]  }
  0x13   :  { %376 = vmatprep.subr.bf16.mxu0 %v4577_v35  ;;  %v5785_v17 = vld [vmem:[%s7859_s3 + $0xe0] ss:$8 sps:$4 sm:$0xff]   ;;  %v5790_v18 = vld [vmem:[%s7859_s3 + $0xf4] ss:$8 sps:$4 sm:$0xff]   ;;  %v5788_v19 = vld [vmem:[%s7859_s3 + $0xf0] ss:$8 sps:$4 sm:$0xff]  }
  0x14   :  { %v5793_v20 = vld [vmem:[%s7859_s3 + $0x104] ss:$8 sps:$4 sm:$0xff]   ;;  %v57_v21 = vld [vmem:[%s7858_s2 + $0x18] sm:$0xff]  ;;  %v5843_v42 = vld [vmem:[%s7861_s4 + $0x50] sm:$0xff]  }
  0x15   :  { %4604 = vmatmul.mubr.msk.bf16.vlgmr.msra.gmra.mrb[0].mxu0 %vm290_vm0, %v6416_v38  ;;  %4605 = vmatmul.mubr.msk.bf16.vlgmr.msra.gmra.mrb[0].mxu1 %vm290_vm0, %v6416_v38  ;;  %v61_v22 = vld [vmem:[%s7858_s2 + $0x38] sm:$0xff]  ;;  %v5839_v36 = vld [vmem:[%s7861_s4 + $0x40] sm:$0xff]   ;;  %v5844_v43 = vld [vmem:[%s7861_s4 + $0x10] sm:$0xff]  }
  0x16   :  { %377 = vmatpush1.bf16.msra.mxu0 %v4576_v40  ;;  %408 = vmatprep.mubr.bf16.mxu0 %v6259_v3  ;;  %v65_v23 = vld [vmem:[%s7858_s2 + $0x58] sm:$0xff]  ;;  %v4578_v24 = vcombine.low %v57_v21, %v61_v22  ;;  %v4579_v25 = vcombine.high %v57_v21, %v61_v22  ;;  %v5840_v39 = vld [vmem:[%s7861_s4] sm:$0xff]   ;;  %v5841_v40 = vld [vmem:[%s7861_s4 + $0x48] sm:$0xff]  }
  0x17   :  { %378 = vmatprep.subr.bf16.mxu0 %v4585_v41  ;;  %449 = vmatprep.mubr.bf16.mxu1 %v6259_v3  ;;  %v69_v26 = vld [vmem:[%s7858_s2 + $0x78] sm:$0xff]  ;;  %v5842_v41 = vld [vmem:[%s7861_s4 + $0x8] sm:$0xff]  }
  0x18   :  { %v4587_v27 = vcombine.high %v65_v23, %v69_v26  ;;  %v73_v28 = vld [vmem:[%s7858_s2 + $0x98] sm:$0xff]  ;;  %417 = vmatprep.subr.bf16.mxu1 %v4579_v25  ;;  %v4586_v30 = vcombine.low %v65_v23, %v69_v26  ;;  %v5805_v21 = vld [vmem:[%s7859_s3 + $0x144] ss:$8 sps:$4 sm:$0xff]   ;;  %v5803_v22 = vld [vmem:[%s7859_s3 + $0x140] ss:$8 sps:$4 sm:$0xff]  }
  0x19   :  { %v77_v29 = vld [vmem:[%s7858_s2 + $0xb8] sm:$0xff]  ;;  %418 = vmatpush1.bf16.msra.mxu1 %v4578_v24  ;;  %v5811_v25 = vld [vmem:[%s7859_s3 + $0x164] ss:$8 sps:$4 sm:$0xff]   ;;  %v5809_v26 = vld [vmem:[%s7859_s3 + $0x160] ss:$8 sps:$4 sm:$0xff]  }
  0x1a   :  { %379 = vmatpush1.bf16.msra.mxu0 %v4584_v44  ;;  %419 = vmatprep.subr.bf16.mxu1 %v4587_v27  ;;  %v4595_v31 = vcombine.high %v73_v28, %v77_v29  ;;  %v81_v32 = vld [vmem:[%s7858_s2 + $0xd8] sm:$0xff]  ;;  %v4594_v34 = vcombine.low %v73_v28, %v77_v29  ;;  %v5817_v29 = vld [vmem:[%s7859_s3 + $0x184] ss:$8 sps:$4 sm:$0xff]  }
  0x1b   :  { %380 = vmatprep.subr.bf16.mxu0 %v4593_v45  ;;  %v85_v33 = vld [vmem:[%s7858_s2 + $0xf8] sm:$0xff]  ;;  %v90_v45 = vlaneseq }
  0x1c   :  { %v4603_v35 = vcombine.high %v81_v32, %v85_v33  ;;  %v4602_v37 = vcombine.low %v81_v32, %v85_v33  ;;  %v5845_v44 = vld [vmem:[%s7861_s4 + $0x58] sm:$0xff]   ;;  %v5823_v33 = vld [vmem:[%s7859_s3 + $0x1a4] ss:$8 sps:$4 sm:$0xff]  }
  0x1d   :  { %420 = vmatpush1.bf16.msra.mxu1 %v4586_v30  ;;  %v6587_v46 = vshrl.u32 %v90_v45, 7  ;;  %v86_v47 = vld [vmem:[%s7862_s13] ss:$8 sm:$0xf]  ;;  %v5808_v23 = vld [vmem:[%s7859_s3 + $0x154] ss:$8 sps:$4 sm:$0xff]  }
  0x1e   :  { %381 = vmatpush1.bf16.msra.mxu0 %v4592_v48  ;;  %421 = vmatprep.subr.bf16.mxu1 %v4595_v31  ;;  %v87_v48 = vld [vmem:[%s7862_s13] ss:$8 sm:$0xf0]  ;;  %v5814_v27 = vld [vmem:[%s7859_s3 + $0x174] ss:$8 sps:$4 sm:$0xff]  }
  0x1f   :  { %382 = vmatprep.subr.bf16.mxu0 %v4601_v49  ;;  %v6595_v49 = vor.u32 %v87_v48, %v86_v47  ;;  %v5806_v24 = vld [vmem:[%s7859_s3 + $0x150] ss:$8 sps:$4 sm:$0xff]   ;;  %v5815_v30 = vld [vmem:[%s7859_s3 + $0x180] ss:$8 sps:$4 sm:$0xff]   ;;  %v5820_v31 = vld [vmem:[%s7859_s3 + $0x194] ss:$8 sps:$4 sm:$0xff]  }
  0x20   :  { %v5812_v28 = vld [vmem:[%s7859_s3 + $0x170] ss:$8 sps:$4 sm:$0xff]   ;;  %v5833_v45 = vld [vmem:[%s7859_s3 + $0x1e0] ss:$8 sps:$4 sm:$0xff]   ;;  %v5838_v47 = vld [vmem:[%s7859_s3 + $0x1f4] ss:$8 sps:$4 sm:$0xff]  }
  0x21   :  { %422 = vmatpush1.bf16.msra.mxu1 %v4594_v34  ;;  %v5818_v32 = vld [vmem:[%s7859_s3 + $0x190] ss:$8 sps:$4 sm:$0xff]   ;;  %v5821_v34 = vld [vmem:[%s7859_s3 + $0x1a0] ss:$8 sps:$4 sm:$0xff]  }
  0x22   :  { %383 = vmatpush1.bf16.msra.mxu0 %v4600_v51  ;;  %423 = vmatprep.subr.bf16.mxu1 %v4603_v35  ;;  %v6601_v51 = vsub.s32 1, %v6587_v46  ;;  %v100_v35 = vsub.s32 2, %v6587_v46  ;;  %v5836_v48 = vld [vmem:[%s7859_s3 + $0x1f0] ss:$8 sps:$4 sm:$0xff]  }
  0x23   :  { %871 = vmatprep.subr.bf16.mxu0 %v5745_v50  ;;  %v6598_v50 = vsub.s32 0, %v6587_v46 }
  0x25   :  { %4606 = vmatmul.mubr.msk.bf16.vlgmr.msra.gmra.mrb[4].mxu0 %vm290_vm0, %v6416_v38  ;;  %424 = vmatpush1.bf16.msra.mxu1 %v4602_v37  ;;  %v101_v37 = vrot.slane %v6595_v49, %v100_v35 }
  0x26   :  { %872 = vmatpush1.bf16.msra.mxu0 %v5743_v52  ;;  %5244 = vmatprep.subr.bf16.mxu1 %v5839_v36  ;;  %v93_v52 = vrot.slane %v6595_v49, %v6598_v50  ;;  %v5826_v36 = vld [vmem:[%s7859_s3 + $0x1b4] ss:$8 sps:$4 sm:$0xff]  }
  0x27   :  { %873 = vmatprep.subr.bf16.mxu0 %v5748_v53  ;;  %v104_v53 = vsub.s32 3, %v6587_v46 }
  0x28   :  { %4607 = vmatmul.mubr.msk.bf16.vlgmr.msra.gmra.mrb[4].mxu1 %vm290_vm0, %v6416_v38  ;;  %v5846_v38 = vld [vmem:[%s7861_s4 + $0x18] sm:$0xff]  }
  0x29   :  { %5245 = vmatpush3.bf16.msra.mxu1 %v5840_v39  ;;  %v5824_v39 = vld [vmem:[%s7859_s3 + $0x1b0] ss:$8 sps:$4 sm:$0xff]  }
  0x2a   :  { %874 = vmatpush1.bf16.msra.mxu0 %v5746_v54  ;;  %5246 = vmatprep.subr.bf16.mxu1 %v5841_v40  ;;  %v97_v54 = vrot.slane %v6595_v49, %v6601_v51  ;;  %v5829_v40 = vld [vmem:[%s7859_s3 + $0x1c4] ss:$8 sps:$4 sm:$0xff]  }
  0x2b   :  { %875 = vmatprep.subr.bf16.mxu0 %v5751_v55 }
  0x2d   :  { %5247 = vmatpush3.bf16.msra.mxu1 %v5842_v41 }
  0x2e   :  { %876 = vmatpush1.bf16.msra.mxu0 %v5749_v56  ;;  %5248 = vmatprep.subr.bf16.mxu1 %v5843_v42  ;;  %v5827_v42 = vld [vmem:[%s7859_s3 + $0x1c0] ss:$8 sps:$4 sm:$0xff]  }
  0x2f   :  { %877 = vmatprep.subr.bf16.mxu0 %v5754_v57 }
  0x31   :  { %5249 = vmatpush3.bf16.msra.mxu1 %v5844_v43  ;;  %v5832_v43 = vld [vmem:[%s7859_s3 + $0x1d4] ss:$8 sps:$4 sm:$0xff]  }
  0x32   :  { %878 = vmatpush1.bf16.msra.mxu0 %v5752_v58  ;;  %5250 = vmatprep.subr.bf16.mxu1 %v5845_v44  ;;  %v105_v58 = vrot.slane %v6595_v49, %v104_v53  ;;  %v5830_v44 = vld [vmem:[%s7859_s3 + $0x1d0] ss:$8 sps:$4 sm:$0xff]  }
  0x33   :  { %879 = vmatprep.subr.bf16.mxu0 %v5757_v59 }
  0x35   :  { %5251 = vmatpush3.bf16.msra.mxu1 %v5846_v38  ;;  %v5835_v38 = vld [vmem:[%s7859_s3 + $0x1e4] ss:$8 sps:$4 sm:$0xff]  }
  0x36   :  { %880 = vmatpush1.bf16.msra.mxu0 %v5755_v60 }
  0x37   :  { %881 = vmatprep.subr.bf16.mxu0 %v5760_v61 }
  0x3a   :  { %882 = vmatpush1.bf16.msra.mxu0 %v5758_v62 }
  0x3b   :  { %883 = vmatprep.subr.bf16.mxu0 %v5763_v63 }
  0x3e   :  { %884 = vmatpush1.bf16.msra.mxu0 %v5761_v0 }
  0x3f   :  { %885 = vmatprep.subr.bf16.mxu0 %v5766_v1 }
  0x42   :  { %886 = vmatpush1.bf16.msra.mxu0 %v5764_v2 }
  0x43   :  { %887 = vmatprep.subr.bf16.mxu0 %v5769_v4 }
  0x46   :  { %888 = vmatpush1.bf16.msra.mxu0 %v5767_v5 }
  0x47   :  { %889 = vmatprep.subr.bf16.mxu0 %v5772_v6 }
  0x4a   :  { %890 = vmatpush1.bf16.msra.mxu0 %v5770_v7  ;;  %v5791_v7 = vld [vmem:[%s7859_s3 + $0x100] ss:$8 sps:$4 sm:$0xff]  }
  0x4b   :  { %891 = vmatprep.subr.bf16.mxu0 %v5775_v8 }
  0x4e   :  { %892 = vmatpush1.bf16.msra.mxu0 %v5773_v9  ;;  %v5796_v9 = vld [vmem:[%s7859_s3 + $0x114] ss:$8 sps:$4 sm:$0xff]  }
  0x4f   :  { %893 = vmatprep.subr.bf16.mxu0 %v5778_v10 }
  0x52   :  { %894 = vmatpush1.bf16.msra.mxu0 %v5776_v11 }
  0x53   :  { %895 = vmatprep.subr.bf16.mxu0 %v5781_v12 }
  0x56   :  { %896 = vmatpush1.bf16.msra.mxu0 %v5779_v13 }
  0x57   :  { %897 = vmatprep.subr.bf16.mxu0 %v5784_v14 }
  0x5a   :  { %898 = vmatpush1.bf16.msra.mxu0 %v5782_v15  ;;  %v5794_v15 = vld [vmem:[%s7859_s3 + $0x110] ss:$8 sps:$4 sm:$0xff]  }
  0x5b   :  { %899 = vmatprep.subr.bf16.mxu0 %v5787_v16 }
  0x5e   :  { %900 = vmatpush1.bf16.msra.mxu0 %v5785_v17  ;;  %v5799_v17 = vld [vmem:[%s7859_s3 + $0x124] ss:$8 sps:$4 sm:$0xff]  }
  0x5f   :  { %901 = vmatprep.subr.bf16.mxu0 %v5790_v18  ;;  %v5797_v18 = vld [vmem:[%s7859_s3 + $0x120] ss:$8 sps:$4 sm:$0xff]  }
  0x62   :  { %902 = vmatpush1.bf16.msra.mxu0 %v5788_v19  ;;  %v5802_v19 = vld [vmem:[%s7859_s3 + $0x134] ss:$8 sps:$4 sm:$0xff]  }
  0x63   :  { %912 = vmatprep.subr.bf16.mxu0 %v5793_v20  ;;  %v5800_v20 = vld [vmem:[%s7859_s3 + $0x130] ss:$8 sps:$4 sm:$0xff]  }
  0xe8   :  { %v328_v55 = vpop.f32.mrb[0].mxu0  ;;  %v6611_v62 = vpop.f32.mrb[0].mxu1 }
  0xe9   :  { %v329_v56 = vadd.f32 %v328_v55, %v93_v52  ;;  %v330_v57 = vpop.f32.mrb[1].mxu0  ;;  %v371_v63 = vpop.f32.mrb[1].mxu1  ;;  %v370_v41 = vadd.f32 %v6611_v62, %v101_v37  ;;  %v5847_v55 = vld [vmem:[%s7861_s4 + $0x60] sm:$0xff]   ;;  %v5854_v62 = vld [vmem:[%s7861_s4 + $0x38] sm:$0xff]  }
  0xea   :  { %v331_v59 = vadd.f32 %v330_v57, %v97_v54  ;;  %v332_v60 = vpop.f32.mrb[2].mxu0  ;;  %v372_v0 = vadd.f32 %v371_v63, %v105_v58  ;;  %v373_v1 = vpop.f32.mrb[2].mxu1  ;;  %5252 = vmatprep.subr.bf16.mxu1 %v5847_v55  ;;  %v5849_v57 = vld [vmem:[%s7861_s4 + $0x68] sm:$0xff]  }
  0xeb   :  { %6159 = vtanh.f32 %v329_v56  ;;  %v333_v61 = vpop.f32.mrb[3].mxu0  ;;  %v374_v2 = vpop.f32.mrb[3].mxu1  ;;  %v5848_v56 = vld [vmem:[%s7861_s4 + $0x20] sm:$0xff]   ;;  %v5850_v58 = vld [vmem:[%s7861_s4 + $0x28] sm:$0xff]   ;;  %v5852_v60 = vld [vmem:[%s7861_s4 + $0x30] sm:$0xff]  }
  0xec   :  { %6161 = vtanh.f32 %v331_v59  ;;  %5253 = vmatpush3.bf16.msra.mxu1 %v5848_v56  ;;  %v5851_v59 = vld [vmem:[%s7861_s4 + $0x70] sm:$0xff]   ;;  %v5853_v61 = vld [vmem:[%s7861_s4 + $0x78] sm:$0xff]  }
  0xed   :  { %6163 = vtanh.f32 %v372_v0  ;;  %5254 = vmatprep.subr.bf16.mxu1 %v5849_v57  ;;  %v6260_v0 = vmov 0.0  }
  0xee   :  { %6165 = vtanh.f32 %v370_v41  ;;  %v5865_v41 = vld [vmem:[%s7865_s6 + $0x10] sm:$0xff]  }
  0xf0   :  { %5255 = vmatpush3.bf16.msra.mxu1 %v5850_v58 }
  0xf1   :  { %5256 = vmatprep.subr.bf16.mxu1 %v5851_v59  ;;  %v5867_v59 = vld [vmem:[%s7859_s3 + $0x200] ss:$8 sps:$4 sm:$0xff]  }
  0xf4   :  { %5257 = vmatpush3.bf16.msra.mxu1 %v5852_v60 }
  0xf5   :  { %v6160_v4 = vpop.eup %6159  ;;  %5258 = vmatprep.subr.bf16.mxu1 %v5853_v61 }
  0xf6   :  { %v6162_v5 = vpop.eup %6161  ;;  %v466_v8 = vpack.c.bf16 %v6160_v4, %v6160_v4 }
  0xf7   :  { %v467_v6 = vpack.c.bf16 %v6162_v5, %v6162_v5  ;;  %v6164_v11 = vpop.eup %6163  ;;  %v4608_v5 = vld [vmem:[%s7862_s13 + $0x1] ss:$8 sm:$0x3] }
  0xf8   :  { %v6619_v10 = vpop.f32.mrb[4].mxu0  ;;  %v469_v13 = vpack.c.bf16 %v6164_v11, %v6164_v11  ;;  %v6166_v52 = vpop.eup %6165  ;;  %5259 = vmatpush3.bf16.msra.mxu1 %v5854_v62  ;;  %v5870_v62 = vld [vmem:[%s7859_s3 + $0x210] ss:$8 sps:$4 sm:$0xff]  }
  0xf9   :  { %903 = vmatprep.mubr.bf16.mxu0 %v467_v6  ;;  %v6621_v12 = vpop.f32.mrb[5].mxu0  ;;  %v468_v54 = vpack.c.bf16 %v6166_v52, %v6166_v52  ;;  %5431 = vmatprep.subr.bf16.mxu1 %v6260_v0  ;;  %v544_v6 = vrot.slane %v4608_v5, %v6598_v50 }
  0xfa   :  { %904 = vmatmul.mubr.bf16.vlgmr.msra.gmra.mrb[8].mxu0 %v466_v8  ;;  %v414_v14 = vpop.f32.mrb[6].mxu0 }
  0xfb   :  { %913 = vmatpush1.bf16.msra.mxu0 %v5791_v7  ;;  %v415_v16 = vpop.f32.mrb[7].mxu0  ;;  %944 = vmatprep.mubr.bf16.mxu0 %v469_v13  ;;  %v6739_v63 = vpop.f32.mrb[4].mxu1  ;;  %v548_v7 = vrot.slane %v4608_v5, %v6601_v51  ;;  %v5878_v5 = vld [vmem:[%s7859_s3 + $0x234] ss:$8 sps:$4 sm:$0xff]  }
  0xfc   :  { %914 = vmatprep.subr.bf16.mxu0 %v5796_v9  ;;  %v6742_v1 = vpop.f32.mrb[5].mxu1 }
  0xfd   :  { %v455_v2 = vpop.f32.mrb[6].mxu1 }
  0xfe   :  { %v456_v4 = vpop.f32.mrb[7].mxu1  ;;  %v5875_v2 = vld [vmem:[%s7859_s3 + $0x224] ss:$8 sps:$4 sm:$0xff]  }
  0xff   :  { %915 = vmatpush1.bf16.msra.mxu0 %v5794_v15  ;;  %v5873_v4 = vld [vmem:[%s7859_s3 + $0x220] ss:$8 sps:$4 sm:$0xff]  }
 0x100   :  { %916 = vmatprep.subr.bf16.mxu0 %v5799_v17 }
 0x103   :  { %917 = vmatpush1.bf16.msra.mxu0 %v5797_v18 }
 0x104   :  { %918 = vmatprep.subr.bf16.mxu0 %v5802_v19  ;;  %v5855_v19 = vld [vmem:[%s7863_s5] sm:$0xff]  }
 0x107   :  { %919 = vmatpush1.bf16.msra.mxu0 %v5800_v20 }
 0x108   :  { %920 = vmatprep.subr.bf16.mxu0 %v5805_v21  ;;  %v5856_v21 = vld [vmem:[%s7863_s5 + $0x8] sm:$0xff]  }
 0x10b   :  { %921 = vmatpush1.bf16.msra.mxu0 %v5803_v22  ;;  %v5857_v22 = vld [vmem:[%s7863_s5 + $0x10] sm:$0xff]  }
 0x10c   :  { %922 = vmatprep.subr.bf16.mxu0 %v5808_v23  ;;  %v5858_v23 = vld [vmem:[%s7863_s5 + $0x18] sm:$0xff]  }
 0x10f   :  { %923 = vmatpush1.bf16.msra.mxu0 %v5806_v24  ;;  %v5859_v24 = vld [vmem:[%s7863_s5 + $0x20] sm:$0xff]  }
 0x110   :  { %924 = vmatprep.subr.bf16.mxu0 %v5811_v25  ;;  %v5860_v25 = vld [vmem:[%s7863_s5 + $0x28] sm:$0xff]  }
 0x113   :  { %925 = vmatpush1.bf16.msra.mxu0 %v5809_v26  ;;  %v5861_v26 = vld [vmem:[%s7863_s5 + $0x30] sm:$0xff]  }
 0x114   :  { %926 = vmatprep.subr.bf16.mxu0 %v5814_v27  ;;  %v5862_v27 = vld [vmem:[%s7863_s5 + $0x38] sm:$0xff]  }
 0x117   :  { %927 = vmatpush1.bf16.msra.mxu0 %v5812_v28 }
 0x118   :  { %928 = vmatprep.subr.bf16.mxu0 %v5817_v29  ;;  %v4673_v29 = vld [vmem:[%s7864_s14] ss:$0 sm:$0xff] }
 0x11b   :  { %929 = vmatpush1.bf16.msra.mxu0 %v5815_v30 }
 0x11c   :  { %930 = vmatprep.subr.bf16.mxu0 %v5820_v31 }
 0x11f   :  { %931 = vmatpush1.bf16.msra.mxu0 %v5818_v32 }
 0x120   :  { %932 = vmatprep.subr.bf16.mxu0 %v5823_v33 }
 0x123   :  { %933 = vmatpush1.bf16.msra.mxu0 %v5821_v34 }
 0x124   :  { %934 = vmatprep.subr.bf16.mxu0 %v5826_v36 }
 0x127   :  { %935 = vmatpush1.bf16.msra.mxu0 %v5824_v39  ;;  %v5863_v39 = vld [vmem:[%s7865_s6] sm:$0xff]  }
 0x128   :  { %936 = vmatprep.subr.bf16.mxu0 %v5829_v40  ;;  %v5864_v40 = vld [vmem:[%s7865_s6 + $0x8] sm:$0xff]  }
 0x12b   :  { %937 = vmatpush1.bf16.msra.mxu0 %v5827_v42  ;;  %v5866_v42 = vld [vmem:[%s7865_s6 + $0x18] sm:$0xff]  }
 0x12c   :  { %938 = vmatprep.subr.bf16.mxu0 %v5832_v43  ;;  %v5869_v43 = vld [vmem:[%s7859_s3 + $0x204] ss:$8 sps:$4 sm:$0xff]  }
 0x12f   :  { %939 = vmatpush1.bf16.msra.mxu0 %v5830_v44  ;;  %v112_v44 = vsub.s32 5, %v6587_v46 }
 0x130   :  { %940 = vmatprep.subr.bf16.mxu0 %v5835_v38 }
 0x131   :  { %v113_v38 = vrot.slane %v6595_v49, %v112_v44  ;;  %v5920_v44 = vld [vmem:[%s7859_s3 + $0x314] ss:$8 sps:$4 sm:$0xff]  }
 0x133   :  { %941 = vmatpush1.bf16.msra.mxu0 %v5833_v45  ;;  %v413_v45 = vadd.f32 %v6621_v12, %v113_v38  ;;  %v5872_v12 = vld [vmem:[%s7859_s3 + $0x214] ss:$8 sps:$4 sm:$0xff]  }
 0x134   :  { %942 = vmatprep.subr.bf16.mxu0 %v5838_v47  ;;  %v4690_v47 = vld [vmem:[%s7864_s14 + $0x2] ss:$0 sm:$0xff] }
 0x137   :  { %943 = vmatpush1.bf16.msra.mxu0 %v5836_v48 }
 0x13a   :  { %945 = vmatmul.mubr.bf16.vlgmr.msra.gmra.mrb[8].mxu0 %v468_v54 }
 0x20d   :  { %v946_v8 = vpop.f32.mrb[8].mxu0 }
 0x20e   :  { %v5719_v9 = vadd.f32 %v946_v8, %v544_v6  ;;  %v948_v11 = vpop.f32.mrb[9].mxu0  ;;  %v5876_v6 = vld [vmem:[%s7859_s3 + $0x230] ss:$8 sps:$4 sm:$0xff]   ;;  %v5879_v8 = vld [vmem:[%s7859_s3 + $0x240] ss:$8 sps:$4 sm:$0xff]  }
 0x20f   :  { %v5720_v13 = vadd.f32 %v948_v11, %v548_v7  ;;  %v950_v14 = vpop.f32.mrb[10].mxu0  ;;  %v5881_v7 = vld [vmem:[%s7859_s3 + $0x244] ss:$8 sps:$4 sm:$0xff]   ;;  %v5882_v11 = vld [vmem:[%s7859_s3 + $0x250] ss:$8 sps:$4 sm:$0xff]  }
 0x210   :  { %6167 = vtanh.f32 %v5719_v9  ;;  %v951_v15 = vpop.f32.mrb[11].mxu0  ;;  %v5884_v9 = vld [vmem:[%s7859_s3 + $0x254] ss:$8 sps:$4 sm:$0xff]   ;;  %v5885_v14 = vld [vmem:[%s7859_s3 + $0x260] ss:$8 sps:$4 sm:$0xff]  }
 0x211   :  { %6169 = vtanh.f32 %v5720_v13  ;;  %v5887_v13 = vld [vmem:[%s7859_s3 + $0x264] ss:$8 sps:$4 sm:$0xff]   ;;  %v5890_v15 = vld [vmem:[%s7859_s3 + $0x274] ss:$8 sps:$4 sm:$0xff]  }
 0x21a   :  { %v6168_v16 = vpop.eup %6167 }
 0x21b   :  { %v6170_v17 = vpop.eup %6169  ;;  %v955_v20 = vpack.c.bf16 %v6168_v16, %v6168_v16  ;;  %v5888_v16 = vld [vmem:[%s7859_s3 + $0x270] ss:$8 sps:$4 sm:$0xff]  }
 0x21c   :  { %v956_v18 = vpack.c.bf16 %v6170_v17, %v6170_v17  ;;  %v5893_v17 = vld [vmem:[%s7859_s3 + $0x284] ss:$8 sps:$4 sm:$0xff]  }
 0x21e   :  { %1122 = vmatprep.mubr.bf16.mxu1 %v956_v18  ;;  %v5891_v18 = vld [vmem:[%s7859_s3 + $0x280] ss:$8 sps:$4 sm:$0xff]  }
 0x21f   :  { %1123 = vmatmul.mubr.bf16.vlgmr.msra.gmra.mrb[8].mxu1 %v955_v20  ;;  %v5894_v20 = vld [vmem:[%s7859_s3 + $0x290] ss:$8 sps:$4 sm:$0xff]  }
 0x220   :  { %5432 = vmatpush3.bf16.msra.mxu1 %v5855_v19  ;;  %5447 = vmatprep.mubr.msk.bf16.mxu1 %vm6261_vm1, %v6260_v0  ;;  %v5896_v19 = vld [vmem:[%s7859_s3 + $0x294] ss:$8 sps:$4 sm:$0xff]  }
 0x221   :  { %5433 = vmatprep.subr.bf16.mxu1 %v6260_v0 }
 0x224   :  { %5434 = vmatpush3.bf16.msra.mxu1 %v5856_v21  ;;  %v5899_v21 = vld [vmem:[%s7859_s3 + $0x2a4] ss:$8 sps:$4 sm:$0xff]  }
 0x225   :  { %5435 = vmatprep.subr.bf16.mxu1 %v6260_v0 }
 0x228   :  { %5436 = vmatpush3.bf16.msra.mxu1 %v5857_v22  ;;  %v108_v22 = vsub.s32 4, %v6587_v46 }
 0x229   :  { %5437 = vmatprep.subr.bf16.mxu1 %v6260_v0 }
 0x22c   :  { %5438 = vmatpush3.bf16.msra.mxu1 %v5858_v23  ;;  %v5897_v23 = vld [vmem:[%s7859_s3 + $0x2a0] ss:$8 sps:$4 sm:$0xff]  }
 0x22d   :  { %5439 = vmatprep.subr.bf16.mxu1 %v6260_v0 }
 0x230   :  { %5440 = vmatpush3.bf16.msra.mxu1 %v5859_v24  ;;  %v120_v24 = vsub.s32 7, %v6587_v46 }
 0x231   :  { %5441 = vmatprep.subr.bf16.mxu1 %v6260_v0 }
 0x234   :  { %5442 = vmatpush3.bf16.msra.mxu1 %v5860_v25  ;;  %v5902_v25 = vld [vmem:[%s7859_s3 + $0x2b4] ss:$8 sps:$4 sm:$0xff]  }
 0x235   :  { %5443 = vmatprep.subr.bf16.mxu1 %v6260_v0 }
 0x238   :  { %5444 = vmatpush3.bf16.msra.mxu1 %v5861_v26  ;;  %v109_v26 = vrot.slane %v6595_v49, %v108_v22  ;;  %v5953_v22 = vld [vmem:[%s7859_s3 + $0x3c4] ss:$8 sps:$4 sm:$0xff]  }
 0x239   :  { %5445 = vmatprep.subr.bf16.mxu1 %v6260_v0 }
 0x23c   :  { %5446 = vmatpush3.bf16.msra.mxu1 %v5862_v27  ;;  %v5900_v27 = vld [vmem:[%s7859_s3 + $0x2b0] ss:$8 sps:$4 sm:$0xff]  }
 0x23d   :  { %5451 = vmatprep.subr.bf16.mxu1 %v6260_v0 }
 0x2f2   :  { %v5260_v28 = vpop.f32.mrb[8].mxu1 }
 0x2f3   :  { %v5261_v30 = vpop.f32.mrb[9].mxu1 }
 0x2f4   :  { %v5262_v31 = vadd.f32 %v5261_v30, %v5260_v28  ;;  %v5263_v32 = vpop.f32.mrb[10].mxu1  ;;  %v121_v28 = vrot.slane %v6595_v49, %v120_v24  ;;  %v411_v30 = vadd.f32 %v6619_v10, %v109_v26  ;;  %v5911_v10 = vld [vmem:[%s7859_s3 + $0x2e4] ss:$8 sps:$4 sm:$0xff]   ;;  %v5951_v24 = vld [vmem:[%s7859_s3 + $0x3c0] ss:$8 sps:$4 sm:$0xff]  }
 0x2f5   :  { %v5264_v33 = vpop.f32.mrb[11].mxu1  ;;  %v5957_v26 = vld [vmem:[%s7859_s3 + $0x3e0] ss:$8 sps:$4 sm:$0xff]  }
 0x2f6   :  { %v1125_v34 = vadd.f32 %v5262_v31, %v4673_v29  ;;  %v5905_v29 = vld [vmem:[%s7859_s3 + $0x2c4] ss:$8 sps:$4 sm:$0xff]   ;;  %v5903_v31 = vld [vmem:[%s7859_s3 + $0x2c0] ss:$8 sps:$4 sm:$0xff]   ;;  %v454_v32 = vadd.f32 %v6742_v1, %v121_v28  ;;  %v5908_v33 = vld [vmem:[%s7859_s3 + $0x2d4] ss:$8 sps:$4 sm:$0xff]  }
 0x2f7   :  { %v5909_v1 = vld [vmem:[%s7859_s3 + $0x2e0] ss:$8 sps:$4 sm:$0xff]   ;;  %v5960_v28 = vld [vmem:[%s7859_s3 + $0x3f0] ss:$8 sps:$4 sm:$0xff]  }
 0x2f8   :  { %6171 = vtanh.f32 %v1125_v34  ;;  %v5906_v34 = vld [vmem:[%s7859_s3 + $0x2d0] ss:$8 sps:$4 sm:$0xff]  }
 0x2f9   :  { %6173 = vtanh.f32 %v413_v45  ;;  %v5918_v45 = vld [vmem:[%s7859_s3 + $0x310] ss:$8 sps:$4 sm:$0xff]  }
 0x302   :  { %v6172_v36 = vpop.eup %6171 }
 0x303   :  { %v1131_v37 = vpack.c.bf16 %v6172_v36, %v6172_v36  ;;  %v6174_v57 = vpop.eup %6173  ;;  %v5914_v36 = vld [vmem:[%s7859_s3 + $0x2f4] ss:$8 sps:$4 sm:$0xff]  }
 0x304   :  { %v471_v61 = vpack.c.bf16 %v6174_v57, %v6174_v57  ;;  %v5932_v57 = vld [vmem:[%s7859_s3 + $0x354] ss:$8 sps:$4 sm:$0xff]  }
 0x305   :  { %5448 = vmatmul.mubr.bf16.vlgmr.msra.gmra.mrb[12].mxu1 %v1131_v37  ;;  %v5912_v37 = vld [vmem:[%s7859_s3 + $0x2f0] ss:$8 sps:$4 sm:$0xff]  }
 0x306   :  { %5459 = vmatprep.mubr.msk.bf16.mxu1 %vm6261_vm1, %v6260_v0  ;;  %5452 = vmatpush3.bf16.msra.mxu1 %v5863_v39  ;;  %v5917_v39 = vld [vmem:[%s7859_s3 + $0x304] ss:$8 sps:$4 sm:$0xff]  }
 0x307   :  { %5453 = vmatprep.subr.bf16.mxu1 %v6260_v0 }
 0x30a   :  { %5454 = vmatpush3.bf16.msra.mxu1 %v5864_v40 }
 0x30b   :  { %5455 = vmatprep.subr.bf16.mxu1 %v6260_v0 }
 0x30e   :  { %5456 = vmatpush3.bf16.msra.mxu1 %v5865_v41 }
 0x30f   :  { %5457 = vmatprep.subr.bf16.mxu1 %v6260_v0 }
 0x312   :  { %5458 = vmatpush3.bf16.msra.mxu1 %v5866_v42  ;;  %v5915_v42 = vld [vmem:[%s7859_s3 + $0x300] ss:$8 sps:$4 sm:$0xff]  }
 0x313   :  { %1721 = vmatprep.subr.bf16.mxu1 %v5869_v43 }
 0x3d8   :  { %v1235_v48 = vpop.f32.mrb[12].mxu1 }
 0x3d9   :  { %v1236_v52 = vadd.f32 %v4690_v47, %v1235_v48  ;;  %v5449_v54 = vpop.f32.mrb[13].mxu1  ;;  %v5923_v47 = vld [vmem:[%s7859_s3 + $0x324] ss:$8 sps:$4 sm:$0xff]   ;;  %v5921_v48 = vld [vmem:[%s7859_s3 + $0x320] ss:$8 sps:$4 sm:$0xff]  }
 0x3da   :  { %v1238_v55 = vpop.f32.mrb[14].mxu1  ;;  %v5924_v54 = vld [vmem:[%s7859_s3 + $0x330] ss:$8 sps:$4 sm:$0xff]  }
 0x3db   :  { %6175 = vtanh.f32 %v1236_v52  ;;  %v5450_v56 = vpop.f32.mrb[15].mxu1  ;;  %v5926_v52 = vld [vmem:[%s7859_s3 + $0x334] ss:$8 sps:$4 sm:$0xff]   ;;  %v5929_v55 = vld [vmem:[%s7859_s3 + $0x344] ss:$8 sps:$4 sm:$0xff]  }
 0x3dc   :  { %6177 = vtanh.f32 %v411_v30  ;;  %v5927_v56 = vld [vmem:[%s7859_s3 + $0x340] ss:$8 sps:$4 sm:$0xff]  }
 0x3dd   :  { %6179 = vtanh.f32 %v454_v32  ;;  %v5971_v32 = vld [vmem:[%s7861_s4 + $0xe0] sm:$0xff]  }
 0x3e5   :  { %v6176_v58 = vpop.eup %6175 }
 0x3e6   :  { %v1242_v60 = vpack.c.bf16 %v6176_v58, %v6176_v58  ;;  %v6178_v40 = vpop.eup %6177  ;;  %v5930_v58 = vld [vmem:[%s7859_s3 + $0x350] ss:$8 sps:$4 sm:$0xff]  }
 0x3e7   :  { %v6180_v41 = vpop.eup %6179  ;;  %v470_v43 = vpack.c.bf16 %v6178_v40, %v6178_v40  ;;  %v5976_v40 = vld [vmem:[%s7861_s4 + $0xb0] sm:$0xff]  }
 0x3e8   :  { %5460 = vmatmul.mubr.msk.bf16.vlgmr.msra.gmra.mrb[16].mxu1 %vm290_vm0, %v1242_v60  ;;  %v473_v38 = vpack.c.bf16 %v6180_v41, %v6180_v41  ;;  %v5933_v60 = vld [vmem:[%s7859_s3 + $0x360] ss:$8 sps:$4 sm:$0xff]   ;;  %v5977_v41 = vld [vmem:[%s7861_s4 + $0xf8] sm:$0xff]  }
 0x3e9   :  { %1722 = vmatpush1.bf16.msra.mxu1 %v5867_v59  ;;  %1753 = vmatprep.mubr.bf16.mxu1 %v471_v61  ;;  %v5935_v59 = vld [vmem:[%s7859_s3 + $0x364] ss:$8 sps:$4 sm:$0xff]  }
 0x3ea   :  { %1723 = vmatprep.subr.bf16.mxu1 %v5872_v12  ;;  %v5938_v12 = vld [vmem:[%s7859_s3 + $0x374] ss:$8 sps:$4 sm:$0xff]   ;;  %v5963_v61 = vld [vmem:[%s7861_s4 + $0xc0] sm:$0xff]  }
 0x3eb   :  { %5280 = vmatprep.subr.bf16.mxu0 %v5963_v61  ;;  %v5981_v61 = vld [vmem:[%s7863_s5 + $0x50] sm:$0xff]  }
 0x3ed   :  { %1724 = vmatpush1.bf16.msra.mxu1 %v5870_v62  ;;  %v5964_v62 = vld [vmem:[%s7861_s4 + $0x80] sm:$0xff]  }
 0x3ee   :  { %1725 = vmatprep.subr.bf16.mxu1 %v5875_v2  ;;  %v5965_v2 = vld [vmem:[%s7861_s4 + $0xc8] sm:$0xff]   ;;  %5281 = vmatpush3.bf16.msra.mxu0 %v5964_v62  ;;  %v5982_v62 = vld [vmem:[%s7863_s5 + $0x58] sm:$0xff]  }
 0x3ef   :  { %5282 = vmatprep.subr.bf16.mxu0 %v5965_v2  ;;  %v5983_v2 = vld [vmem:[%s7863_s5 + $0x60] sm:$0xff]  }
 0x3f1   :  { %1726 = vmatpush1.bf16.msra.mxu1 %v5873_v4  ;;  %v5936_v4 = vld [vmem:[%s7859_s3 + $0x370] ss:$8 sps:$4 sm:$0xff]  }
 0x3f2   :  { %1727 = vmatprep.subr.bf16.mxu1 %v5878_v5  ;;  %v5966_v5 = vld [vmem:[%s7861_s4 + $0x88] sm:$0xff]  }
 0x3f3   :  { %5283 = vmatpush3.bf16.msra.mxu0 %v5966_v5  ;;  %v5985_v5 = vld [vmem:[%s7863_s5 + $0x70] sm:$0xff]  }
 0x3f5   :  { %1728 = vmatpush1.bf16.msra.mxu1 %v5876_v6  ;;  %v5941_v6 = vld [vmem:[%s7859_s3 + $0x384] ss:$8 sps:$4 sm:$0xff]  }
 0x3f6   :  { %1729 = vmatprep.subr.bf16.mxu1 %v5881_v7  ;;  %v5967_v7 = vld [vmem:[%s7861_s4 + $0xd0] sm:$0xff]  }
 0x3f7   :  { %5284 = vmatprep.subr.bf16.mxu0 %v5967_v7 }
 0x3f9   :  { %1730 = vmatpush1.bf16.msra.mxu1 %v5879_v8  ;;  %v5939_v8 = vld [vmem:[%s7859_s3 + $0x380] ss:$8 sps:$4 sm:$0xff]  }
 0x3fa   :  { %1731 = vmatprep.subr.bf16.mxu1 %v5884_v9  ;;  %v5968_v9 = vld [vmem:[%s7861_s4 + $0x90] sm:$0xff]  }
 0x3fb   :  { %5285 = vmatpush3.bf16.msra.mxu0 %v5968_v9 }
 0x3fd   :  { %1732 = vmatpush1.bf16.msra.mxu1 %v5882_v11  ;;  %v5944_v11 = vld [vmem:[%s7859_s3 + $0x394] ss:$8 sps:$4 sm:$0xff]  }
 0x3fe   :  { %1733 = vmatprep.subr.bf16.mxu1 %v5887_v13  ;;  %v5969_v13 = vld [vmem:[%s7861_s4 + $0xd8] sm:$0xff]  }
 0x3ff   :  { %5286 = vmatprep.subr.bf16.mxu0 %v5969_v13 }
 0x401   :  { %1734 = vmatpush1.bf16.msra.mxu1 %v5885_v14  ;;  %v5942_v14 = vld [vmem:[%s7859_s3 + $0x390] ss:$8 sps:$4 sm:$0xff]  }
 0x402   :  { %1735 = vmatprep.subr.bf16.mxu1 %v5890_v15  ;;  %v5970_v15 = vld [vmem:[%s7861_s4 + $0x98] sm:$0xff]  }
 0x403   :  { %5287 = vmatpush3.bf16.msra.mxu0 %v5970_v15 }
 0x404   :  { %5288 = vmatprep.subr.bf16.mxu0 %v5971_v32  ;;  %v5996_v32 = vld [vmem:[%s7866_s7 + $0xc] ss:$16 sps:$4 sm:$0xff]  }
 0x405   :  { %1736 = vmatpush1.bf16.msra.mxu1 %v5888_v16  ;;  %v5947_v16 = vld [vmem:[%s7859_s3 + $0x3a4] ss:$8 sps:$4 sm:$0xff]  }
 0x406   :  { %1737 = vmatprep.subr.bf16.mxu1 %v5893_v17  ;;  %v116_v17 = vsub.s32 6, %v6587_v46  ;;  %v6063_v46 = vld [vmem:[%s7868_s8 + $0x170] sm:$0xff]  }
 0x409   :  { %1738 = vmatpush1.bf16.msra.mxu1 %v5891_v18  ;;  %v5945_v18 = vld [vmem:[%s7859_s3 + $0x3a0] ss:$8 sps:$4 sm:$0xff]  }
 0x40a   :  { %1739 = vmatprep.subr.bf16.mxu1 %v5896_v19  ;;  %v5950_v19 = vld [vmem:[%s7859_s3 + $0x3b4] ss:$8 sps:$4 sm:$0xff]  }
 0x40d   :  { %1740 = vmatpush1.bf16.msra.mxu1 %v5894_v20  ;;  %v117_v20 = vrot.slane %v6595_v49, %v116_v17  ;;  %v5956_v49 = vld [vmem:[%s7859_s3 + $0x3d4] ss:$8 sps:$4 sm:$0xff]  }
 0x40e   :  { %1741 = vmatprep.subr.bf16.mxu1 %v5899_v21  ;;  %v5948_v21 = vld [vmem:[%s7859_s3 + $0x3b0] ss:$8 sps:$4 sm:$0xff]  }
 0x411   :  { %1742 = vmatpush1.bf16.msra.mxu1 %v5897_v23  ;;  %v452_v23 = vadd.f32 %v6739_v63, %v117_v20  ;;  %v5959_v63 = vld [vmem:[%s7859_s3 + $0x3e4] ss:$8 sps:$4 sm:$0xff]   ;;  %v5989_v20 = vld [vmem:[%s7865_s6 + $0x30] sm:$0xff]  }
 0x412   :  { %1743 = vmatprep.subr.bf16.mxu1 %v5902_v25  ;;  %v5954_v25 = vld [vmem:[%s7859_s3 + $0x3d0] ss:$8 sps:$4 sm:$0xff]  }
 0x413   :  { %6181 = vtanh.f32 %v452_v23 }
 0x415   :  { %1744 = vmatpush1.bf16.msra.mxu1 %v5900_v27  ;;  %v5962_v27 = vld [vmem:[%s7859_s3 + $0x3f4] ss:$8 sps:$4 sm:$0xff]  }
 0x416   :  { %1745 = vmatprep.subr.bf16.mxu1 %v5905_v29 }
 0x419   :  { %1746 = vmatpush1.bf16.msra.mxu1 %v5903_v31 }
 0x41a   :  { %1747 = vmatprep.subr.bf16.mxu1 %v5908_v33 }
 0x41d   :  { %1748 = vmatpush1.bf16.msra.mxu1 %v5906_v34  ;;  %v6182_v29 = vpop.eup %6181  ;;  %v5972_v34 = vld [vmem:[%s7861_s4 + $0xa0] sm:$0xff]  }
 0x41e   :  { %1749 = vmatprep.subr.bf16.mxu1 %v5911_v10  ;;  %v472_v30 = vpack.c.bf16 %v6182_v29, %v6182_v29  ;;  %5289 = vmatpush3.bf16.msra.mxu0 %v5972_v34  ;;  %v5993_v29 = vld [vmem:[%s7866_s7 + $0x4] ss:$16 sps:$4 sm:$0xff]  }
 0x421   :  { %1750 = vmatpush1.bf16.msra.mxu1 %v5909_v1 }
 0x422   :  { %1751 = vmatprep.subr.bf16.mxu1 %v5914_v36  ;;  %v5973_v36 = vld [vmem:[%s7861_s4 + $0xe8] sm:$0xff]  }
 0x423   :  { %5290 = vmatprep.subr.bf16.mxu0 %v5973_v36 }
 0x425   :  { %1752 = vmatpush1.bf16.msra.mxu1 %v5912_v37  ;;  %v5974_v37 = vld [vmem:[%s7861_s4 + $0xa8] sm:$0xff]  }
 0x426   :  { %1762 = vmatprep.subr.bf16.mxu1 %v5917_v39  ;;  %5291 = vmatpush3.bf16.msra.mxu0 %v5974_v37  ;;  %v5975_v39 = vld [vmem:[%s7861_s4 + $0xf0] sm:$0xff]  }
 0x427   :  { %5292 = vmatprep.subr.bf16.mxu0 %v5975_v39 }
 0x428   :  { %1754 = vmatmul.mubr.bf16.vlgmr.msra.gmra.mrb[20].mxu1 %v470_v43  ;;  %v4769_v43 = vld [vmem:[%s7862_s13 + $0x2] ss:$8 sm:$0x3] }
 0x429   :  { %1763 = vmatpush1.bf16.msra.mxu1 %v5915_v42  ;;  %1794 = vmatprep.mubr.bf16.mxu1 %v473_v38  ;;  %v5978_v42 = vld [vmem:[%s7861_s4 + $0xb8] sm:$0xff]   ;;  %v1398_v38 = vrot.slane %v4769_v43, %v6601_v51 }
 0x42a   :  { %1764 = vmatprep.subr.bf16.mxu1 %v5920_v44  ;;  %5293 = vmatpush3.bf16.msra.mxu0 %v5976_v40  ;;  %v1394_v44 = vrot.slane %v4769_v43, %v6598_v50 }
 0x42b   :  { %5294 = vmatprep.subr.bf16.mxu0 %v5977_v41  ;;  %v4699_v41 = vld [vmem:[%s7864_s14 + $0x4] ss:$0 sm:$0xff] }
 0x42d   :  { %1765 = vmatpush1.bf16.msra.mxu1 %v5918_v45 }
 0x42e   :  { %1766 = vmatprep.subr.bf16.mxu1 %v5923_v47  ;;  %5295 = vmatpush3.bf16.msra.mxu0 %v5978_v42  ;;  %v53_v42 = vld [vmem:[%s7867_s1] sm:$0xff]  ;;  %s6264_s1 = smov 24  }
 0x42f   :  { %5463 = vmatprep.subr.bf16.mxu0 %v6260_v0 }
 0x431   :  { %1767 = vmatpush1.bf16.msra.mxu1 %v5921_v48 }
 0x432   :  { %1768 = vmatprep.subr.bf16.mxu1 %v5926_v52 }
 0x435   :  { %1769 = vmatpush1.bf16.msra.mxu1 %v5924_v54 }
 0x436   :  { %1770 = vmatprep.subr.bf16.mxu1 %v5929_v55 }
 0x439   :  { %1771 = vmatpush1.bf16.msra.mxu1 %v5927_v56 }
 0x43a   :  { %1772 = vmatprep.subr.bf16.mxu1 %v5932_v57 }
 0x43d   :  { %1773 = vmatpush1.bf16.msra.mxu1 %v5930_v58 }
 0x43e   :  { %1774 = vmatprep.subr.bf16.mxu1 %v5935_v59  ;;  %v5979_v59 = vld [vmem:[%s7863_s5 + $0x40] sm:$0xff]  }
 0x441   :  { %1775 = vmatpush1.bf16.msra.mxu1 %v5933_v60 }
 0x442   :  { %1776 = vmatprep.subr.bf16.mxu1 %v5938_v12  ;;  %v5980_v12 = vld [vmem:[%s7863_s5 + $0x48] sm:$0xff]  }
 0x445   :  { %1777 = vmatpush1.bf16.msra.mxu1 %v5936_v4  ;;  %v5984_v4 = vld [vmem:[%s7863_s5 + $0x68] sm:$0xff]  }
 0x446   :  { %1778 = vmatprep.subr.bf16.mxu1 %v5941_v6  ;;  %v5986_v6 = vld [vmem:[%s7863_s5 + $0x78] sm:$0xff]  }
 0x449   :  { %1779 = vmatpush1.bf16.msra.mxu1 %v5939_v8  ;;  %v4866_v8 = vld [vmem:[%s7864_s14 + $0x1] ss:$0 sm:$0xff] }
 0x44a   :  { %1780 = vmatprep.subr.bf16.mxu1 %v5944_v11 }
 0x44d   :  { %1781 = vmatpush1.bf16.msra.mxu1 %v5942_v14 }
 0x44e   :  { %1782 = vmatprep.subr.bf16.mxu1 %v5947_v16 }
 0x451   :  { %1783 = vmatpush1.bf16.msra.mxu1 %v5945_v18  ;;  %v5987_v18 = vld [vmem:[%s7865_s6 + $0x20] sm:$0xff]  }
 0x452   :  { %1784 = vmatprep.subr.bf16.mxu1 %v5950_v19  ;;  %v5988_v19 = vld [vmem:[%s7865_s6 + $0x28] sm:$0xff]  }
 0x455   :  { %1785 = vmatpush1.bf16.msra.mxu1 %v5948_v21  ;;  %v5990_v21 = vld [vmem:[%s7865_s6 + $0x38] sm:$0xff]  }
 0x456   :  { %1786 = vmatprep.subr.bf16.mxu1 %v5953_v22  ;;  %v4899_v22 = vld [vmem:[%s7864_s14 + $0x3] ss:$0 sm:$0xff] }
 0x459   :  { %1787 = vmatpush1.bf16.msra.mxu1 %v5951_v24 }
 0x45a   :  { %1788 = vmatprep.subr.bf16.mxu1 %v5956_v49 }
 0x45d   :  { %1789 = vmatpush1.bf16.msra.mxu1 %v5954_v25 }
 0x45e   :  { %1790 = vmatprep.subr.bf16.mxu1 %v5959_v63 }
 0x461   :  { %1791 = vmatpush1.bf16.msra.mxu1 %v5957_v26 }
 0x462   :  { %1792 = vmatprep.subr.bf16.mxu1 %v5962_v27 }
 0x465   :  { %1793 = vmatpush1.bf16.msra.mxu1 %v5960_v28  ;;  %v5991_v28 = vld [vmem:[%s7866_s7] ss:$16 sps:$4 sm:$0xff]  }
 0x466   :  { %2274 = vmatprep.subr.bf16.mxu1 %v5996_v32  ;;  %v6009_v32 = vld [vmem:[%s7865_s6 + $0x40] sm:$0xff]  }
 0x468   :  { %1795 = vmatmul.mubr.bf16.vlgmr.msra.gmra.mrb[20].mxu1 %v472_v30  ;;  %v5994_v30 = vld [vmem:[%s7866_s7 + $0x8] ss:$16 sps:$4 sm:$0xff]  }
 0x469   :  { %2306 = vmatprep.mubr.bf16.mxu1 %v6259_v3  ;;  %2275 = vmatpush1.bf16.msra.mxu1 %v5994_v30 }
 0x46a   :  { %5507 = vmatprep.subr.bf16.mxu1 %v6260_v0 }
 0x4bb   :  { %v7036_v31 = vpop.f32.mrb[16].mxu1 }
 0x4bc   :  { %v5461_v33 = vpop.f32.mrb[17].mxu1 }
 0x4bd   :  { %v1320_v10 = vpop.f32.mrb[18].mxu1  ;;  %v4916_v33 = vld [vmem:[%s7864_s14 + $0x5] ss:$0 sm:$0xff] }
 0x4be   :  { %v5462_v1 = vpop.f32.mrb[19].mxu1 }
 0x53b   :  { %v1796_v45 = vpop.f32.mrb[20].mxu1 }
 0x53c   :  { %v5721_v47 = vadd.f32 %v1796_v45, %v1394_v44  ;;  %v1798_v48 = vpop.f32.mrb[21].mxu1  ;;  %v7154_v44 = vadd.f32 %v4699_v41, %v7036_v31  ;;  %v5997_v31 = vld [vmem:[%s7868_s8] sm:$0xff]  }
 0x53d   :  { %v5722_v52 = vadd.f32 %v1798_v48, %v1398_v38  ;;  %v1800_v54 = vpop.f32.mrb[22].mxu1  ;;  %v5998_v48 = vld [vmem:[%s7868_s8 + $0x8] sm:$0xff]  }
 0x53e   :  { %6183 = vtanh.f32 %v5721_v47  ;;  %v1801_v55 = vpop.f32.mrb[23].mxu1  ;;  %v6000_v54 = vld [vmem:[%s7868_s8 + $0x18] sm:$0xff]  }
 0x53f   :  { %6185 = vtanh.f32 %v5722_v52  ;;  %v5999_v52 = vld [vmem:[%s7868_s8 + $0x10] sm:$0xff]  }
 0x540   :  { %v7186_v55 = vld [vmem:[%s7862_s13 + $0x3] ss:$8 sm:$0xf] }
 0x548   :  { %v6184_v56 = vpop.eup %6183 }
 0x549   :  { %v6186_v57 = vpop.eup %6185  ;;  %v1805_v60 = vpack.c.bf16 %v6184_v56, %v6184_v56  ;;  %v2192_v56 = vrot.slane %v7186_v55, %v6598_v50 }
 0x54a   :  { %v1806_v58 = vpack.c.bf16 %v6186_v57, %v6186_v57  ;;  %v2200_v57 = vrot.slane %v7186_v55, %v100_v35 }
 0x54c   :  { %1973 = vmatprep.mubr.bf16.mxu0 %v1806_v58  ;;  %v2196_v58 = vrot.slane %v7186_v55, %v6601_v51 }
 0x54d   :  { %1974 = vmatmul.mubr.bf16.vlgmr.msra.gmra.mrb[12].mxu0 %v1805_v60 }
 0x54e   :  { %5464 = vmatpush3.bf16.msra.mxu0 %v5979_v59  ;;  %5479 = vmatprep.mubr.msk.bf16.mxu0 %vm6261_vm1, %v6260_v0 }
 0x54f   :  { %5465 = vmatprep.subr.bf16.mxu0 %v6260_v0 }
 0x552   :  { %5466 = vmatpush3.bf16.msra.mxu0 %v5980_v12 }
 0x553   :  { %5467 = vmatprep.subr.bf16.mxu0 %v6260_v0 }
 0x556   :  { %5468 = vmatpush3.bf16.msra.mxu0 %v5981_v61 }
 0x557   :  { %5469 = vmatprep.subr.bf16.mxu0 %v6260_v0 }
 0x55a   :  { %5470 = vmatpush3.bf16.msra.mxu0 %v5982_v62 }
 0x55b   :  { %5471 = vmatprep.subr.bf16.mxu0 %v6260_v0 }
 0x55e   :  { %5472 = vmatpush3.bf16.msra.mxu0 %v5983_v2 }
 0x55f   :  { %5473 = vmatprep.subr.bf16.mxu0 %v6260_v0 }
 0x562   :  { %5474 = vmatpush3.bf16.msra.mxu0 %v5984_v4 }
 0x563   :  { %5475 = vmatprep.subr.bf16.mxu0 %v6260_v0 }
 0x566   :  { %5476 = vmatpush3.bf16.msra.mxu0 %v5985_v5 }
 0x567   :  { %5477 = vmatprep.subr.bf16.mxu0 %v6260_v0 }
 0x56a   :  { %5478 = vmatpush3.bf16.msra.mxu0 %v5986_v6 }
 0x56b   :  { %5483 = vmatprep.subr.bf16.mxu0 %v6260_v0 }
 0x620   :  { %v5296_v7 = vpop.f32.mrb[12].mxu0 }
 0x621   :  { %v5297_v9 = vpop.f32.mrb[13].mxu0 }
 0x622   :  { %v5298_v11 = vadd.f32 %v5297_v9, %v5296_v7  ;;  %v5299_v13 = vpop.f32.mrb[14].mxu0 }
 0x623   :  { %v5300_v14 = vpop.f32.mrb[15].mxu0 }
 0x624   :  { %v1976_v15 = vadd.f32 %v5298_v11, %v4866_v8 }
 0x626   :  { %6187 = vtanh.f32 %v1976_v15 }
 0x630   :  { %v6188_v16 = vpop.eup %6187 }
 0x631   :  { %v1982_v17 = vpack.c.bf16 %v6188_v16, %v6188_v16  ;;  %v6001_v16 = vld [vmem:[%s7868_s8 + $0xc0] sm:$0xff]  }
 0x633   :  { %5480 = vmatmul.mubr.bf16.vlgmr.msra.gmra.mrb[16].mxu0 %v1982_v17  ;;  %v6002_v17 = vld [vmem:[%s7868_s8 + $0xc8] sm:$0xff]  }
 0x634   :  { %5491 = vmatprep.mubr.msk.bf16.mxu0 %vm6261_vm1, %v6260_v0  ;;  %5484 = vmatpush3.bf16.msra.mxu0 %v5987_v18  ;;  %v6003_v18 = vld [vmem:[%s7868_s8 + $0xd0] sm:$0xff]  }
 0x635   :  { %5485 = vmatprep.subr.bf16.mxu0 %v6260_v0 }
 0x638   :  { %5486 = vmatpush3.bf16.msra.mxu0 %v5988_v19  ;;  %v6004_v19 = vld [vmem:[%s7868_s8 + $0xd8] sm:$0xff]  }
 0x639   :  { %5487 = vmatprep.subr.bf16.mxu0 %v6260_v0 }
 0x63c   :  { %5488 = vmatpush3.bf16.msra.mxu0 %v5989_v20  ;;  %v4929_v20 = vld [vmem:[%s7864_s14 + $0xc] ss:$0 sm:$0xff] }
 0x63d   :  { %5489 = vmatprep.subr.bf16.mxu0 %v6260_v0 }
 0x640   :  { %5490 = vmatpush3.bf16.msra.mxu0 %v5990_v21 }
 0x641   :  { %2233 = vmatprep.subr.bf16.mxu0 %v5993_v29  ;;  %v6008_v29 = vld [vmem:[%s7868_s8 + $0x38] sm:$0xff]  }
 0x706   :  { %v2087_v23 = vpop.f32.mrb[16].mxu0 }
 0x707   :  { %v2088_v24 = vadd.f32 %v4899_v22, %v2087_v23  ;;  %v5481_v49 = vpop.f32.mrb[17].mxu0 }
 0x708   :  { %v2090_v25 = vpop.f32.mrb[18].mxu0 }
 0x709   :  { %6189 = vtanh.f32 %v2088_v24  ;;  %v5482_v63 = vpop.f32.mrb[19].mxu0 }
 0x70a   :  { %v6005_v63 = vld [vmem:[%s7868_s8 + $0x20] sm:$0xff]  }
 0x713   :  { %v6190_v26 = vpop.eup %6189 }
 0x714   :  { %v2094_v27 = vpack.c.bf16 %v6190_v26, %v6190_v26 }
 0x716   :  { %5492 = vmatmul.mubr.msk.bf16.vlgmr.msra.gmra.mrb[20].mxu0 %vm290_vm0, %v2094_v27  ;;  %v6006_v27 = vld [vmem:[%s7868_s8 + $0x28] sm:$0xff]  }
 0x717   :  { %2265 = vmatprep.mubr.bf16.mxu0 %v6259_v3  ;;  %2234 = vmatpush1.bf16.msra.mxu0 %v5991_v28  ;;  %v6007_v28 = vld [vmem:[%s7868_s8 + $0x30] sm:$0xff]  }
 0x718   :  { %5495 = vmatprep.subr.bf16.mxu0 %v6260_v0 }
 0x7e9   :  { %v2170_v34 = vpop.f32.mrb[20].mxu0 }
 0x7ea   :  { %v7144_v10 = vadd.f32 %v4916_v33, %v2170_v34  ;;  %v5493_v1 = vpop.f32.mrb[21].mxu0  ;;  %v6010_v33 = vld [vmem:[%s7865_s6 + $0x48] sm:$0xff]   ;;  %v6011_v34 = vld [vmem:[%s7865_s6 + $0x50] sm:$0xff]  }
 0x7eb   :  { %v2173_v36 = vpop.f32.mrb[22].mxu0  ;;  %v6012_v1 = vld [vmem:[%s7865_s6 + $0x58] sm:$0xff]  }
 0x7ec   :  { %v2176_v37 = vmul.f32 0.5, %v7144_v10  ;;  %v5494_v39 = vpop.f32.mrb[23].mxu0  ;;  %v4943_v36 = vld [vmem:[%s7864_s14 + $0x12] ss:$0 sm:$0xff] }
 0x7ee   :  { %v2177_v40 = vmul.f32 1.442695, %v2176_v37 }
 0x7f0   :  { %6191 = vpow2.f32 %v2177_v40 }
 0x7fa   :  { %v6192_v43 = vpop.eup %6191 }
 0x7fb   :  { %v2179_v38 = vmul.f32 %v6192_v43, %v53_v42 }
 0x7fd   :  { %v7157_v45 = vadd.f32 %v2179_v38, %v7154_v44  ;;  %v6013_v38 = vld [vmem:[%s7868_s8 + $0xe0] sm:$0xff]  }
 0x7ff   :  { %v2181_v47 = vpack.c.bf16 %v7157_v45, %v7157_v45 }
 0x801   :  { %4927 = vmatmul.mubr.msk.bf16.vlgmr.msra.gmra.mrb[24].mxu0 %vm2229_vm2, %v2181_v47  ;;  %4928 = vmatmul.mubr.msk.bf16.vlgmr.msra.gmra.mrb[24].mxu1 %vm2229_vm2, %v2181_v47 }
 0x802   :  { %5503 = vmatprep.mubr.msk.bf16.mxu0 %vm6261_vm1, %v6260_v0  ;;  %5515 = vmatprep.mubr.msk.bf16.mxu1 %vm6261_vm1, %v6260_v0 }
 0x803   :  { %5496 = vmatpush3.bf16.msra.mxu0 %v5997_v31  ;;  %5508 = vmatpush3.bf16.msra.mxu1 %v6001_v16  ;;  %v4971_v31 = vld [vmem:[%s7864_s14 + $0xd] ss:$0 sm:$0xff] }
 0x804   :  { %5497 = vmatprep.subr.bf16.mxu0 %v6260_v0  ;;  %5509 = vmatprep.subr.bf16.mxu1 %v6260_v0 }
 0x807   :  { %5498 = vmatpush3.bf16.msra.mxu0 %v5998_v48  ;;  %5510 = vmatpush3.bf16.msra.mxu1 %v6002_v17  ;;  %v4985_v17 = vld [vmem:[%s7864_s14 + $0x13] ss:$0 sm:$0xff] }
 0x808   :  { %5499 = vmatprep.subr.bf16.mxu0 %v6260_v0  ;;  %5511 = vmatprep.subr.bf16.mxu1 %v6260_v0 }
 0x80b   :  { %5500 = vmatpush3.bf16.msra.mxu0 %v5999_v52  ;;  %5512 = vmatpush3.bf16.msra.mxu1 %v6003_v18 }
 0x80c   :  { %5501 = vmatprep.subr.bf16.mxu0 %v6260_v0  ;;  %5513 = vmatprep.subr.bf16.mxu1 %v6260_v0 }
 0x80f   :  { %5502 = vmatpush3.bf16.msra.mxu0 %v6000_v54  ;;  %5514 = vmatpush3.bf16.msra.mxu1 %v6004_v19 }
 0x810   :  { %5519 = vmatprep.subr.bf16.mxu0 %v6260_v0  ;;  %5531 = vmatprep.subr.bf16.mxu1 %v6260_v0 }
 0x8d4   :  { %v2267_v59 = vpop.f32.mrb[24].mxu0  ;;  %v2308_v60 = vpop.f32.mrb[24].mxu1 }
 0x8d5   :  { %v2268_v12 = vadd.f32 %v2267_v59, %v2192_v56  ;;  %v2309_v61 = vadd.f32 %v2308_v60, %v2200_v57  ;;  %v2269_v62 = vpop.f32.mrb[25].mxu0  ;;  %v7195_v2 = vpop.f32.mrb[25].mxu1  ;;  %v6014_v56 = vld [vmem:[%s7868_s8 + $0xe8] sm:$0xff]   ;;  %v6015_v59 = vld [vmem:[%s7868_s8 + $0xf0] sm:$0xff]   ;;  %v6016_v60 = vld [vmem:[%s7868_s8 + $0xf8] sm:$0xff]  }
 0x8d6   :  { %v2270_v4 = vadd.f32 %v2269_v62, %v2196_v58  ;;  %v2271_v5 = vpop.f32.mrb[26].mxu0  ;;  %v2312_v6 = vpop.f32.mrb[26].mxu1 }
 0x8d7   :  { %6193 = vtanh.f32 %v2268_v12  ;;  %v2272_v7 = vpop.f32.mrb[27].mxu0  ;;  %v2313_v8 = vpop.f32.mrb[27].mxu1  ;;  %v6019_v5 = vld [vmem:[%s7868_s8 + $0x50] sm:$0xff]   ;;  %v6020_v6 = vld [vmem:[%s7868_s8 + $0x58] sm:$0xff]  }
 0x8d8   :  { %6195 = vtanh.f32 %v2309_v61  ;;  %v6017_v61 = vld [vmem:[%s7868_s8 + $0x40] sm:$0xff]   ;;  %v6022_v8 = vld [vmem:[%s7865_s6 + $0x68] sm:$0xff]  }
 0x8d9   :  { %6197 = vtanh.f32 %v2270_v4  ;;  %v6018_v4 = vld [vmem:[%s7868_s8 + $0x48] sm:$0xff]   ;;  %v6021_v7 = vld [vmem:[%s7865_s6 + $0x60] sm:$0xff]  }
 0x8e1   :  { %v6194_v9 = vpop.eup %6193 }
 0x8e2   :  { %v6196_v35 = vpop.eup %6195  ;;  %v2319_v11 = vpack.c.bf16 %v6194_v9, %v6194_v9  ;;  %v6023_v9 = vld [vmem:[%s7865_s6 + $0x70] sm:$0xff]  }
 0x8e3   :  { %v6198_v13 = vpop.eup %6197  ;;  %v7197_v14 = vpack.c.bf16 %v6196_v35, %v6196_v35  ;;  %v6024_v35 = vld [vmem:[%s7865_s6 + $0x78] sm:$0xff]  }
 0x8e4   :  { %2584 = vrot.lane.b32.xlu0 %v2319_v11, %s6262_s30  ;;  %5504 = vmatmul.mubr.msk.bf16.vlgmr.msra.gmra.mrb[28].mxu0 %vm290_vm0, %v2319_v11  ;;  %v7205_v15 = vpack.c.bf16 %v6198_v13, %v6198_v13 }
 0x8e5   :  { %3578 = vrot.lane.b32.xlu1 %v7197_v14, %s6262_s30  ;;  %5527 = vmatprep.mubr.msk.bf16.mxu0 %vm6261_vm1, %v6260_v0 }
 0x8e6   :  { %5520 = vmatpush3.bf16.msra.mxu0 %v6009_v32  ;;  %v6027_v32 = vld [vmem:[%s7868_s8 + $0x110] sm:$0xff]  }
 0x8e7   :  { %5521 = vmatprep.subr.bf16.mxu0 %v6260_v0 }
 0x8e8   :  { %3081 = vrot.lane.b32.xlu0 %v7205_v15, %s6262_s30 }
 0x8ea   :  { %5522 = vmatpush3.bf16.msra.mxu0 %v6010_v33  ;;  %v6028_v33 = vld [vmem:[%s7868_s8 + $0x118] sm:$0xff]  }
 0x8eb   :  { %5523 = vmatprep.subr.bf16.mxu0 %v6260_v0 }
 0x8ee   :  { %5524 = vmatpush3.bf16.msra.mxu0 %v6011_v34 }
 0x8ef   :  { %5525 = vmatprep.subr.bf16.mxu0 %v6260_v0 }
 0x8f2   :  { %5526 = vmatpush3.bf16.msra.mxu0 %v6012_v1  ;;  %v6029_v1 = vld [vmem:[%s7868_s8 + $0x60] sm:$0xff]  }
 0x8f3   :  { %5543 = vmatprep.subr.bf16.mxu0 %v6260_v0 }
 0x956   :  { %v2585_v30 = vpop.permute.xlu0 %2584 }
 0x9b7   :  { %v2397_v21 = vpop.f32.mrb[28].mxu0 }
 0x9b8   :  { %v2398_v22 = vadd.f32 %v4929_v20, %v2397_v21  ;;  %v5505_v23 = vpop.f32.mrb[29].mxu0 }
 0x9b9   :  { %v2400_v24 = vpop.f32.mrb[30].mxu0 }
 0x9ba   :  { %6199 = vtanh.f32 %v2398_v22  ;;  %v5506_v49 = vpop.f32.mrb[31].mxu0  ;;  %v6025_v24 = vld [vmem:[%s7868_s8 + $0x100] sm:$0xff]  }
 0x9c4   :  { %v6200_v25 = vpop.eup %6199 }
 0x9c5   :  { %v2404_v26 = vpack.c.bf16 %v6200_v25, %v6200_v25  ;;  %v5013_v25 = vld [vmem:[%s7864_s14 + $0xe] ss:$0 sm:$0xff] }
 0x9c7   :  { %5516 = vmatmul.mubr.msk.bf16.vlgmr.msra.gmra.mrb[28].mxu1 %vm290_vm0, %v2404_v26 }
 0x9c8   :  { %5532 = vmatpush3.bf16.msra.mxu1 %v6005_v63  ;;  %5539 = vmatprep.mubr.msk.bf16.mxu1 %vm6261_vm1, %v6260_v0 }
 0x9c9   :  { %5533 = vmatprep.subr.bf16.mxu1 %v6260_v0 }
 0x9cc   :  { %5534 = vmatpush3.bf16.msra.mxu1 %v6006_v27 }
 0x9cd   :  { %5535 = vmatprep.subr.bf16.mxu1 %v6260_v0 }
 0x9d0   :  { %5536 = vmatpush3.bf16.msra.mxu1 %v6007_v28  ;;  %v6026_v28 = vld [vmem:[%s7868_s8 + $0x108] sm:$0xff]  }
 0x9d1   :  { %5537 = vmatprep.subr.bf16.mxu1 %v6260_v0 }
 0x9d4   :  { %5538 = vmatpush3.bf16.msra.mxu1 %v6008_v29 }
 0x9d5   :  { %5555 = vmatprep.subr.bf16.mxu1 %v6260_v0 }
 0x9d7   :  { %5540 = vmatmul.mubr.msk.bf16.vlgmr.msra.gmra.mrb[32].mxu1 %vm290_vm0, %v2585_v30 }
 0x9d8   :  { %5563 = vmatprep.mubr.msk.bf16.mxu1 %vm6261_vm1, %v6260_v0  ;;  %5556 = vmatpush3.bf16.msra.mxu1 %v6021_v7 }
 0x9d9   :  { %5557 = vmatprep.subr.bf16.mxu1 %v6260_v0 }
 0x9dc   :  { %5558 = vmatpush3.bf16.msra.mxu1 %v6022_v8 }
 0x9dd   :  { %5559 = vmatprep.subr.bf16.mxu1 %v6260_v0 }
 0x9e0   :  { %5560 = vmatpush3.bf16.msra.mxu1 %v6023_v9  ;;  %v6038_v9 = vld [vmem:[%s7868_s8 + $0x128] sm:$0xff]  }
 0x9e1   :  { %5561 = vmatprep.subr.bf16.mxu1 %v6260_v0 }
 0x9e4   :  { %5562 = vmatpush3.bf16.msra.mxu1 %v6024_v35 }
 0x9e5   :  { %5579 = vmatprep.subr.bf16.mxu1 %v6260_v0 }
 0xa9a   :  { %v2480_v37 = vpop.f32.mrb[28].mxu1 }
 0xa9b   :  { %v2481_v39 = vadd.f32 %v4943_v36, %v2480_v37  ;;  %v5517_v40 = vpop.f32.mrb[29].mxu1  ;;  %v6030_v37 = vld [vmem:[%s7868_s8 + $0x68] sm:$0xff]  }
 0xa9c   :  { %v2483_v41 = vpop.f32.mrb[30].mxu1  ;;  %v6032_v40 = vld [vmem:[%s7868_s8 + $0x78] sm:$0xff]  }
 0xa9d   :  { %6201 = vtanh.f32 %v2481_v39  ;;  %v5518_v42 = vpop.f32.mrb[31].mxu1  ;;  %v6031_v39 = vld [vmem:[%s7868_s8 + $0x70] sm:$0xff]   ;;  %v3082_v41 = vpop.permute.xlu0 %3081 }
 0xa9e   :  { %v6033_v42 = vld [vmem:[%s7865_s6 + $0x80] sm:$0xff]  }
 0xaa7   :  { %v6202_v43 = vpop.eup %6201 }
 0xaa8   :  { %v2487_v47 = vpack.c.bf16 %v6202_v43, %v6202_v43  ;;  %v6034_v43 = vld [vmem:[%s7865_s6 + $0x88] sm:$0xff]  }
 0xaaa   :  { %v2647_v48 = vpop.f32.mrb[32].mxu1  ;;  %5528 = vmatmul.mubr.msk.bf16.vlgmr.msra.gmra.mrb[32].mxu0 %vm290_vm0, %v2487_v47  ;;  %v6036_v47 = vld [vmem:[%s7865_s6 + $0x98] sm:$0xff]  }
 0xaab   :  { %v2648_v52 = vadd.f32 %v4971_v31, %v2647_v48  ;;  %v5541_v54 = vpop.f32.mrb[33].mxu1  ;;  %5544 = vmatpush3.bf16.msra.mxu0 %v6013_v38  ;;  %5551 = vmatprep.mubr.msk.bf16.mxu0 %vm6261_vm1, %v6260_v0  ;;  %v6035_v38 = vld [vmem:[%s7865_s6 + $0x90] sm:$0xff]  }
 0xaac   :  { %v2650_v57 = vpop.f32.mrb[34].mxu1  ;;  %5545 = vmatprep.subr.bf16.mxu0 %v6260_v0 }
 0xaad   :  { %6203 = vtanh.f32 %v2648_v52  ;;  %v5542_v58 = vpop.f32.mrb[35].mxu1 }
 0xaaf   :  { %5546 = vmatpush3.bf16.msra.mxu0 %v6014_v56  ;;  %v5027_v56 = vld [vmem:[%s7864_s14 + $0x14] ss:$0 sm:$0xff] }
 0xab0   :  { %5547 = vmatprep.subr.bf16.mxu0 %v6260_v0 }
 0xab3   :  { %5548 = vmatpush3.bf16.msra.mxu0 %v6015_v59 }
 0xab4   :  { %5549 = vmatprep.subr.bf16.mxu0 %v6260_v0 }
 0xab7   :  { %v6204_v12 = vpop.eup %6203  ;;  %5550 = vmatpush3.bf16.msra.mxu0 %v6016_v60 }
 0xab8   :  { %v2654_v62 = vpack.c.bf16 %v6204_v12, %v6204_v12  ;;  %5567 = vmatprep.subr.bf16.mxu0 %v6260_v0 }
 0xaba   :  { %5552 = vmatmul.mubr.msk.bf16.vlgmr.msra.gmra.mrb[36].mxu0 %vm290_vm0, %v2654_v62  ;;  %v6037_v62 = vld [vmem:[%s7868_s8 + $0x120] sm:$0xff]  }
 0xabb   :  { %5568 = vmatpush3.bf16.msra.mxu0 %v6017_v61  ;;  %5575 = vmatprep.mubr.msk.bf16.mxu0 %vm6261_vm1, %v6260_v0 }
 0xabc   :  { %5569 = vmatprep.subr.bf16.mxu0 %v6260_v0 }
 0xabf   :  { %5570 = vmatpush3.bf16.msra.mxu0 %v6018_v4 }
 0xac0   :  { %5571 = vmatprep.subr.bf16.mxu0 %v6260_v0 }
 0xac3   :  { %5572 = vmatpush3.bf16.msra.mxu0 %v6019_v5  ;;  %v5055_v5 = vld [vmem:[%s7864_s14 + $0xf] ss:$0 sm:$0xff] }
 0xac4   :  { %5573 = vmatprep.subr.bf16.mxu0 %v6260_v0 }
 0xac7   :  { %5574 = vmatpush3.bf16.msra.mxu0 %v6020_v6 }
 0xac8   :  { %5591 = vmatprep.subr.bf16.mxu0 %v6260_v0 }
 0xaca   :  { %5576 = vmatmul.mubr.msk.bf16.vlgmr.msra.gmra.mrb[40].mxu0 %vm290_vm0, %v7205_v15 }
 0xacb   :  { %5599 = vmatprep.mubr.msk.bf16.mxu0 %vm6261_vm1, %v6260_v0  ;;  %5592 = vmatpush3.bf16.msra.mxu0 %v6033_v42  ;;  %v5097_v42 = vld [vmem:[%s7864_s14 + $0x10] ss:$0 sm:$0xff] }
 0xacc   :  { %5593 = vmatprep.subr.bf16.mxu0 %v6260_v0 }
 0xacf   :  { %5594 = vmatpush3.bf16.msra.mxu0 %v6034_v43 }
 0xad0   :  { %5595 = vmatprep.subr.bf16.mxu0 %v6260_v0 }
 0xad3   :  { %5596 = vmatpush3.bf16.msra.mxu0 %v6035_v38 }
 0xad4   :  { %5597 = vmatprep.subr.bf16.mxu0 %v6260_v0 }
 0xad7   :  { %5598 = vmatpush3.bf16.msra.mxu0 %v6036_v47 }
 0xad8   :  { %5615 = vmatprep.subr.bf16.mxu0 %v6260_v0 }
 0xb7d   :  { %v7330_v11 = vpop.f32.mrb[32].mxu0 }
 0xb7e   :  { %v5529_v13 = vpop.f32.mrb[33].mxu0 }
 0xb7f   :  { %v2566_v15 = vpop.f32.mrb[34].mxu0 }
 0xb80   :  { %v5530_v16 = vpop.f32.mrb[35].mxu0  ;;  %v6039_v15 = vld [vmem:[%s7868_s8 + $0x130] sm:$0xff]  }
 0xb81   :  { %v6040_v16 = vld [vmem:[%s7868_s8 + $0x138] sm:$0xff]  }
 0xb8d   :  { %v2730_v18 = vpop.f32.mrb[36].mxu0 }
 0xb8e   :  { %v2731_v19 = vadd.f32 %v4985_v17, %v2730_v18  ;;  %v5553_v20 = vpop.f32.mrb[37].mxu0  ;;  %v6041_v18 = vld [vmem:[%s7868_s8 + $0x80] sm:$0xff]  }
 0xb8f   :  { %v2733_v21 = vpop.f32.mrb[38].mxu0  ;;  %v6042_v20 = vld [vmem:[%s7868_s8 + $0x88] sm:$0xff]  }
 0xb90   :  { %6205 = vtanh.f32 %v2731_v19  ;;  %v5554_v22 = vpop.f32.mrb[39].mxu0  ;;  %v6043_v21 = vld [vmem:[%s7868_s8 + $0x90] sm:$0xff]  }
 0xb91   :  { %v6044_v22 = vld [vmem:[%s7868_s8 + $0x98] sm:$0xff]  }
 0xb9a   :  { %v6206_v23 = vpop.eup %6205 }
 0xb9b   :  { %v2737_v49 = vpack.c.bf16 %v6206_v23, %v6206_v23  ;;  %v6045_v23 = vld [vmem:[%s7865_s6 + $0xa0] sm:$0xff]  }
 0xb9d   :  { %5564 = vmatmul.mubr.msk.bf16.vlgmr.msra.gmra.mrb[36].mxu1 %vm290_vm0, %v2737_v49  ;;  %v2894_v63 = vpop.f32.mrb[40].mxu0  ;;  %v6048_v49 = vld [vmem:[%s7865_s6 + $0xb8] sm:$0xff]  }
 0xb9e   :  { %v2895_v26 = vadd.f32 %v5013_v25, %v2894_v63  ;;  %5580 = vmatpush3.bf16.msra.mxu1 %v6025_v24  ;;  %v5577_v27 = vpop.f32.mrb[41].mxu0  ;;  %5587 = vmatprep.mubr.msk.bf16.mxu1 %vm6261_vm1, %v6260_v0  ;;  %v6046_v24 = vld [vmem:[%s7865_s6 + $0xa8] sm:$0xff]  }
 0xb9f   :  { %v2897_v29 = vpop.f32.mrb[42].mxu0  ;;  %5581 = vmatprep.subr.bf16.mxu1 %v6260_v0  ;;  %v5041_v25 = vld [vmem:[%s7864_s14 + $0x8] ss:$0 sm:$0xff] }
 0xba0   :  { %6207 = vtanh.f32 %v2895_v26  ;;  %v5578_v30 = vpop.f32.mrb[43].mxu0 }
 0xba2   :  { %5582 = vmatpush3.bf16.msra.mxu1 %v6026_v28 }
 0xba3   :  { %5583 = vmatprep.subr.bf16.mxu1 %v6260_v0 }
 0xba6   :  { %5584 = vmatpush3.bf16.msra.mxu1 %v6027_v32  ;;  %v5069_v32 = vld [vmem:[%s7864_s14 + $0x15] ss:$0 sm:$0xff] }
 0xba7   :  { %5585 = vmatprep.subr.bf16.mxu1 %v6260_v0 }
 0xbaa   :  { %v6208_v34 = vpop.eup %6207  ;;  %5586 = vmatpush3.bf16.msra.mxu1 %v6028_v33 }
 0xbab   :  { %v2901_v36 = vpack.c.bf16 %v6208_v34, %v6208_v34  ;;  %5603 = vmatprep.subr.bf16.mxu1 %v6260_v0 }
 0xbad   :  { %5588 = vmatmul.mubr.msk.bf16.vlgmr.msra.gmra.mrb[40].mxu1 %vm290_vm0, %v2901_v36 }
 0xbae   :  { %5604 = vmatpush3.bf16.msra.mxu1 %v6029_v1  ;;  %5611 = vmatprep.mubr.msk.bf16.mxu1 %vm6261_vm1, %v6260_v0 }
 0xbaf   :  { %5605 = vmatprep.subr.bf16.mxu1 %v6260_v0 }
 0xbb2   :  { %5606 = vmatpush3.bf16.msra.mxu1 %v6030_v37 }
 0xbb3   :  { %5607 = vmatprep.subr.bf16.mxu1 %v6260_v0 }
 0xbb6   :  { %5608 = vmatpush3.bf16.msra.mxu1 %v6031_v39 }
 0xbb7   :  { %5609 = vmatprep.subr.bf16.mxu1 %v6260_v0 }
 0xbba   :  { %5610 = vmatpush3.bf16.msra.mxu1 %v6032_v40  ;;  %v6049_v40 = vld [vmem:[%s7868_s8 + $0x140] sm:$0xff]  }
 0xbbb   :  { %5627 = vmatprep.subr.bf16.mxu1 %v6260_v0 }
 0xbbd   :  { %5612 = vmatmul.mubr.msk.bf16.vlgmr.msra.gmra.mrb[44].mxu1 %vm290_vm0, %v3082_v41 }
 0xbbe   :  { %5635 = vmatprep.mubr.msk.bf16.mxu1 %vm6261_vm1, %v6260_v0  ;;  %5628 = vmatpush3.bf16.msra.mxu1 %v6045_v23 }
 0xbbf   :  { %5629 = vmatprep.subr.bf16.mxu1 %v6260_v0 }
 0xbc2   :  { %5630 = vmatpush3.bf16.msra.mxu1 %v6046_v24 }
 0xbc3   :  { %5631 = vmatprep.subr.bf16.mxu1 %v6260_v0 }
 0xc70   :  { %v7395_v31 = vpop.f32.mrb[36].mxu1 }
 0xc71   :  { %v5565_v48 = vpop.f32.mrb[37].mxu1 }
 0xc72   :  { %v2816_v52 = vpop.f32.mrb[38].mxu1  ;;  %v6050_v48 = vld [vmem:[%s7868_s8 + $0x148] sm:$0xff]  }
 0xc73   :  { %v5566_v54 = vpop.f32.mrb[39].mxu1 }
 0xc80   :  { %v2977_v57 = vpop.f32.mrb[40].mxu1 }
 0xc81   :  { %v2978_v58 = vadd.f32 %v5027_v56, %v2977_v57  ;;  %v5589_v59 = vpop.f32.mrb[41].mxu1  ;;  %v6051_v56 = vld [vmem:[%s7868_s8 + $0x150] sm:$0xff]   ;;  %v6052_v57 = vld [vmem:[%s7868_s8 + $0x158] sm:$0xff]  }
 0xc82   :  { %v2980_v60 = vpop.f32.mrb[42].mxu1  ;;  %v6053_v59 = vld [vmem:[%s7868_s8 + $0xa0] sm:$0xff]  }
 0xc83   :  { %6209 = vtanh.f32 %v2978_v58  ;;  %v5590_v12 = vpop.f32.mrb[43].mxu1 }
 0xc84   :  { %v6054_v12 = vld [vmem:[%s7868_s8 + $0xa8] sm:$0xff]  }
 0xc8d   :  { %v6210_v61 = vpop.eup %6209 }
 0xc8e   :  { %v2984_v4 = vpack.c.bf16 %v6210_v61, %v6210_v61  ;;  %v6055_v61 = vld [vmem:[%s7868_s8 + $0xb0] sm:$0xff]  }
 0xc90   :  { %v3144_v6 = vpop.f32.mrb[44].mxu1  ;;  %5600 = vmatmul.mubr.msk.bf16.vlgmr.msra.gmra.mrb[44].mxu0 %vm290_vm0, %v2984_v4  ;;  %v3579_v4 = vpop.permute.xlu1 %3578 }
 0xc91   :  { %v3145_v7 = vadd.f32 %v5055_v5, %v3144_v6  ;;  %v5613_v8 = vpop.f32.mrb[45].mxu1  ;;  %5616 = vmatpush3.bf16.msra.mxu0 %v6037_v62  ;;  %5623 = vmatprep.mubr.msk.bf16.mxu0 %vm6261_vm1, %v6260_v0  ;;  %v6056_v62 = vld [vmem:[%s7868_s8 + $0xb8] sm:$0xff]   ;;  %v6057_v5 = vld [vmem:[%s7865_s6 + $0xc0] sm:$0xff]   ;;  %v6058_v6 = vld [vmem:[%s7865_s6 + $0xc8] sm:$0xff]  }
 0xc92   :  { %v3147_v35 = vpop.f32.mrb[46].mxu1  ;;  %5617 = vmatprep.subr.bf16.mxu0 %v6260_v0  ;;  %v6060_v8 = vld [vmem:[%s7865_s6 + $0xd8] sm:$0xff]  }
 0xc93   :  { %6211 = vtanh.f32 %v3145_v7  ;;  %v5614_v13 = vpop.f32.mrb[47].mxu1  ;;  %v6059_v7 = vld [vmem:[%s7865_s6 + $0xd0] sm:$0xff]  }
 0xc95   :  { %5618 = vmatpush3.bf16.msra.mxu0 %v6038_v9  ;;  %v5083_v9 = vld [vmem:[%s7864_s14 + $0x9] ss:$0 sm:$0xff] }
 0xc96   :  { %5619 = vmatprep.subr.bf16.mxu0 %v6260_v0 }
 0xc99   :  { %5620 = vmatpush3.bf16.msra.mxu0 %v6039_v15 }
 0xc9a   :  { %5621 = vmatprep.subr.bf16.mxu0 %v6260_v0 }
 0xc9d   :  { %v6212_v17 = vpop.eup %6211  ;;  %5622 = vmatpush3.bf16.msra.mxu0 %v6040_v16 }
 0xc9e   :  { %v3151_v19 = vpack.c.bf16 %v6212_v17, %v6212_v17  ;;  %5639 = vmatprep.subr.bf16.mxu0 %v6260_v0 }
 0xca0   :  { %5624 = vmatmul.mubr.msk.bf16.vlgmr.msra.gmra.mrb[48].mxu0 %vm290_vm0, %v3151_v19  ;;  %v5111_v19 = vld [vmem:[%s7864_s14 + $0x16] ss:$0 sm:$0xff] }
 0xca1   :  { %5640 = vmatpush3.bf16.msra.mxu0 %v6041_v18  ;;  %5647 = vmatprep.mubr.msk.bf16.mxu0 %vm6261_vm1, %v6260_v0 }
 0xca2   :  { %5641 = vmatprep.subr.bf16.mxu0 %v6260_v0 }
 0xca5   :  { %5642 = vmatpush3.bf16.msra.mxu0 %v6042_v20 }
 0xca6   :  { %5643 = vmatprep.subr.bf16.mxu0 %v6260_v0 }
 0xca9   :  { %5644 = vmatpush3.bf16.msra.mxu0 %v6043_v21 }
 0xcaa   :  { %5645 = vmatprep.subr.bf16.mxu0 %v6260_v0 }
 0xcad   :  { %5646 = vmatpush3.bf16.msra.mxu0 %v6044_v22 }
 0xcae   :  { %5663 = vmatprep.subr.bf16.mxu0 %v6260_v0 }
 0xcb0   :  { %5648 = vmatmul.mubr.msk.bf16.vlgmr.msra.gmra.mrb[52].mxu0 %vm290_vm0, %v7197_v14  ;;  %v6047_v14 = vld [vmem:[%s7865_s6 + $0xb0] sm:$0xff]  }
 0xcb1   :  { %5671 = vmatprep.mubr.msk.bf16.mxu0 %vm6261_vm1, %v6260_v0  ;;  %5632 = vmatpush3.bf16.msra.mxu1 %v6047_v14 }
 0xcb2   :  { %5633 = vmatprep.subr.bf16.mxu1 %v6260_v0  ;;  %5664 = vmatpush3.bf16.msra.mxu0 %v6057_v5 }
 0xcb3   :  { %5665 = vmatprep.subr.bf16.mxu0 %v6260_v0 }
 0xcb5   :  { %5634 = vmatpush3.bf16.msra.mxu1 %v6048_v49  ;;  %v6061_v49 = vld [vmem:[%s7868_s8 + $0x160] sm:$0xff]  }
 0xcb6   :  { %5651 = vmatprep.subr.bf16.mxu1 %v6260_v0  ;;  %5666 = vmatpush3.bf16.msra.mxu0 %v6058_v6 }
 0xcb7   :  { %5667 = vmatprep.subr.bf16.mxu0 %v6260_v0 }
 0xcba   :  { %5668 = vmatpush3.bf16.msra.mxu0 %v6059_v7 }
 0xcbb   :  { %5669 = vmatprep.subr.bf16.mxu0 %v6260_v0 }
 0xcbe   :  { %5670 = vmatpush3.bf16.msra.mxu0 %v6060_v8 }
 0xcbf   :  { %5687 = vmatprep.subr.bf16.mxu0 %v6260_v0 }
 0xd63   :  { %v3060_v63 = vpop.f32.mrb[44].mxu0 }
 0xd64   :  { %v7464_v26 = vadd.f32 %v5041_v25, %v3060_v63  ;;  %v5601_v27 = vpop.f32.mrb[45].mxu0  ;;  %v5139_v63 = vld [vmem:[%s7864_s14 + $0x11] ss:$0 sm:$0xff] }
 0xd65   :  { %v3063_v28 = vpop.f32.mrb[46].mxu0 }
 0xd66   :  { %v5602_v29 = vpop.f32.mrb[47].mxu0  ;;  %v4470_v30 = vsel %vm4469_vm3, %v7464_v26, -inf  ;;  %v2204_v28 = vrot.slane %v7186_v55, %v104_v53  ;;  %v6064_v53 = vld [vmem:[%s7868_s8 + $0x178] sm:$0xff]  }
 0xd67   :  { %4471 = vmax.xlane.f32.xlu1 %v4470_v30 }
 0xd73   :  { %v3227_v33 = vpop.f32.mrb[48].mxu0 }
 0xd74   :  { %v3228_v34 = vadd.f32 %v5069_v32, %v3227_v33  ;;  %v5625_v1 = vpop.f32.mrb[49].mxu0  ;;  %v6062_v32 = vld [vmem:[%s7868_s8 + $0x168] sm:$0xff]  }
 0xd75   :  { %v3230_v36 = vpop.f32.mrb[50].mxu0  ;;  %v2311_v1 = vadd.f32 %v7195_v2, %v2204_v28  ;;  %v6065_v2 = vld [vmem:[%s7869_s9] sm:$0xff]   ;;  %v6086_v28 = vld [vmem:[%s7870_s10 + $0x50] ss:$8 sps:$4 sm:$0xff]  }
 0xd76   :  { %6213 = vtanh.f32 %v3228_v34  ;;  %v5626_v37 = vpop.f32.mrb[51].mxu0 }
 0xd77   :  { %v6066_v37 = vld [vmem:[%s7869_s9 + $0x8] sm:$0xff]   ;;  %s6267_s9 = smov 32  }
 0xd80   :  { %v6214_v39 = vpop.eup %6213 }
 0xd81   :  { %v3234_v41 = vpack.c.bf16 %v6214_v39, %v6214_v39 }
 0xd83   :  { %5636 = vmatmul.mubr.msk.bf16.vlgmr.msra.gmra.mrb[48].mxu1 %vm290_vm0, %v3234_v41  ;;  %v3391_v43 = vpop.f32.mrb[52].mxu0  ;;  %v6067_v41 = vld [vmem:[%s7865_s6 + $0xe0] sm:$0xff]  }
 0xd84   :  { %v3392_v38 = vadd.f32 %v5097_v42, %v3391_v43  ;;  %5652 = vmatpush3.bf16.msra.mxu1 %v6049_v40  ;;  %v5649_v47 = vpop.f32.mrb[53].mxu0  ;;  %5659 = vmatprep.mubr.msk.bf16.mxu1 %vm6261_vm1, %v6260_v0  ;;  %v6068_v42 = vld [vmem:[%s7865_s6 + $0xe8] sm:$0xff]   ;;  %v6069_v43 = vld [vmem:[%s7865_s6 + $0xf0] sm:$0xff]  }
 0xd85   :  { %v3394_v52 = vpop.f32.mrb[54].mxu0  ;;  %5653 = vmatprep.subr.bf16.mxu1 %v6260_v0  ;;  %v6073_v47 = vld [vmem:[%s7870_s10 + $0x4] ss:$8 sps:$4 sm:$0xff]  }
 0xd86   :  { %6215 = vtanh.f32 %v3392_v38  ;;  %v5650_v54 = vpop.f32.mrb[55].mxu0  ;;  %v6070_v38 = vld [vmem:[%s7865_s6 + $0xf8] sm:$0xff]  }
 0xd88   :  { %5654 = vmatpush3.bf16.msra.mxu1 %v6050_v48 }
 0xd89   :  { %5655 = vmatprep.subr.bf16.mxu1 %v6260_v0 }
 0xd8c   :  { %5656 = vmatpush3.bf16.msra.mxu1 %v6051_v56  ;;  %v5125_v56 = vld [vmem:[%s7864_s14 + $0xa] ss:$0 sm:$0xff] }
 0xd8d   :  { %5657 = vmatprep.subr.bf16.mxu1 %v6260_v0 }
 0xd90   :  { %v6216_v58 = vpop.eup %6215  ;;  %5658 = vmatpush3.bf16.msra.mxu1 %v6052_v57 }
 0xd91   :  { %v3398_v60 = vpack.c.bf16 %v6216_v58, %v6216_v58  ;;  %5675 = vmatprep.subr.bf16.mxu1 %v6260_v0 }
 0xd93   :  { %5660 = vmatmul.mubr.msk.bf16.vlgmr.msra.gmra.mrb[52].mxu1 %vm290_vm0, %v3398_v60 }
 0xd94   :  { %5676 = vmatpush3.bf16.msra.mxu1 %v6053_v59  ;;  %5683 = vmatprep.mubr.msk.bf16.mxu1 %vm6261_vm1, %v6260_v0 }
 0xd95   :  { %5677 = vmatprep.subr.bf16.mxu1 %v6260_v0 }
 0xd98   :  { %5678 = vmatpush3.bf16.msra.mxu1 %v6054_v12 }
 0xd99   :  { %5679 = vmatprep.subr.bf16.mxu1 %v6260_v0 }
 0xd9c   :  { %5680 = vmatpush3.bf16.msra.mxu1 %v6055_v61 }
 0xd9d   :  { %5681 = vmatprep.subr.bf16.mxu1 %v6260_v0 }
 0xda0   :  { %5682 = vmatpush3.bf16.msra.mxu1 %v6056_v62  ;;  %v5153_v62 = vld [vmem:[%s7864_s14 + $0x17] ss:$0 sm:$0xff] }
 0xda1   :  { %5699 = vmatprep.subr.bf16.mxu1 %v6260_v0 }
 0xda3   :  { %5684 = vmatmul.mubr.msk.bf16.vlgmr.msra.gmra.mrb[56].mxu1 %vm290_vm0, %v3579_v4 }
 0xda4   :  { %5707 = vmatprep.mubr.msk.bf16.mxu1 %vm6261_vm1, %v6260_v0  ;;  %5700 = vmatpush3.bf16.msra.mxu1 %v6067_v41  ;;  %v6109_v41 = vld [vmem:[%s7871_s11 + $0x44] ss:$8 sps:$4 sm:$0xff]  }
 0xda5   :  { %5701 = vmatprep.subr.bf16.mxu1 %v6260_v0 }
 0xda8   :  { %5702 = vmatpush3.bf16.msra.mxu1 %v6068_v42  ;;  %v6107_v42 = vld [vmem:[%s7871_s11 + $0x40] ss:$8 sps:$4 sm:$0xff]  }
 0xda9   :  { %5703 = vmatprep.subr.bf16.mxu1 %v6260_v0 }
 0xdac   :  { %5704 = vmatpush3.bf16.msra.mxu1 %v6069_v43  ;;  %v6110_v43 = vld [vmem:[%s7871_s11 + $0x50] ss:$8 sps:$4 sm:$0xff]  }
 0xdad   :  { %5705 = vmatprep.subr.bf16.mxu1 %v6260_v0 }
 0xdb0   :  { %5706 = vmatpush3.bf16.msra.mxu1 %v6070_v38  ;;  %v6112_v38 = vld [vmem:[%s7871_s11 + $0x54] ss:$8 sps:$4 sm:$0xff]  }
 0xdb1   :  { %3989 = vmatprep.subr.bf16.mxu1 %v6073_v47  ;;  %v6113_v47 = vld [vmem:[%s7871_s11 + $0x60] ss:$8 sps:$4 sm:$0xff]  }
 0xdf4   :  { %v4472_v48 = vpop.xlane.xlu1 %4471 }
 0xdf5   :  { %v4473_v52 = vsub.f32 %v7464_v26, %v4472_v48  ;;  %v6115_v48 = vld [vmem:[%s7871_s11 + $0x64] ss:$8 sps:$4 sm:$0xff]  }
 0xdf7   :  { %v4474_v54 = vmul.f32 1.442695, %v4473_v52  ;;  %v6118_v52 = vld [vmem:[%s7871_s11 + $0x74] ss:$8 sps:$4 sm:$0xff]  }
 0xe56   :  { %v3310_v35 = vpop.f32.mrb[48].mxu1 }
 0xe57   :  { %v7534_v13 = vadd.f32 %v5083_v9, %v3310_v35  ;;  %v5637_v15 = vpop.f32.mrb[49].mxu1 }
 0xe58   :  { %v3313_v16 = vpop.f32.mrb[50].mxu1 }
 0xe59   :  { %v5638_v17 = vpop.f32.mrb[51].mxu1  ;;  %v4481_v18 = vsel %vm4469_vm3, %v7534_v13, -inf }
 0xe5a   :  { %4482 = vmax.xlane.f32.xlu0 %v4481_v18  ;;  %v6071_v18 = vld [vmem:[%s7870_s10] ss:$8 sps:$4 sm:$0xff]  }
 0xe66   :  { %v3474_v20 = vpop.f32.mrb[52].mxu1 }
 0xe67   :  { %v3475_v21 = vadd.f32 %v5111_v19, %v3474_v20  ;;  %v5661_v22 = vpop.f32.mrb[53].mxu1  ;;  %v6076_v20 = vld [vmem:[%s7870_s10 + $0x14] ss:$8 sps:$4 sm:$0xff]  }
 0xe68   :  { %v3477_v23 = vpop.f32.mrb[54].mxu1  ;;  %v6079_v22 = vld [vmem:[%s7870_s10 + $0x24] ss:$8 sps:$4 sm:$0xff]  }
 0xe69   :  { %6217 = vtanh.f32 %v3475_v21  ;;  %v5662_v24 = vpop.f32.mrb[55].mxu1  ;;  %v6074_v21 = vld [vmem:[%s7870_s10 + $0x10] ss:$8 sps:$4 sm:$0xff]   ;;  %v6077_v23 = vld [vmem:[%s7870_s10 + $0x20] ss:$8 sps:$4 sm:$0xff]  }
 0xe6a   :  { %v6082_v24 = vld [vmem:[%s7870_s10 + $0x34] ss:$8 sps:$4 sm:$0xff]  }
 0xe73   :  { %v6218_v14 = vpop.eup %6217 }
 0xe74   :  { %v3481_v25 = vpack.c.bf16 %v6218_v14, %v6218_v14  ;;  %v5173_v14 = vld [vmem:[%s7864_s14 + $0x18] ss:$0 sm:$0xff] }
 0xe76   :  { %v3641_v27 = vpop.f32.mrb[56].mxu1  ;;  %5672 = vmatmul.mubr.msk.bf16.vlgmr.msra.gmra.mrb[56].mxu0 %vm290_vm0, %v3481_v25 }
 0xe77   :  { %v3642_v29 = vadd.f32 %v5139_v63, %v3641_v27  ;;  %v5685_v30 = vpop.f32.mrb[57].mxu1  ;;  %5688 = vmatpush3.bf16.msra.mxu0 %v6061_v49  ;;  %5695 = vmatprep.mubr.msk.bf16.mxu0 %vm6261_vm1, %v6260_v0  ;;  %v6085_v49 = vld [vmem:[%s7870_s10 + $0x44] ss:$8 sps:$4 sm:$0xff]   ;;  %v6083_v63 = vld [vmem:[%s7870_s10 + $0x40] ss:$8 sps:$4 sm:$0xff]  }
 0xe78   :  { %v3644_v33 = vpop.f32.mrb[58].mxu1  ;;  %5689 = vmatprep.subr.bf16.mxu0 %v6260_v0  ;;  %v6088_v27 = vld [vmem:[%s7870_s10 + $0x54] ss:$8 sps:$4 sm:$0xff]   ;;  %v6089_v30 = vld [vmem:[%s7870_s10 + $0x60] ss:$8 sps:$4 sm:$0xff]  }
 0xe79   :  { %6219 = vtanh.f32 %v3642_v29  ;;  %v5686_v34 = vpop.f32.mrb[59].mxu1  ;;  %v6091_v29 = vld [vmem:[%s7870_s10 + $0x64] ss:$8 sps:$4 sm:$0xff]   ;;  %v6092_v33 = vld [vmem:[%s7870_s10 + $0x70] ss:$8 sps:$4 sm:$0xff]  }
 0xe7a   :  { %6221 = vtanh.f32 %v2311_v1  ;;  %v6095_v34 = vld [vmem:[%s7871_s11] ss:$8 sps:$4 sm:$0xff]   ;;  %v6097_v1 = vld [vmem:[%s7871_s11 + $0x4] ss:$8 sps:$4 sm:$0xff]  }
 0xe7b   :  { %5690 = vmatpush3.bf16.msra.mxu0 %v6062_v32  ;;  %6223 = vpow2.f32 %v4474_v54  ;;  %v6094_v32 = vld [vmem:[%s7870_s10 + $0x74] ss:$8 sps:$4 sm:$0xff]   ;;  %v6116_v54 = vld [vmem:[%s7871_s11 + $0x70] ss:$8 sps:$4 sm:$0xff]  }
 0xe7c   :  { %5691 = vmatprep.subr.bf16.mxu0 %v6260_v0 }
 0xe7f   :  { %5692 = vmatpush3.bf16.msra.mxu0 %v6063_v46 }
 0xe80   :  { %5693 = vmatprep.subr.bf16.mxu0 %v6260_v0 }
 0xe83   :  { %v6220_v55 = vpop.eup %6219  ;;  %5694 = vmatpush3.bf16.msra.mxu0 %v6064_v53  ;;  %v6100_v53 = vld [vmem:[%s7871_s11 + $0x14] ss:$8 sps:$4 sm:$0xff]  }
 0xe84   :  { %v3648_v36 = vpack.c.bf16 %v6220_v55, %v6220_v55  ;;  %5711 = vmatprep.subr.bf16.mxu0 %v6260_v0  ;;  %v6222_v39 = vpop.eup %6221  ;;  %v6098_v55 = vld [vmem:[%s7871_s11 + $0x10] ss:$8 sps:$4 sm:$0xff]  }
 0xe85   :  { %v2322_v40 = vpack.c.bf16 %v6222_v39, %v6222_v39  ;;  %v7604_v61 = vpop.eup %6223  ;;  %v6106_v39 = vld [vmem:[%s7871_s11 + $0x34] ss:$8 sps:$4 sm:$0xff]  }
 0xe86   :  { %5696 = vmatmul.mubr.msk.bf16.vlgmr.msra.gmra.mrb[60].mxu0 %vm290_vm0, %v3648_v36  ;;  %v4476_v26 = vsel %vm4469_vm3, %v7604_v61, 0.0  ;;  %v6103_v36 = vld [vmem:[%s7871_s11 + $0x24] ss:$8 sps:$4 sm:$0xff]  }
 0xe87   :  { %5712 = vmatpush3.bf16.msra.mxu0 %v6065_v2  ;;  %5715 = vmatprep.mubr.msk.bf16.mxu0 %vm6261_vm1, %v6260_v0 }
 0xe88   :  { %5713 = vmatprep.subr.bf16.mxu0 %v6260_v0 }
 0xe8b   :  { %5714 = vmatpush3.bf16.msra.mxu0 %v6066_v37  ;;  %v6101_v37 = vld [vmem:[%s7871_s11 + $0x20] ss:$8 sps:$4 sm:$0xff]  }
 0xe8c   :  { %4239 = vmatprep.subr.bf16.mxu0 %v6097_v1 }
 0xe8e   :  { %5716 = vmatmul.mubr.msk.bf16.vlgmr.msra.gmra.mrb[64].mxu0 %vm3834_vm4, %v2322_v40  ;;  %v6104_v40 = vld [vmem:[%s7871_s11 + $0x30] ss:$8 sps:$4 sm:$0xff]  }
 0xe8f   :  { %4240 = vmatpush1.bf16.msra.mxu0 %v6095_v34 }
 0xe90   :  { %4241 = vmatprep.subr.bf16.mxu0 %v6100_v53 }
 0xe93   :  { %4242 = vmatpush1.bf16.msra.mxu0 %v6098_v55 }
 0xe94   :  { %4243 = vmatprep.subr.bf16.mxu0 %v6103_v36 }
 0xe97   :  { %4244 = vmatpush1.bf16.msra.mxu0 %v6101_v37 }
 0xe98   :  { %4245 = vmatprep.subr.bf16.mxu0 %v6106_v39 }
 0xe9b   :  { %4246 = vmatpush1.bf16.msra.mxu0 %v6104_v40  ;;  %v6143_v40 = vld [vmem:[%s7872_s12 + $0x40] sm:$0xff]  }
 0xe9c   :  { %4247 = vmatprep.subr.bf16.mxu0 %v6109_v41  ;;  %v6144_v41 = vld [vmem:[%s7872_s12] sm:$0xff]  }
 0xe9f   :  { %4248 = vmatpush1.bf16.msra.mxu0 %v6107_v42  ;;  %v6145_v42 = vld [vmem:[%s7872_s12 + $0x48] sm:$0xff]  }
 0xea0   :  { %4249 = vmatprep.subr.bf16.mxu0 %v6112_v38  ;;  %v6147_v38 = vld [vmem:[%s7872_s12 + $0x50] sm:$0xff]  }
 0xea3   :  { %4250 = vmatpush1.bf16.msra.mxu0 %v6110_v43  ;;  %v6146_v43 = vld [vmem:[%s7872_s12 + $0x8] sm:$0xff]  }
 0xea4   :  { %4251 = vmatprep.subr.bf16.mxu0 %v6115_v48  ;;  %v6149_v48 = vld [vmem:[%s7872_s12 + $0x58] sm:$0xff]  }
 0xea7   :  { %4252 = vmatpush1.bf16.msra.mxu0 %v6113_v47  ;;  %v6148_v47 = vld [vmem:[%s7872_s12 + $0x10] sm:$0xff]  }
 0xea8   :  { %4253 = vmatprep.subr.bf16.mxu0 %v6118_v52  ;;  %v6150_v52 = vld [vmem:[%s7872_s12 + $0x18] sm:$0xff]  }
 0xeab   :  { %4254 = vmatpush1.bf16.msra.mxu0 %v6116_v54  ;;  %v6151_v54 = vld [vmem:[%s7872_s12 + $0x60] sm:$0xff]  }
 0xf49   :  { %v3557_v0 = vpop.f32.mrb[56].mxu0 }
 0xf4a   :  { %v7600_v57 = vadd.f32 %v5125_v56, %v3557_v0  ;;  %v5673_v58 = vpop.f32.mrb[57].mxu0  ;;  %v6121_v56 = vld [vmem:[%s7871_s11 + $0x84] ss:$8 sps:$4 sm:$0xff]   ;;  %v6119_v0 = vld [vmem:[%s7871_s11 + $0x80] ss:$8 sps:$4 sm:$0xff]  }
 0xf4b   :  { %v3560_v59 = vpop.f32.mrb[58].mxu0  ;;  %4255 = vmatprep.subr.bf16.mxu0 %v6121_v56  ;;  %v6124_v58 = vld [vmem:[%s7871_s11 + $0x94] ss:$8 sps:$4 sm:$0xff]   ;;  %v4999_v56 = vld [vmem:[%s7864_s14 + $0x7] ss:$0 sm:$0xff] }
 0xf4c   :  { %v5674_v60 = vpop.f32.mrb[59].mxu0  ;;  %v4492_v12 = vsel %vm2229_vm2, %v7600_v57, -inf  ;;  %4256 = vmatpush1.bf16.msra.mxu0 %v6119_v0  ;;  %v6122_v59 = vld [vmem:[%s7871_s11 + $0x90] ss:$8 sps:$4 sm:$0xff]   ;;  %v6152_v0 = vld [vmem:[%s7872_s12 + $0x20] sm:$0xff]  }
 0xf4d   :  { %4493 = vmax.xlane.f32.xlu0 %v4492_v12  ;;  %4257 = vmatprep.subr.bf16.mxu0 %v6124_v58  ;;  %v6127_v60 = vld [vmem:[%s7871_s11 + $0xa4] ss:$8 sps:$4 sm:$0xff]   ;;  %v6125_v12 = vld [vmem:[%s7871_s11 + $0xa0] ss:$8 sps:$4 sm:$0xff]   ;;  %v2814_v58 = vadd.f32 %v4999_v56, %v7395_v31 }
 0xf50   :  { %4258 = vmatpush1.bf16.msra.mxu0 %v6122_v59  ;;  %v6153_v59 = vld [vmem:[%s7872_s12 + $0x68] sm:$0xff]  }
 0xf51   :  { %4477 = vadd.xlane.f32.xlu0 %v4476_v26  ;;  %4259 = vmatprep.subr.bf16.mxu0 %v6127_v60  ;;  %v6130_v26 = vld [vmem:[%s7871_s11 + $0xb4] ss:$8 sps:$4 sm:$0xff]   ;;  %v6154_v60 = vld [vmem:[%s7872_s12 + $0x28] sm:$0xff]  }
 0xf54   :  { %4260 = vmatpush1.bf16.msra.mxu0 %v6125_v12  ;;  %v4463_v12 = vsub.f32 0.0, %v2814_v58 }
 0xf55   :  { %4261 = vmatprep.subr.bf16.mxu0 %v6130_v26  ;;  %v6155_v26 = vld [vmem:[%s7872_s12 + $0x70] sm:$0xff]  }
 0xf56   :  { %v4464_v31 = vmul.f32 1.442695, %v4463_v12 }
 0xf59   :  { %v3724_v4 = vpop.f32.mrb[60].mxu0 }
 0xf5a   :  { %v3725_v5 = vadd.f32 %v5153_v62, %v3724_v4  ;;  %v5697_v6 = vpop.f32.mrb[61].mxu0  ;;  %v4483_v62 = vpop.xlane.xlu0 %4482  ;;  %v6128_v4 = vld [vmem:[%s7871_s11 + $0xb0] ss:$8 sps:$4 sm:$0xff]  }
 0xf5b   :  { %v3727_v7 = vpop.f32.mrb[62].mxu0  ;;  %4262 = vmatpush1.bf16.msra.mxu0 %v6128_v4 }
 0xf5c   :  { %6225 = vtanh.f32 %v3725_v5  ;;  %v5698_v8 = vpop.f32.mrb[63].mxu0  ;;  %v6133_v7 = vld [vmem:[%s7871_s11 + $0xc4] ss:$8 sps:$4 sm:$0xff]  }
 0xf5d   :  { %4263 = vmatprep.subr.bf16.mxu0 %v6133_v7  ;;  %v6158_v7 = vld [vmem:[%s7872_s12 + $0x38] sm:$0xff]  }
 0xf61   :  { %v3872_v9 = vpop.f32.mrb[64].mxu0 }
 0xf62   :  { %v5717_v35 = vpop.f32.mrb[65].mxu0  ;;  %v3873_v25 = vadd.f32 %v5173_v14, %v3872_v9  ;;  %v6131_v9 = vld [vmem:[%s7871_s11 + $0xc0] ss:$8 sps:$4 sm:$0xff]  }
 0xf63   :  { %v3875_v15 = vpop.f32.mrb[66].mxu0  ;;  %4264 = vmatpush1.bf16.msra.mxu0 %v6131_v9  ;;  %v6136_v35 = vld [vmem:[%s7871_s11 + $0xd4] ss:$8 sps:$4 sm:$0xff]  }
 0xf64   :  { %v5718_v16 = vpop.f32.mrb[67].mxu0  ;;  %6227 = vtanh.f32 %v3873_v25  ;;  %4265 = vmatprep.subr.bf16.mxu0 %v6136_v35  ;;  %v6139_v15 = vld [vmem:[%s7871_s11 + $0xe4] ss:$8 sps:$4 sm:$0xff]  }
 0xf65   :  { %v6137_v16 = vld [vmem:[%s7871_s11 + $0xe0] ss:$8 sps:$4 sm:$0xff]  }
 0xf66   :  { %v6226_v17 = vpop.eup %6225 }
 0xf67   :  { %v3731_v19 = vpack.c.bf16 %v6226_v17, %v6226_v17  ;;  %v6142_v17 = vld [vmem:[%s7871_s11 + $0xf4] ss:$8 sps:$4 sm:$0xff]  }
 0xf69   :  { %5708 = vmatmul.mubr.msk.bf16.vlgmr.msra.gmra.mrb[60].mxu1 %vm290_vm0, %v3731_v19  ;;  %v6140_v19 = vld [vmem:[%s7871_s11 + $0xf0] ss:$8 sps:$4 sm:$0xff]  }
 0xf6a   :  { %3990 = vmatpush1.bf16.msra.mxu1 %v6071_v18  ;;  %4021 = vmatprep.mubr.bf16.mxu1 %v6259_v3  ;;  %v6080_v3 = vld [vmem:[%s7870_s10 + $0x30] ss:$8 sps:$4 sm:$0xff]  }
 0xf6b   :  { %3991 = vmatprep.subr.bf16.mxu1 %v6076_v20 }
 0xf6e   :  { %3992 = vmatpush1.bf16.msra.mxu1 %v6074_v21  ;;  %v6228_v46 = vpop.eup %6227  ;;  %v4957_v21 = vld [vmem:[%s7864_s14 + $0x6] ss:$0 sm:$0xff] }
 0xf6f   :  { %3993 = vmatprep.subr.bf16.mxu1 %v6079_v22  ;;  %v3879_v2 = vpack.c.bf16 %v6228_v46, %v6228_v46  ;;  %v2564_v22 = vadd.f32 %v4957_v21, %v7330_v11 }
 0xf72   :  { %3994 = vmatpush1.bf16.msra.mxu1 %v6077_v23  ;;  %v4484_v23 = vsub.f32 %v7534_v13, %v4483_v62  ;;  %v6156_v62 = vld [vmem:[%s7872_s12 + $0x30] sm:$0xff]  }
 0xf73   :  { %3995 = vmatprep.subr.bf16.mxu1 %v6082_v24 }
 0xf74   :  { %v4485_v24 = vmul.f32 1.442695, %v4484_v23 }
 0xf76   :  { %3996 = vmatpush1.bf16.msra.mxu1 %v6080_v3  ;;  %v5167_v3 = vld [vmem:[%s7864_s14 + $0xb] ss:$0 sm:$0xff] }
 0xf77   :  { %3997 = vmatprep.subr.bf16.mxu1 %v6085_v49 }
 0xf7a   :  { %3998 = vmatpush1.bf16.msra.mxu1 %v6083_v63 }
 0xf7b   :  { %3999 = vmatprep.subr.bf16.mxu1 %v6088_v27 }
 0xf7e   :  { %4000 = vmatpush1.bf16.msra.mxu1 %v6086_v28 }
 0xf7f   :  { %4001 = vmatprep.subr.bf16.mxu1 %v6091_v29  ;;  %v5177_v29 = vld [vmem:[%s7862_s13 + $0x4] ss:$8 sm:$0x3] }
 0xf82   :  { %4002 = vmatpush1.bf16.msra.mxu1 %v6089_v30  ;;  %v3902_v30 = vrot.slane %v5177_v29, %v6598_v50 }
 0xf83   :  { %4003 = vmatprep.subr.bf16.mxu1 %v6094_v32  ;;  %v3906_v32 = vrot.slane %v5177_v29, %v6601_v51 }
 0xf86   :  { %4004 = vmatpush1.bf16.msra.mxu1 %v6092_v33 }
 0xf87   :  { %5409 = vmatprep.subr.bf16.mxu1 %v6143_v40 }
 0xf89   :  { %4022 = vmatmul.mubr.bf16.vlgmr.msra.gmra.mrb[64].mxu1 %v3879_v2 }
 0xf8a   :  { %5410 = vmatpush3.bf16.msra.mxu1 %v6144_v41 }
 0xf8b   :  { %5411 = vmatprep.subr.bf16.mxu1 %v6145_v42 }
 0xf8e   :  { %5412 = vmatpush3.bf16.msra.mxu1 %v6146_v43 }
 0xf8f   :  { %5413 = vmatprep.subr.bf16.mxu1 %v6147_v38 }
 0xf92   :  { %5414 = vmatpush3.bf16.msra.mxu1 %v6148_v47 }
 0xf93   :  { %5415 = vmatprep.subr.bf16.mxu1 %v6149_v48 }
 0xf96   :  { %5416 = vmatpush3.bf16.msra.mxu1 %v6150_v52 }
 0xf97   :  { %5417 = vmatprep.subr.bf16.mxu1 %v6151_v54 }
 0xf9a   :  { %5418 = vmatpush3.bf16.msra.mxu1 %v6152_v0 }
 0xf9b   :  { %5419 = vmatprep.subr.bf16.mxu1 %v6153_v59 }
 0xf9e   :  { %5420 = vmatpush3.bf16.msra.mxu1 %v6154_v60 }
 0xf9f   :  { %5421 = vmatprep.subr.bf16.mxu1 %v6155_v26 }
 0xfa2   :  { %5422 = vmatpush3.bf16.msra.mxu1 %v6156_v62 }
 0xfda   :  { %v4494_v5 = vpop.xlane.xlu0 %4493 }
 0xfdb   :  { %v4495_v6 = vsub.f32 %v7600_v57, %v4494_v5  ;;  %v6134_v57 = vld [vmem:[%s7871_s11 + $0xd0] ss:$8 sps:$4 sm:$0xff]  }
 0xfdc   :  { %4266 = vmatpush1.bf16.msra.mxu0 %v6134_v57  ;;  %v6157_v5 = vld [vmem:[%s7872_s12 + $0x78] sm:$0xff]   ;;  %s6265_s12 = smov 15  }
 0xfdd   :  { %v4496_v8 = vmul.f32 1.442695, %v4495_v6  ;;  %4267 = vmatprep.subr.bf16.mxu0 %v6139_v15  ;;  %5423 = vmatprep.subr.bf16.mxu1 %v6157_v5 }
 0xfde   :  { %5424 = vmatpush3.bf16.msra.mxu1 %v6158_v7 }
 0xfdf   :  { %6229 = vpow2.f32 %v4496_v8 }
 0xfe0   :  { %4268 = vmatpush1.bf16.msra.mxu0 %v6137_v16  ;;  %6231 = vpow2.f32 %v4485_v24 }
 0xfe1   :  { %4269 = vmatprep.subr.bf16.mxu0 %v6142_v17 }
 0xfe4   :  { %4270 = vmatpush1.bf16.msra.mxu0 %v6140_v19 }
 0xfe9   :  { %v7755_v18 = vpop.eup %6229 }
 0xfea   :  { %v4498_v20 = vsel %vm2229_vm2, %v7755_v18, 0.0  ;;  %v7774_v11 = vpop.eup %6231 }
 0xfeb   :  { %4499 = vadd.xlane.f32.xlu0 %v4498_v20  ;;  %v4487_v13 = vsel %vm4469_vm3, %v7774_v11, 0.0  ;;  %v4478_v20 = vpop.xlane.xlu0 %4477 }
0x1001   :  { %4515 = vrot.lane.b32.xlu0 %v2564_v22, %s6263_s16 }
0x103c   :  { %v3807_v14 = vpop.f32.mrb[60].mxu1 }
0x103d   :  { %v7770_v49 = vadd.f32 %v5167_v3, %v3807_v14  ;;  %v5709_v25 = vpop.f32.mrb[61].mxu1 }
0x103e   :  { %v3810_v63 = vpop.f32.mrb[62].mxu1 }
0x103f   :  { %v5710_v27 = vpop.f32.mrb[63].mxu1  ;;  %v4503_v28 = vsel %vm2229_vm2, %v7770_v49, -inf }
0x1040   :  { %4504 = vmax.xlane.f32.xlu1 %v4503_v28 }
0x1044   :  { %4488 = vadd.xlane.f32.xlu1 %v4487_v13 }
0x105c   :  { %v4023_v33 = vpop.f32.mrb[64].mxu1 }
0x105d   :  { %v4024_v34 = vadd.f32 %v4023_v33, %v3902_v30  ;;  %v4025_v1 = vpop.f32.mrb[65].mxu1 }
0x105e   :  { %v4026_v46 = vadd.f32 %v4025_v1, %v3906_v32  ;;  %v4027_v53 = vpop.f32.mrb[66].mxu1 }
0x105f   :  { %6233 = vtanh.f32 %v4024_v34  ;;  %v4028_v55 = vpop.f32.mrb[67].mxu1  ;;  %v5227_v34 = vld [vmem:[%s7864_s14 + $0x19] ss:$0 sm:$0xff] }
0x1060   :  { %6235 = vtanh.f32 %v4026_v46 }
0x1061   :  { %6237 = vpow2.f32 %v4464_v31 }
0x1069   :  { %v6234_v2 = vpop.eup %6233 }
0x106a   :  { %v6236_v36 = vpop.eup %6235  ;;  %v4032_v39 = vpack.c.bf16 %v6234_v2, %v6234_v2 }
0x106b   :  { %v4033_v37 = vpack.c.bf16 %v6236_v36, %v6236_v36  ;;  %v6238_v35 = vpop.eup %6237 }
0x106c   :  { %v4466_v19 = vadd.f32 1.0, %v6238_v35 }
0x106d   :  { %4271 = vmatprep.mubr.bf16.mxu0 %v4033_v37 }
0x106e   :  { %4272 = vmatmul.mubr.bf16.vlgmr.msra.gmra.mrb[68].mxu0 %v4032_v39 }
0x1078   :  { %v4500_v21 = vpop.xlane.xlu0 %4499 }
0x107c   :  { %v4516_v43 = vpop.permute.xlu0 %4515 }
0x10cd   :  { %v4505_v4 = vpop.xlane.xlu1 %4504 }
0x10ce   :  { %v4506_v6 = vsub.f32 %v7770_v49, %v4505_v4  ;;  %v5194_v49 = vld [vmem:[%s7862_s13 + $0x5] ss:$8 sm:$0x3]  ;;  %s6269_s13 = smov 48  }
0x10cf   :  { %v4072_v25 = vrot.slane %v5194_v49, %v6598_v50 }
0x10d0   :  { %v4507_v8 = vmul.f32 1.442695, %v4506_v6 }
0x10d1   :  { %v4489_v9 = vpop.xlane.xlu1 %4488 }
0x10d2   :  { %6239 = vpow2.f32 %v4507_v8 }
0x10d3   :  { %6241 = vrcp.f32 %v4489_v9 }
0x10d4   :  { %6243 = vrcp.f32 %v4466_v19 }
0x10d5   :  { %6245 = vrcp.f32 %v4478_v20 }
0x10d6   :  { %6247 = vrcp.f32 %v4500_v21 }
0x10dc   :  { %v6240_v57 = vpop.eup %6239 }
0x10dd   :  { %v6242_v15 = vpop.eup %6241  ;;  %v4509_v16 = vsel %vm2229_vm2, %v6240_v57, 0.0 }
0x10de   :  { %4510 = vadd.xlane.f32.xlu1 %v4509_v16  ;;  %v4491_v17 = vmul.f32 %v6242_v15, %v7774_v11  ;;  %v6244_v22 = vpop.eup %6243 }
0x10df   :  { %v6246_v23 = vpop.eup %6245 }
0x10e0   :  { %4527 = vrot.lane.b32.xlu0 %v4491_v17, %s6264_s1  ;;  %v4480_v24 = vmul.f32 %v6246_v23, %v7604_v61  ;;  %v6248_v3 = vpop.eup %6247  ;;  %v4076_v61 = vrot.slane %v5194_v49, %v6601_v51 }
0x10e1   :  { %v4502_v14 = vmul.f32 %v6248_v3, %v7755_v18 }
0x10ef   :  { %4519 = vrot.lane.b32.xlu1 %v6244_v22, %s6265_s12 }
0x10f3   :  { %4523 = vrot.lane.b32.xlu1 %v4480_v24, %s6266_s24 }
0x10f7   :  { %4531 = vrot.lane.b32.xlu1 %v4502_v14, %s6267_s9 }
0x10fb   :  { %4539 = vrot.lane.b32.xlu1 %v7154_v44, %s6262_s30  ;;  %s6270_s30 = smov 80  }
0x10ff   :  { %4547 = vrot.lane.b32.xlu1 %v7157_v45, %s6268_s25 }
0x1141   :  { %v4273_v63 = vpop.f32.mrb[68].mxu0 }
0x1142   :  { %v4274_v27 = vadd.f32 %v4273_v63, %v4072_v25  ;;  %v4275_v28 = vpop.f32.mrb[69].mxu0 }
0x1143   :  { %v4276_v18 = vadd.f32 %v4275_v28, %v4076_v61  ;;  %v4277_v11 = vpop.f32.mrb[70].mxu0 }
0x1144   :  { %6249 = vtanh.f32 %v4274_v27  ;;  %v4278_v13 = vpop.f32.mrb[71].mxu0 }
0x1145   :  { %6251 = vtanh.f32 %v4276_v18 }
0x114e   :  { %v6250_v44 = vpop.eup %6249 }
0x114f   :  { %v6252_v29 = vpop.eup %6251  ;;  %v4282_v45 = vpack.c.bf16 %v6250_v44, %v6250_v44 }
0x1150   :  { %v4283_v30 = vpack.c.bf16 %v6252_v29, %v6252_v29 }
0x1152   :  { %4449 = vmatprep.mubr.bf16.mxu1 %v4283_v30  ;;  %v4528_v38 = vpop.permute.xlu0 %4527 }
0x1153   :  { %4450 = vmatmul.mubr.bf16.vlgmr.msra.gmra.mrb[68].mxu1 %v4282_v45 }
0x116b   :  { %v4511_v32 = vpop.xlane.xlu1 %4510 }
0x116c   :  { %6253 = vrcp.f32 %v4511_v32 }
0x116f   :  { %v4520_v39 = vpop.permute.xlu1 %4519 }
0x1173   :  { %v4524_v42 = vpop.permute.xlu1 %4523 }
0x1176   :  { %v6254_v33 = vpop.eup %6253 }
0x1177   :  { %v4513_v50 = vmul.f32 %v6254_v33, %v6240_v57 }
0x1179   :  { %4535 = vrot.lane.b32.xlu0 %v4513_v50, %s6269_s13 }
0x117d   :  { %4543 = vrot.lane.b32.xlu0 %v7144_v10, %s6270_s30  ;;  %v4532_v10 = vpop.permute.xlu1 %4531 }
0x1181   :  { %v4540_v54 = vpop.permute.xlu1 %4539 }
0x1185   :  { %v4548_v62 = vpop.permute.xlu1 %4547 }
0x11eb   :  { %v4536_v48 = vpop.permute.xlu0 %4535 }
0x11ef   :  { %v4544_v12 = vpop.permute.xlu0 %4543 }
0x1226   :  { %v5425_v51 = vpop.f32.mrb[68].mxu1 }
0x1227   :  { %v5426_v1 = vpop.f32.mrb[69].mxu1 }
0x1228   :  { %v5427_v46 = vadd.f32 %v5426_v1, %v5425_v51  ;;  %v5428_v53 = vpop.f32.mrb[70].mxu1 }
0x1229   :  { %v5429_v55 = vpop.f32.mrb[71].mxu1 }
0x122a   :  { %v4452_v2 = vadd.f32 %v5427_v46, %v5227_v34 }
0x122c   :  { %v4457_v36 = vsub.f32 0.0, %v4452_v2 }
0x122e   :  { %v4458_v37 = vmul.f32 1.442695, %v4457_v36 }
0x1230   :  { %6255 = vpow2.f32 %v4458_v37 }
0x123a   :  { %v6256_v40 = vpop.eup %6255 }
0x123b   :  { %v4460_v41 = vadd.f32 1.0, %v6256_v40 }
0x123d   :  { %6257 = vrcp.f32 %v4460_v41 }
0x1247   :  { %v6258_v47 = vpop.eup %6257 }
0x1248   :  { %v4551_v52 = vsel %vm4550_vm5, %v6258_v47, %v4516_v43 }
0x1249   :  { %v4553_v56 = vsel %vm4552_vm6, %v4551_v52, %v4520_v39 }
0x124a   :  { %v4554_v0 = vsel %vm2229_vm2, %v4553_v56, %v4524_v42 }
0x124b   :  { %v4556_v58 = vsel %vm4555_vm7, %v4554_v0, %v4528_v38 }
0x124c   :  { %v4557_v59 = vsel %vm3834_vm4, %v4556_v58, %v4532_v10 }
0x124d   :  { %v4559_v60 = vsel %vm4558_vm8, %v4557_v59, %v4536_v48 }
0x124e   :  { %v4560_v26 = vsel %vm290_vm0, %v4559_v60, %v4540_v54 }
0x124f   :  { %v4562_v31 = vsel %vm4561_vm9, %v4560_v26, %v4544_v12 }
0x1250   :  { %v4564_v4 = vsel %vm4563_vm10, %v4562_v31, %v4548_v62 }
0x1251   :  { %v4566_v5 = vsel %vm4565_vm11, %v4564_v4, 0.0 }
0x1252   :  { %4567 = vst [vmem:[%s7873_s15] sm:$0xff] %v4566_v5 }

</bundles_post_ra>
